<compile_context>
chip_gen: v7x
topology: tpu7x:2x2x1
jax: 0.10.0
libtpu: 0.0.40
codegen_flags: <defaults>
</compile_context>

<pallas_src>
import jax
import jax.numpy as jnp
from jax.experimental import pallas as pl
from jax.experimental.pallas import tpu as pltpu


_MAX_SINGLE_STEP_K = 4096     # whole-K single grid step below this
_SUBLANE = 8                  # pad batch (M) to a multiple of this
_VMEM_CAP = 64 << 20          # <= physical VMEM on every generation (v7x: 64 MiB)


def _round_up(x, m):
    return (x + m - 1) // m * m


def _select_enc_tile(k_eff, max_single_step_k):
    """Encoder K tile: whole-K if small, else the candidate minimizing the
    zero-pad of the last tile (padded rows are dead DMA bytes / MXU passes)."""
    if k_eff <= max_single_step_k:
        return _round_up(k_eff, 128)
    # TODO(synk): sweep per generation (v7x tolerates 8192, v5e prefers <=2048).
    candidates = (2048, 2560, 3072, 3584, 4096)
    best_tk, best_pad = None, None
    for c in candidates:
        pad = _round_up(k_eff, c) - k_eff
        if best_pad is None or pad < best_pad or (pad == best_pad and c > best_tk):
            best_tk, best_pad = c, pad
    return best_tk


def _vmem_limit_bytes(block_bytes, scratch_bytes=0):
    """Explicit scoped-VMEM limit: 2x (double-buffered pipeline blocks) +
    scratch + headroom; never below the 32 MiB default, never above 64 MiB."""
    need = 2 * sum(block_bytes) + scratch_bytes
    need = need + need // 4 + (4 << 20)
    return int(min(max(need, 32 << 20), _VMEM_CAP))


# ----------------------------------------------------------------------------
# Kernels
# ----------------------------------------------------------------------------
def _fused_single_kernel(x_ref, enc_w_ref, d1_w_ref, d1_b_ref, d2_w_ref,
                         d2_b_ref, o_ref):
    # Whole K in one block: no scratch, no predication.
    feat = jnp.dot(x_ref[...], enc_w_ref[...], preferred_element_type=jnp.float32)
    h = jnp.dot(feat.astype(d1_w_ref.dtype), d1_w_ref[...],
                preferred_element_type=jnp.float32) + d1_b_ref[...]
    h = jnp.maximum(h, 0.0)
    out = jnp.dot(h.astype(d2_w_ref.dtype), d2_w_ref[...],
                  preferred_element_type=jnp.float32) + d2_b_ref[...]
    o_ref[...] = out.astype(o_ref.dtype)


def _fused_ktiled_kernel(x_ref, enc_w_ref, d1_w_ref, d1_b_ref, d2_w_ref,
                         d2_b_ref, o_ref, feat_acc):
    k = pl.program_id(0)

    @pl.when(k == 0)
    def _():
        feat_acc[...] = jnp.zeros_like(feat_acc)

    # Encoder projection (Normalize + bias already folded into enc_w rows).
    feat_acc[...] += jnp.dot(x_ref[...], enc_w_ref[...],
                             preferred_element_type=jnp.float32)

    @pl.when(k == pl.num_programs(0) - 1)
    def _():
        h = jnp.dot(feat_acc[...].astype(d1_w_ref.dtype), d1_w_ref[...],
                    preferred_element_type=jnp.float32) + d1_b_ref[...]
        h = jnp.maximum(h, 0.0)                                 # ReLU
        out = jnp.dot(h.astype(d2_w_ref.dtype), d2_w_ref[...],
                      preferred_element_type=jnp.float32) + d2_b_ref[...]
        o_ref[...] = out.astype(o_ref.dtype)


def _enc_dec1_kernel(x_ref, enc_w_ref, d1_w_ref, d1_b_ref, h_ref, feat_acc):
    k = pl.program_id(0)

    @pl.when(k == 0)
    def _():
        feat_acc[...] = jnp.zeros_like(feat_acc)

    feat_acc[...] += jnp.dot(x_ref[...], enc_w_ref[...],
                             preferred_element_type=jnp.float32)

    @pl.when(k == pl.num_programs(0) - 1)
    def _():
        h = jnp.dot(feat_acc[...].astype(d1_w_ref.dtype), d1_w_ref[...],
                    preferred_element_type=jnp.float32) + d1_b_ref[...]
        h_ref[...] = jnp.maximum(h, 0.0).astype(h_ref.dtype)


def _dec2_kernel(h_ref, d2_w_ref, d2_b_ref, o_ref):
    out = jnp.dot(h_ref[...], d2_w_ref[...],
                  preferred_element_type=jnp.float32) + d2_b_ref[...]
    o_ref[...] = out.astype(o_ref.dtype)


# ----------------------------------------------------------------------------
# pallas_call wrappers
# ----------------------------------------------------------------------------
def _fused_forward(x, p):
    """x: (B_pad, K_pad) bf16. One fused call: encoder + Linear/ReLU + Linear."""
    B_pad, K_pad = x.shape
    tk = p["tk"]
    F, hid = p["dec1_w"].shape
    n_pad = p["dec2_w"].shape[1]
    k_steps = K_pad // tk

    in_specs = [
        pl.BlockSpec((B_pad, tk), lambda k: (0, k)),      # x        (K-streamed)
        pl.BlockSpec((tk, F), lambda k: (k, 0)),          # enc_w    (K-streamed)
        pl.BlockSpec((F, hid), lambda k: (0, 0)),         # dec1_w   (VMEM-resident)
        pl.BlockSpec((1, hid), lambda k: (0, 0)),         # dec1_b
        pl.BlockSpec((hid, n_pad), lambda k: (0, 0)),     # dec2_w   (VMEM-resident)
        pl.BlockSpec((1, n_pad), lambda k: (0, 0)),       # dec2_b
    ]
    out_spec = pl.BlockSpec((B_pad, n_pad), lambda k: (0, 0))
    block_bytes = [B_pad * tk * 2, tk * F * 2, F * hid * 2, hid * 4,
                   hid * n_pad * 2, n_pad * 4, B_pad * n_pad * 4]

    if k_steps == 1:
        kernel, scratch, scratch_bytes = _fused_single_kernel, [], 0
    else:
        kernel = _fused_ktiled_kernel
        scratch = [pltpu.VMEM((B_pad, F), jnp.float32)]
        scratch_bytes = B_pad * F * 4

    return pl.pallas_call(
        kernel,
        out_shape=jax.ShapeDtypeStruct((B_pad, n_pad), jnp.float32),
        grid_spec=pltpu.PrefetchScalarGridSpec(
            num_scalar_prefetch=0,
            grid=(k_steps,),
            in_specs=in_specs,
            out_specs=out_spec,
            scratch_shapes=scratch,
        ),
        compiler_params=pltpu.CompilerParams(
            dimension_semantics=("arbitrary",),           # K is a reduction
            vmem_limit_bytes=_vmem_limit_bytes(block_bytes, scratch_bytes),
        ),
    )(x, p["enc_w"], p["dec1_w"], p["dec1_b"], p["dec2_w"], p["dec2_b"])


def _encoder_dec1_forward(x, p):
    """Split path, stage 1: encoder (K-streamed) + Linear(512,1024)+ReLU -> h."""
    B_pad, K_pad = x.shape
    tk = p["tk"]
    F, hid = p["dec1_w"].shape
    k_steps = K_pad // tk
    block_bytes = [B_pad * tk * 2, tk * F * 2, F * hid * 2, hid * 4,
                   B_pad * hid * 2]
    return pl.pallas_call(
        _enc_dec1_kernel,
        out_shape=jax.ShapeDtypeStruct((B_pad, hid), jnp.bfloat16),
        grid_spec=pltpu.PrefetchScalarGridSpec(
            num_scalar_prefetch=0,
            grid=(k_steps,),
            in_specs=[
                pl.BlockSpec((B_pad, tk), lambda k: (0, k)),
                pl.BlockSpec((tk, F), lambda k: (k, 0)),
                pl.BlockSpec((F, hid), lambda k: (0, 0)),
                pl.BlockSpec((1, hid), lambda k: (0, 0)),
            ],
            out_specs=pl.BlockSpec((B_pad, hid), lambda k: (0, 0)),
            scratch_shapes=[pltpu.VMEM((B_pad, F), jnp.float32)],
        ),
        compiler_params=pltpu.CompilerParams(
            dimension_semantics=("arbitrary",),
            vmem_limit_bytes=_vmem_limit_bytes(block_bytes, B_pad * F * 4),
        ),
    )(x, p["enc_w"], p["dec1_w"], p["dec1_b"])


def _dec2_forward(h, p):
    """Split path, stage 2: Linear(1024, n_points*3), dec2_w streamed by N tile.
    N tiles are independent -> "parallel" grid axis (megacore shards it)."""
    B_pad, hid = h.shape
    n_pad = p["dec2_w"].shape[1]
    tn = p["tn"]
    n_steps = n_pad // tn
    block_bytes = [B_pad * hid * 2, hid * tn * 2, tn * 4, B_pad * tn * 4]
    return pl.pallas_call(
        _dec2_kernel,
        out_shape=jax.ShapeDtypeStruct((B_pad, n_pad), jnp.float32),
        grid_spec=pltpu.PrefetchScalarGridSpec(
            num_scalar_prefetch=0,
            grid=(n_steps,),
            in_specs=[
                pl.BlockSpec((B_pad, hid), lambda n: (0, 0)),   # h (VMEM-resident)
                pl.BlockSpec((hid, tn), lambda n: (0, n)),      # dec2_w (N-streamed)
                pl.BlockSpec((1, tn), lambda n: (0, n)),        # dec2_b
            ],
            out_specs=pl.BlockSpec((B_pad, tn), lambda n: (0, n)),
        ),
        compiler_params=pltpu.CompilerParams(
            dimension_semantics=("parallel",),
            vmem_limit_bytes=_vmem_limit_bytes(block_bytes),
        ),
    )(h, p["dec2_w"], p["dec2_b"])


# ----------------------------------------------------------------------------
# Parameter construction (deterministic, synthetic — NOT a checkpoint load).
# ----------------------------------------------------------------------------
def init_params(key, *, img_hw, img_c, feat_dim, hidden_dim, n_points):
    k_enc, k_d1, k_d2 = jax.random.split(key, 3)
    enc_in = img_c * img_hw * img_hw  # flattened NCHW image
    scale = 0.02
    return {
        "enc_w": scale * jax.random.normal(k_enc, (enc_in, feat_dim), jnp.float32),
        "enc_b": jnp.zeros((feat_dim,), jnp.float32),
        "dec1_w": scale * jax.random.normal(k_d1, (feat_dim, hidden_dim), jnp.float32),
        "dec1_b": jnp.zeros((hidden_dim,), jnp.float32),
        "dec2_w": scale * jax.random.normal(k_d2, (hidden_dim, n_points * 3), jnp.float32),
        "dec2_b": jnp.zeros((n_points * 3,), jnp.float32),
        "mean": jnp.array([0.485, 0.456, 0.406], jnp.float32),
        "std": jnp.array([0.229, 0.224, 0.225], jnp.float32),
    }


def prepare_inference_params(params, *, img_hw, img_c, n_points,
                             max_single_step_k=_MAX_SINGLE_STEP_K,
                             enc_k_tile=None,
                             dec2_resident_cols_max=4096,
                             dec2_tile_cols=2048):
    """One-time parameter prep:
      * transforms.Normalize folded into the encoder projection (f32 math),
      * encoder weight rows re-ordered to NHWC-flatten order (no runtime transpose),
      * encoder bias folded in as an extra row driven by a ones-column of x,
      * K zero-padded to the streaming tile; dec2 output padded lane-dense,
      * streamed weights cast to bf16 (f32 MXU accumulation in-kernel)."""
    H = W = img_hw
    C = img_c
    F = params["enc_w"].shape[1]
    hid = params["dec1_w"].shape[1]

    inv_std = 1.0 / params["std"]                                 # (C,)
    inv_std_rows = jnp.repeat(inv_std, H * W)                     # NCHW row order
    mean_over_std_rows = jnp.repeat(params["mean"] * inv_std, H * W)

    # ((x - mean)/std) @ W + b  ==  x @ (W * inv_std_rows) + (b - (mean/std) @ W)
    enc_w_folded = params["enc_w"] * inv_std_rows[:, None]
    enc_b_folded = params["enc_b"] - mean_over_std_rows @ params["enc_w"]

    # Re-order rows NCHW-flatten -> NHWC-flatten so raw NHWC images feed the
    # kernel with no transpose in the forward path.
    enc_w_nhwc = (
        enc_w_folded.reshape(C, H, W, F).transpose(1, 2, 0, 3).reshape(H * W * C, F)
    )
    # Encoder bias becomes one extra weight row (driven by a ones-column of x).
    enc_w_aug = jnp.concatenate([enc_w_nhwc, enc_b_folded.reshape(1, F)], axis=0)

    k_eff = H * W * C + 1
    tk = int(enc_k_tile) if enc_k_tile is not None else _select_enc_tile(
        k_eff, max_single_step_k)
    k_pad = _round_up(k_eff, tk)
    enc_w_aug = jnp.pad(enc_w_aug, ((0, k_pad - k_eff), (0, 0)))

    # dec2 output columns: lane-dense padding; split the decoder into its own
    # "parallel" pallas_call only when the resident dec2 weight would bloat VMEM.
    n_out = n_points * 3
    n_resident = _round_up(n_out, 128)
    split = n_resident > dec2_resident_cols_max
    tn = int(dec2_tile_cols) if split else n_resident
    assert tn % 128 == 0
    n_pad = _round_up(n_out, tn)
    dec2_w = jnp.pad(params["dec2_w"], ((0, 0), (0, n_pad - n_out)))
    dec2_b = jnp.pad(params["dec2_b"], ((0, n_pad - n_out),))

    return {
        "enc_w": enc_w_aug.astype(jnp.bfloat16),
        "dec1_w": params["dec1_w"].astype(jnp.bfloat16),
        "dec1_b": params["dec1_b"].reshape(1, hid).astype(jnp.float32),
        "dec2_w": dec2_w.astype(jnp.bfloat16),
        "dec2_b": dec2_b.reshape(1, n_pad).astype(jnp.float32),
        "tk": int(tk),
        "tn": int(tn),
        "split": bool(split),
    }


# ----------------------------------------------------------------------------
# Forward pass (args.type == 'point')
# ----------------------------------------------------------------------------
def single_view_to_3d_point(images_nhwc, prep, *, n_points):
    B = images_nhwc.shape[0]
    K_pad = prep["enc_w"].shape[0]

    # Raw NHWC pixels + a ones-column (drives the folded encoder-bias row).
    x = images_nhwc.reshape(B, -1).astype(jnp.bfloat16)
    x = jnp.concatenate([x, jnp.ones((B, 1), jnp.bfloat16)], axis=1)

    # Pad M (batch) to a sublane multiple: extra rows ride the same HBM weight
    # stream essentially for free and make every store sublane-dense.
    B_pad = _round_up(max(B, _SUBLANE), _SUBLANE)
    x = jnp.pad(x, ((0, B_pad - B), (0, K_pad - x.shape[1])))

    if prep["split"]:
        h = _encoder_dec1_forward(x, prep)     # (B_pad, 1024) bf16 (tiny roundtrip)
        out_pad = _dec2_forward(h, prep)       # (B_pad, n_pad) f32, N-tiled parallel
    else:
        out_pad = _fused_forward(x, prep)      # one fused call, all activations in VMEM

    pts = out_pad[:B, : n_points * 3]
    return pts.reshape(-1, n_points, 3)        # Reshape((-1, n_points, 3))


# Pure-JAX reference of the original pipeline (f32), for a correctness check.
def reference_forward(images_nhwc, params, *, n_points):
    B, H, W, C = images_nhwc.shape
    x = jnp.transpose(images_nhwc, (0, 3, 1, 2))
    x = (x - params["mean"].reshape(1, C, 1, 1)) / params["std"].reshape(1, C, 1, 1)
    x = x.reshape(B, C * H * W)
    feat = x @ params["enc_w"] + params["enc_b"]
    h = jnp.maximum(feat @ params["dec1_w"] + params["dec1_b"], 0.0)
    pts = h @ params["dec2_w"] + params["dec2_b"]
    return pts.reshape(-1, n_points, 3)


if __name__ == "__main__":
    B, H, W, C = 2, 16, 16, 3
    FEAT, HIDDEN = 512, 1024

    key = jax.random.PRNGKey(0)
    k_img, k_par1, k_par2 = jax.random.split(key, 3)
    images = jax.random.uniform(k_img, (B, H, W, C), jnp.float32)  # NHWC in [0,1]

    # --- Test 1: fused path, whole-K single-step kernel (the common small case)
    n_points = 64
    params = init_params(k_par1, img_hw=H, img_c=C, feat_dim=FEAT,
                         hidden_dim=HIDDEN, n_points=n_points)
    prep = prepare_inference_params(params, img_hw=H, img_c=C, n_points=n_points)
    pred = jax.block_until_ready(single_view_to_3d_point(images, prep, n_points=n_points))
    assert pred.shape == (B, n_points, 3), pred.shape
    assert pred.dtype == jnp.float32
    assert bool(jnp.all(jnp.isfinite(pred)))
    ref = reference_forward(images, params, n_points=n_points)
    err1 = float(jnp.max(jnp.abs(pred - ref)))
    assert err1 < 5e-2, f"fused single-step max abs err: {err1}"

    # --- Test 2: fused path, K-tiled accumulation (forced small K tile)
    prep_kt = prepare_inference_params(params, img_hw=H, img_c=C,
                                       n_points=n_points, enc_k_tile=256)
    pred_kt = jax.block_until_ready(
        single_view_to_3d_point(images, prep_kt, n_points=n_points))
    err2 = float(jnp.max(jnp.abs(pred_kt - ref)))
    assert err2 < 5e-2, f"fused K-tiled max abs err: {err2}"

    # --- Test 3: split path (K-tiled encoder + N-tiled "parallel" dec2), forced small tiles
    n_points_b = 96
    params_b = init_params(k_par2, img_hw=H, img_c=C, feat_dim=FEAT,
                           hidden_dim=HIDDEN, n_points=n_points_b)
    prep_split = prepare_inference_params(
        params_b, img_hw=H, img_c=C, n_points=n_points_b,
        enc_k_tile=256, dec2_resident_cols_max=128, dec2_tile_cols=128)
    assert prep_split["split"]
    pred_b = jax.block_until_ready(
        single_view_to_3d_point(images, prep_split, n_points=n_points_b))
    assert pred_b.shape == (B, n_points_b, 3), pred_b.shape
    ref_b = reference_forward(images, params_b, n_points=n_points_b)
    err3 = float(jnp.max(jnp.abs(pred_b - ref_b)))
    assert err3 < 5e-2, f"split-path max abs err: {err3}"

    print("KERNEL_OK")
</pallas_src>

<mosaic_0001>
module attributes {stable_mosaic.version = 11 : i64} {
  func.func @_fused_single_kernel(%arg0: i32, %arg1: memref<8x896xbf16, #tpu.memory_space<vmem>>, %arg2: memref<896x512xbf16, #tpu.memory_space<vmem>>, %arg3: memref<512x1024xbf16, #tpu.memory_space<vmem>>, %arg4: memref<1x1024xf32, #tpu.memory_space<vmem>>, %arg5: memref<1024x256xbf16, #tpu.memory_space<vmem>>, %arg6: memref<1x256xf32, #tpu.memory_space<vmem>>, %arg7: memref<8x256xf32, #tpu.memory_space<vmem>>) attributes {dimension_semantics = [#tpu.dimension_semantics<arbitrary>], iteration_bounds = array<i64: 1>, scalar_prefetch = 0 : i64, scratch_operands = 0 : i64, tpu.core_type = #tpu.core_type<tc>, window_params = [{transform_indices = @transform_0, window_bounds = array<i64: 8, 896>}, {transform_indices = @transform_1, window_bounds = array<i64: 896, 512>}, {pipeline_mode = #tpu.pipeline_mode<synchronous>, transform_indices = @transform_2, window_bounds = array<i64: 512, 1024>}, {pipeline_mode = #tpu.pipeline_mode<synchronous>, transform_indices = @transform_3, window_bounds = array<i64: 1, 1024>}, {pipeline_mode = #tpu.pipeline_mode<synchronous>, transform_indices = @transform_4, window_bounds = array<i64: 1024, 256>}, {pipeline_mode = #tpu.pipeline_mode<synchronous>, transform_indices = @transform_5, window_bounds = array<i64: 1, 256>}, {pipeline_mode = #tpu.pipeline_mode<synchronous>, transform_indices = @transform_6, window_bounds = array<i64: 8, 256>}]} {
    %c0 = arith.constant 0 : index
    %c0_0 = arith.constant 0 : index
    %0 = vector.load %arg1[%c0, %c0_0] : memref<8x896xbf16, #tpu.memory_space<vmem>>, vector<8x896xbf16>
    %c0_1 = arith.constant 0 : index
    %c0_2 = arith.constant 0 : index
    %1 = vector.load %arg2[%c0_1, %c0_2] : memref<896x512xbf16, #tpu.memory_space<vmem>>, vector<896x512xbf16>
    %cst = arith.constant dense<0.000000e+00> : vector<8x512xf32>
    %2 = tpu.matmul %0, %1, %cst {dimension_numbers = #tpu.dot_dimension_numbers<[1], [0], [0], [1], [0, 0, 1, 1], [], []>} : vector<8x896xbf16>, vector<896x512xbf16>, vector<8x512xf32> -> vector<8x512xf32>
    %3 = arith.truncf %2 : vector<8x512xf32> to vector<8x512xbf16>
    %c0_3 = arith.constant 0 : index
    %c0_4 = arith.constant 0 : index
    %4 = vector.load %arg3[%c0_3, %c0_4] : memref<512x1024xbf16, #tpu.memory_space<vmem>>, vector<512x1024xbf16>
    %cst_5 = arith.constant dense<0.000000e+00> : vector<8x1024xf32>
    %5 = tpu.matmul %3, %4, %cst_5 {dimension_numbers = #tpu.dot_dimension_numbers<[1], [0], [0], [1], [0, 0, 1, 1], [], []>} : vector<8x512xbf16>, vector<512x1024xbf16>, vector<8x1024xf32> -> vector<8x1024xf32>
    %c0_6 = arith.constant 0 : index
    %c0_7 = arith.constant 0 : index
    %6 = vector.load %arg4[%c0_6, %c0_7] : memref<1x1024xf32, #tpu.memory_space<vmem>>, vector<1x1024xf32>
    %7 = vector.broadcast %6 : vector<1x1024xf32> to vector<8x1024xf32>
    %8 = arith.addf %5, %7 : vector<8x1024xf32>
    %cst_8 = arith.constant 0.000000e+00 : f32
    %9 = vector.broadcast %cst_8 : f32 to vector<8x1024xf32>
    %10 = arith.maximumf %8, %9 : vector<8x1024xf32>
    %11 = arith.truncf %10 : vector<8x1024xf32> to vector<8x1024xbf16>
    %c0_9 = arith.constant 0 : index
    %c0_10 = arith.constant 0 : index
    %12 = vector.load %arg5[%c0_9, %c0_10] : memref<1024x256xbf16, #tpu.memory_space<vmem>>, vector<1024x256xbf16>
    %cst_11 = arith.constant dense<0.000000e+00> : vector<8x256xf32>
    %13 = tpu.matmul %11, %12, %cst_11 {dimension_numbers = #tpu.dot_dimension_numbers<[1], [0], [0], [1], [0, 0, 1, 1], [], []>} : vector<8x1024xbf16>, vector<1024x256xbf16>, vector<8x256xf32> -> vector<8x256xf32>
    %c0_12 = arith.constant 0 : index
    %c0_13 = arith.constant 0 : index
    %14 = vector.load %arg6[%c0_12, %c0_13] : memref<1x256xf32, #tpu.memory_space<vmem>>, vector<1x256xf32>
    %15 = vector.broadcast %14 : vector<1x256xf32> to vector<8x256xf32>
    %16 = arith.addf %13, %15 : vector<8x256xf32>
    %c0_14 = arith.constant 0 : index
    %c0_15 = arith.constant 0 : index
    %17 = vector.load %arg7[%c0_14, %c0_15] : memref<8x256xf32, #tpu.memory_space<vmem>>, vector<8x256xf32>
    tpu.vector_store %arg7[%c0_14, %c0_15], %16 {strides = array<i32>} : memref<8x256xf32, #tpu.memory_space<vmem>>, vector<8x256xf32>,
    return
  }
  func.func @transform_0(%arg0: i32) -> (i32, i32) {
    %c0_i32 = arith.constant 0 : i32
    %c0_i32_0 = arith.constant 0 : i32
    return %c0_i32, %arg0 : i32, i32
  }
  func.func @transform_1(%arg0: i32) -> (i32, i32) {
    %c0_i32 = arith.constant 0 : i32
    %c0_i32_0 = arith.constant 0 : i32
    return %arg0, %c0_i32 : i32, i32
  }
  func.func @transform_2(%arg0: i32) -> (i32, i32) {
    %c0_i32 = arith.constant 0 : i32
    %c0_i32_0 = arith.constant 0 : i32
    %c0_i32_1 = arith.constant 0 : i32
    return %c0_i32, %c0_i32_0 : i32, i32
  }
  func.func @transform_3(%arg0: i32) -> (i32, i32) {
    %c0_i32 = arith.constant 0 : i32
    %c0_i32_0 = arith.constant 0 : i32
    %c0_i32_1 = arith.constant 0 : i32
    return %c0_i32, %c0_i32_0 : i32, i32
  }
  func.func @transform_4(%arg0: i32) -> (i32, i32) {
    %c0_i32 = arith.constant 0 : i32
    %c0_i32_0 = arith.constant 0 : i32
    %c0_i32_1 = arith.constant 0 : i32
    return %c0_i32, %c0_i32_0 : i32, i32
  }
  func.func @transform_5(%arg0: i32) -> (i32, i32) {
    %c0_i32 = arith.constant 0 : i32
    %c0_i32_0 = arith.constant 0 : i32
    %c0_i32_1 = arith.constant 0 : i32
    return %c0_i32, %c0_i32_0 : i32, i32
  }
  func.func @transform_6(%arg0: i32) -> (i32, i32) {
    %c0_i32 = arith.constant 0 : i32
    %c0_i32_0 = arith.constant 0 : i32
    %c0_i32_1 = arith.constant 0 : i32
    return %c0_i32, %c0_i32_0 : i32, i32
  }
}

</mosaic_0001>

<bundles_post_ra>
// kernel: tpu_custom_call.1
= control target key start
LH: loop header
LB: loop body
LE: loop exit
PB: predicated region body
PF: predicated region fallthrough
CT: control target
= control target key end

     0   :  { %11 = vsyncpa [#allocation3], 0  ;;  %s6242_s0 = inlined_call_operand.hbm [shape: bf16[8,896], index: 0, kind: input, shape index: {}]   ;;  %s6243_s1 = inlined_call_operand.hbm [shape: bf16[896,512], index: 1, kind: input, shape index: {}]   ;;  %s6244_s2 = inlined_call_operand.hbm [shape: bf16[512,1024], index: 2, kind: input, shape index: {}]   ;;  %s6245_s3 = inlined_call_operand.vmem [shape: f32[1,1024], index: 3, kind: input, shape index: {}]   ;;  %s6246_s4 = inlined_call_operand.hbm [shape: bf16[1024,256], index: 4, kind: input, shape index: {}]   ;;  %s6247_s5 = inlined_call_operand.vmem [shape: f32[1,256], index: 5, kind: input, shape index: {}]   ;;  %s6248_s6 = inlined_call_operand.hbm [shape: f32[8,256], index: 6, kind: output, shape index: {}]  }
   0x1   :  { %12 = vsyncpa [#allocation6], 0 }
   0x2   :  { %13 = vsyncpa [#allocation9], 0 }
   0x3   :  { %14 = vsyncpa [#allocation4], 0  ;;  %s6009_s21 = smov [#allocation5]   ;;  %s5891_s25 = scalar_lea.hbm %s6243_s1, 28672 }
   0x4   :  { %s30_s22 = sshll.u32 %s6009_s21, 4  ;;  %p5892_p0 = scmp.ne.s32.totalorder %s6243_s1, %s5891_s25  ;;  %s31_s22 = int_to_ptr.vmem [resolvable:$true] %s30_s22 }
   0x5   :  { %p5895_p1 = scmp.lt.u32.totalorder %s5891_s25, %s6243_s1 }
   0x7   :  { %p5897_p2 = pnand %p5895_p1, %p5892_p0 }
   0x9   :  { %5900 = shalt.err (!%p5897_p2)
}
   0xa   :  { %s5901_s30 = scalar_lea.vmem %s31_s22, 28672  ;;  %p5906_p4 = scmp.lt.s32.totalorder %s31_s22, %s31_s22 }
   0xb   :  { %p5902_p3 = scmp.ne.s32.totalorder %s31_s22, %s5901_s30  ;;  %p5907_p5 = scmp.lt.s32.totalorder %s5901_s30, %s5901_s30 }
   0xd   :  { %p5908_p6 = por %p5907_p5, %p5906_p4 }
   0xf   :  { %p5909_p7 = pnand %p5908_p6, %p5902_p3 }
  0x11   :  { %5912 = shalt.err (!%p5909_p7)
}
  0x12   :  { %s6010_s7 = smov 256   ;;  %s6011_s8 = smov 16  }
  0x13   :  { %36 = dma.hbm_to_vmem [thread:$0]  %s6243_s1, 28672, %s31_s22, [#allocation6], %s6010_s7, %s6010_s7, %s6011_s8  }
  0x14   :  { %s6012_s11 = smov [#allocation2]   ;;  %s6013_s13 = smov [#allocation7]  }
  0x15   :  { %s21_s12 = sshll.u32 %s6012_s11, 4  ;;  %s42_s14 = sshll.u32 %s6013_s13, 4  ;;  %s22_s12 = int_to_ptr.vmem [resolvable:$true] %s21_s12  ;;  %s43_s14 = int_to_ptr.vmem [resolvable:$true] %s42_s14 }
  0x16   :  { %s5913_s17 = scalar_lea.hbm %s6242_s0, 448 }
  0x17   :  { %p5914_p8 = scmp.ne.s32.totalorder %s6242_s0, %s5913_s17  ;;  %p5917_p9 = scmp.lt.u32.totalorder %s5913_s17, %s6242_s0 }
  0x19   :  { %p5919_p10 = pnand %p5917_p9, %p5914_p8 }
  0x1b   :  { %5922 = shalt.err (!%p5919_p10)
}
  0x1c   :  { %s5923_s1 = scalar_lea.vmem %s22_s12, 448  ;;  %p5928_p12 = scmp.lt.s32.totalorder %s22_s12, %s22_s12 }
  0x1d   :  { %p5924_p11 = scmp.ne.s32.totalorder %s22_s12, %s5923_s1  ;;  %p5929_p13 = scmp.lt.s32.totalorder %s5923_s1, %s5923_s1 }
  0x1f   :  { %p5930_p0 = por %p5929_p13, %p5928_p12 }
  0x21   :  { %p5931_p1 = pnand %p5930_p0, %p5924_p11 }
  0x23   :  { %5934 = shalt.err (!%p5931_p1)
}
  0x24   :  { %24 = dma.hbm_to_vmem [thread:$0]  %s6242_s0, 448, %s22_s12, [#allocation3]  }
  0x25   :  { %s5935_s26 = scalar_lea.hbm %s6244_s2, 32768 }
  0x26   :  { %p5936_p2 = scmp.ne.s32.totalorder %s6244_s2, %s5935_s26  ;;  %p5939_p3 = scmp.lt.u32.totalorder %s5935_s26, %s6244_s2 }
  0x28   :  { %p5941_p4 = pnand %p5939_p3, %p5936_p2 }
  0x2a   :  { %5944 = shalt.err (!%p5941_p4)
}
  0x2b   :  { %s5945_s7 = scalar_lea.vmem %s43_s14, 32768  ;;  %p5950_p6 = scmp.lt.s32.totalorder %s43_s14, %s43_s14 }
  0x2c   :  { %p5946_p5 = scmp.ne.s32.totalorder %s43_s14, %s5945_s7  ;;  %p5951_p7 = scmp.lt.s32.totalorder %s5945_s7, %s5945_s7 }
  0x2e   :  { %p5952_p8 = por %p5951_p7, %p5950_p6 }
  0x30   :  { %p5953_p9 = pnand %p5952_p8, %p5946_p5 }
  0x32   :  { %5956 = shalt.err (!%p5953_p9)
}
  0x33   :  { %s6014_s0 = smov 512   ;;  %s6015_s8 = smov 32  }
  0x34   :  { %48 = dma.hbm_to_vmem [thread:$0]  %s6244_s2, 32768, %s43_s14, [#allocation6], %s6014_s0, %s6014_s0, %s6015_s8  }
  0x35   :  { %s6016_s11 = smov [#allocation8]   ;;  %s5957_s16 = scalar_lea.hbm %s6246_s4, 16384 }
  0x36   :  { %s56_s12 = sshll.u32 %s6016_s11, 4  ;;  %p5958_p10 = scmp.ne.s32.totalorder %s6246_s4, %s5957_s16  ;;  %s57_s12 = int_to_ptr.vmem [resolvable:$true] %s56_s12 }
  0x37   :  { %p5961_p11 = scmp.lt.u32.totalorder %s5957_s16, %s6246_s4 }
  0x39   :  { %p5963_p12 = pnand %p5961_p11, %p5958_p10 }
  0x3b   :  { %5966 = shalt.err (!%p5963_p12)
}
  0x3c   :  { %s5967_s21 = scalar_lea.vmem %s57_s12, 16384  ;;  %p5972_p0 = scmp.lt.s32.totalorder %s57_s12, %s57_s12 }
  0x3d   :  { %p5968_p13 = scmp.ne.s32.totalorder %s57_s12, %s5967_s21  ;;  %p5973_p1 = scmp.lt.s32.totalorder %s5967_s21, %s5967_s21 }
  0x3f   :  { %p5974_p2 = por %p5973_p1, %p5972_p0 }
  0x41   :  { %p5975_p3 = pnand %p5974_p2, %p5968_p13 }
  0x43   :  { %5978 = shalt.err (!%p5975_p3)
}
  0x44   :  { %s6017_s2 = smov 128   ;;  %s6018_s14 = smov 8  }
  0x45   :  { %62 = dma.hbm_to_vmem [thread:$0]  %s6246_s4, 16384, %s57_s12, [#allocation9], %s6017_s2, %s6017_s2, %s6018_s14  }
  0x46   :  { %6001 = dma.done.wait [#allocation3], 448  }
  0x47   :  { %6002 = vsyncadd [#allocation3], 4294966848 }
  0x48   :  { %6003 = dma.done.wait [#allocation6], 61440  }
  0x49   :  { %6004 = vsyncadd [#allocation6], 4294905856 }
  0x4a   :  { %6005 = dma.done.wait [#allocation9], 16384  }
  0x4b   :  { %6006 = vsyncadd [#allocation9], 4294950912  ;;  %v5355_v0 = vld [vmem:[#allocation5 + $0x4] ss:$16 sps:$4 sm:$0xff]   ;;  %v5357_v1 = vld [vmem:[#allocation5] ss:$16 sps:$4 sm:$0xff]  }
  0x4c   :  { %1451 = vmatprep.subr.bf16.mxu1 %v5355_v0  ;;  %v5358_v2 = vld [vmem:[#allocation5 + $0x24] ss:$16 sps:$4 sm:$0xff]   ;;  %v5360_v3 = vld [vmem:[#allocation5 + $0x20] ss:$16 sps:$4 sm:$0xff]   ;;  %s6020_s25 = smov [#allocation10]  }
  0x4d   :  { %1452 = vmatpush1.bf16.msra.mxu1 %v5357_v1  ;;  %v5361_v4 = vld [vmem:[#allocation5 + $0x44] ss:$16 sps:$4 sm:$0xff]   ;;  %v5363_v5 = vld [vmem:[#allocation5 + $0x40] ss:$16 sps:$4 sm:$0xff]   ;;  %s4657_s26 = sshll.u32 %s6020_s25, 4  ;;  %s4658_s26 = int_to_ptr.vmem [resolvable:$true] %s4657_s26 }
  0x4e   :  { %1453 = vmatprep.subr.bf16.mxu1 %v5358_v2  ;;  %v5364_v6 = vld [vmem:[#allocation5 + $0x64] ss:$16 sps:$4 sm:$0xff]   ;;  %v5366_v7 = vld [vmem:[#allocation5 + $0x60] ss:$16 sps:$4 sm:$0xff]   ;;  %s5979_s27 = scalar_lea.vmem %s4658_s26, 256  ;;  %p5984_p5 = scmp.lt.s32.totalorder %s4658_s26, %s4658_s26 }
  0x4f   :  { %v5367_v8 = vld [vmem:[#allocation5 + $0x84] ss:$16 sps:$4 sm:$0xff]   ;;  %v5384_v10 = vld [vmem:[#allocation5 + $0x400] ss:$16 sps:$4 sm:$0xff]   ;;  %p5980_p4 = scmp.ne.s32.totalorder %s4658_s26, %s5979_s27  ;;  %p5985_p6 = scmp.lt.s32.totalorder %s5979_s27, %s5979_s27 }
  0x50   :  { %v5381_v9 = vld [vmem:[#allocation5 + $0x404] ss:$16 sps:$4 sm:$0xff]   ;;  %v5369_v11 = vld [vmem:[#allocation5 + $0x80] ss:$16 sps:$4 sm:$0xff]  }
  0x51   :  { %1454 = vmatpush1.bf16.msra.mxu1 %v5360_v3  ;;  %1533 = vmatprep.subr.bf16.mxu0 %v5381_v9  ;;  %v5387_v12 = vld [vmem:[#allocation5 + $0x424] ss:$16 sps:$4 sm:$0xff]   ;;  %v5390_v13 = vld [vmem:[#allocation5 + $0x420] ss:$16 sps:$4 sm:$0xff]   ;;  %p5986_p7 = por %p5985_p6, %p5984_p5 }
  0x52   :  { %1455 = vmatprep.subr.bf16.mxu1 %v5361_v4  ;;  %1534 = vmatpush1.bf16.msra.mxu0 %v5384_v10  ;;  %v5370_v14 = vld [vmem:[#allocation5 + $0xa4] ss:$16 sps:$4 sm:$0xff]   ;;  %v5372_v16 = vld [vmem:[#allocation5 + $0xa0] ss:$16 sps:$4 sm:$0xff]  }
  0x53   :  { %1535 = vmatprep.subr.bf16.mxu0 %v5387_v12  ;;  %v5393_v15 = vld [vmem:[#allocation5 + $0x444] ss:$16 sps:$4 sm:$0xff]   ;;  %v5396_v17 = vld [vmem:[#allocation5 + $0x440] ss:$16 sps:$4 sm:$0xff]   ;;  %p5987_p8 = pnand %p5986_p7, %p5980_p4 }
  0x54   :  { %v5373_v18 = vld [vmem:[#allocation5 + $0xc4] ss:$16 sps:$4 sm:$0xff]   ;;  %v5375_v20 = vld [vmem:[#allocation5 + $0xc0] ss:$16 sps:$4 sm:$0xff]  }
  0x55   :  { %1456 = vmatpush1.bf16.msra.mxu1 %v5363_v5  ;;  %v5399_v19 = vld [vmem:[#allocation5 + $0x464] ss:$16 sps:$4 sm:$0xff]   ;;  %v5402_v22 = vld [vmem:[#allocation5 + $0x460] ss:$16 sps:$4 sm:$0xff]  }
  0x56   :  { %1457 = vmatprep.subr.bf16.mxu1 %v5364_v6  ;;  %1536 = vmatpush1.bf16.msra.mxu0 %v5390_v13  ;;  %v5376_v21 = vld [vmem:[#allocation5 + $0xe4] ss:$16 sps:$4 sm:$0xff]   ;;  %v5378_v24 = vld [vmem:[#allocation5 + $0xe0] ss:$16 sps:$4 sm:$0xff]  }
  0x57   :  { %1537 = vmatprep.subr.bf16.mxu0 %v5393_v15  ;;  %v5405_v23 = vld [vmem:[#allocation5 + $0x484] ss:$16 sps:$4 sm:$0xff]   ;;  %v5408_v25 = vld [vmem:[#allocation5 + $0x480] ss:$16 sps:$4 sm:$0xff]  }
  0x58   :  { %v5379_v26 = vld [vmem:[#allocation5 + $0x104] ss:$16 sps:$4 sm:$0xff]   ;;  %v5383_v28 = vld [vmem:[#allocation5 + $0x100] ss:$16 sps:$4 sm:$0xff]  }
  0x59   :  { %1458 = vmatpush1.bf16.msra.mxu1 %v5366_v7  ;;  %v5411_v27 = vld [vmem:[#allocation5 + $0x4a4] ss:$16 sps:$4 sm:$0xff]   ;;  %v5414_v30 = vld [vmem:[#allocation5 + $0x4a0] ss:$16 sps:$4 sm:$0xff]  }
  0x5a   :  { %1459 = vmatprep.subr.bf16.mxu1 %v5367_v8  ;;  %1538 = vmatpush1.bf16.msra.mxu0 %v5396_v17  ;;  %v5385_v29 = vld [vmem:[#allocation5 + $0x124] ss:$16 sps:$4 sm:$0xff]   ;;  %v5389_v34 = vld [vmem:[#allocation5 + $0x120] ss:$16 sps:$4 sm:$0xff]  }
  0x5b   :  { %1539 = vmatprep.subr.bf16.mxu0 %v5399_v19  ;;  %v5417_v31 = vld [vmem:[#allocation5 + $0x4c4] ss:$16 sps:$4 sm:$0xff]   ;;  %v5420_v36 = vld [vmem:[#allocation5 + $0x4c0] ss:$16 sps:$4 sm:$0xff]  }
  0x5c   :  { %v78_v32 = vld [vmem:[#allocation2] sm:$0xff]  ;;  %v5395_v38 = vld [vmem:[#allocation5 + $0x140] ss:$16 sps:$4 sm:$0xff]   ;;  %v80_v56 = vld [vmem:[#allocation2 + $0x10] sm:$0xff] }
  0x5d   :  { %1460 = vmatpush1.bf16.msra.mxu1 %v5369_v11  ;;  %v6104_v33 = vcombine.high %v78_v32, %v78_v32  ;;  %v5391_v35 = vld [vmem:[#allocation5 + $0x144] ss:$16 sps:$4 sm:$0xff]   ;;  %v5426_v40 = vld [vmem:[#allocation5 + $0x4e0] ss:$16 sps:$4 sm:$0xff]   ;;  %v6107_v59 = vcombine.high %v80_v56, %v80_v56  ;;  %v6110_v0 = vcombine.low %v78_v32, %v78_v32  ;;  %v6113_v15 = vcombine.low %v80_v56, %v80_v56 }
  0x5e   :  { %1461 = vmatprep.subr.bf16.mxu1 %v5370_v14  ;;  %1540 = vmatpush1.bf16.msra.mxu0 %v5402_v22  ;;  %v5423_v37 = vld [vmem:[#allocation5 + $0x4e4] ss:$16 sps:$4 sm:$0xff]   ;;  %v5401_v42 = vld [vmem:[#allocation5 + $0x160] ss:$16 sps:$4 sm:$0xff]  }
  0x5f   :  { %1541 = vmatprep.subr.bf16.mxu0 %v5405_v23  ;;  %1483 = vmatprep.mubr.bf16.mxu1 %v6104_v33  ;;  %v5397_v39 = vld [vmem:[#allocation5 + $0x164] ss:$16 sps:$4 sm:$0xff]   ;;  %v5434_v44 = vld [vmem:[#allocation5 + $0x500] ss:$16 sps:$4 sm:$0xff]  }
  0x60   :  { %v5432_v41 = vld [vmem:[#allocation5 + $0x504] ss:$16 sps:$4 sm:$0xff]   ;;  %v5407_v46 = vld [vmem:[#allocation5 + $0x180] ss:$16 sps:$4 sm:$0xff]   ;;  %1565 = vmatprep.mubr.bf16.mxu0 %v6107_v59 }
  0x61   :  { %1462 = vmatpush1.bf16.msra.mxu1 %v5372_v16  ;;  %v5403_v43 = vld [vmem:[#allocation5 + $0x184] ss:$16 sps:$4 sm:$0xff]   ;;  %v5440_v48 = vld [vmem:[#allocation5 + $0x520] ss:$16 sps:$4 sm:$0xff]  }
  0x62   :  { %1463 = vmatprep.subr.bf16.mxu1 %v5373_v18  ;;  %1542 = vmatpush1.bf16.msra.mxu0 %v5408_v25  ;;  %v5438_v45 = vld [vmem:[#allocation5 + $0x524] ss:$16 sps:$4 sm:$0xff]   ;;  %v5413_v50 = vld [vmem:[#allocation5 + $0x1a0] ss:$16 sps:$4 sm:$0xff]  }
  0x63   :  { %1543 = vmatprep.subr.bf16.mxu0 %v5411_v27  ;;  %v5409_v47 = vld [vmem:[#allocation5 + $0x1a4] ss:$16 sps:$4 sm:$0xff]   ;;  %v5446_v52 = vld [vmem:[#allocation5 + $0x540] ss:$16 sps:$4 sm:$0xff]  }
  0x64   :  { %v5444_v49 = vld [vmem:[#allocation5 + $0x544] ss:$16 sps:$4 sm:$0xff]   ;;  %v5419_v54 = vld [vmem:[#allocation5 + $0x1c0] ss:$16 sps:$4 sm:$0xff]  }
  0x65   :  { %1464 = vmatpush1.bf16.msra.mxu1 %v5375_v20  ;;  %v5415_v51 = vld [vmem:[#allocation5 + $0x1c4] ss:$16 sps:$4 sm:$0xff]   ;;  %v5452_v55 = vld [vmem:[#allocation5 + $0x560] ss:$16 sps:$4 sm:$0xff]  }
  0x66   :  { %1465 = vmatprep.subr.bf16.mxu1 %v5376_v21  ;;  %1544 = vmatpush1.bf16.msra.mxu0 %v5414_v30  ;;  %v5450_v53 = vld [vmem:[#allocation5 + $0x564] ss:$16 sps:$4 sm:$0xff]   ;;  %v5425_v60 = vld [vmem:[#allocation5 + $0x1e0] ss:$16 sps:$4 sm:$0xff]  }
  0x67   :  { %1545 = vmatprep.subr.bf16.mxu0 %v5417_v31  ;;  %v5421_v57 = vld [vmem:[#allocation5 + $0x1e4] ss:$16 sps:$4 sm:$0xff]   ;;  %v5458_v61 = vld [vmem:[#allocation5 + $0x580] ss:$16 sps:$4 sm:$0xff]  }
  0x68   :  { %v5456_v58 = vld [vmem:[#allocation5 + $0x584] ss:$16 sps:$4 sm:$0xff]   ;;  %v5429_v1 = vld [vmem:[#allocation5 + $0x200] ss:$16 sps:$4 sm:$0xff]  }
  0x69   :  { %1466 = vmatpush1.bf16.msra.mxu1 %v5378_v24  ;;  %v5431_v62 = vld [vmem:[#allocation5 + $0x204] ss:$16 sps:$4 sm:$0xff]   ;;  %v5464_v2 = vld [vmem:[#allocation5 + $0x5a0] ss:$16 sps:$4 sm:$0xff]   ;;  %v6019_v24 = vmov 0  }
  0x6a   :  { %1467 = vmatprep.subr.bf16.mxu1 %v5379_v26  ;;  %1546 = vmatpush1.bf16.msra.mxu0 %v5420_v36  ;;  %v5462_v63 = vld [vmem:[#allocation5 + $0x5a4] ss:$16 sps:$4 sm:$0xff]   ;;  %v5435_v5 = vld [vmem:[#allocation5 + $0x220] ss:$16 sps:$4 sm:$0xff]  }
  0x6b   :  { %1547 = vmatprep.subr.bf16.mxu0 %v5423_v37  ;;  %v5437_v3 = vld [vmem:[#allocation5 + $0x224] ss:$16 sps:$4 sm:$0xff]   ;;  %v5470_v6 = vld [vmem:[#allocation5 + $0x5c0] ss:$16 sps:$4 sm:$0xff]  }
  0x6c   :  { %v5468_v4 = vld [vmem:[#allocation5 + $0x5c4] ss:$16 sps:$4 sm:$0xff]   ;;  %v5441_v9 = vld [vmem:[#allocation5 + $0x240] ss:$16 sps:$4 sm:$0xff]  }
  0x6d   :  { %1468 = vmatpush1.bf16.msra.mxu1 %v5383_v28  ;;  %v5443_v7 = vld [vmem:[#allocation5 + $0x244] ss:$16 sps:$4 sm:$0xff]   ;;  %v5476_v10 = vld [vmem:[#allocation5 + $0x5e0] ss:$16 sps:$4 sm:$0xff]  }
  0x6e   :  { %1469 = vmatprep.subr.bf16.mxu1 %v5385_v29  ;;  %1548 = vmatpush1.bf16.msra.mxu0 %v5426_v40  ;;  %v5474_v8 = vld [vmem:[#allocation5 + $0x5e4] ss:$16 sps:$4 sm:$0xff]   ;;  %v5447_v13 = vld [vmem:[#allocation5 + $0x260] ss:$16 sps:$4 sm:$0xff]  }
  0x6f   :  { %1549 = vmatprep.subr.bf16.mxu0 %v5432_v41  ;;  %v5449_v11 = vld [vmem:[#allocation5 + $0x264] ss:$16 sps:$4 sm:$0xff]   ;;  %v5482_v16 = vld [vmem:[#allocation5 + $0x600] ss:$16 sps:$4 sm:$0xff]  }
  0x70   :  { %v5484_v12 = vld [vmem:[#allocation5 + $0x604] ss:$16 sps:$4 sm:$0xff]   ;;  %v6115_v17 = vld [vmem:[#allocation2 + $0x8] sm:$0xff] }
  0x71   :  { %1470 = vmatpush1.bf16.msra.mxu1 %v5389_v34  ;;  %v5455_v14 = vld [vmem:[#allocation5 + $0x284] ss:$16 sps:$4 sm:$0xff]   ;;  %v6119_v19 = vcombine.high %v6115_v17, %v6115_v17  ;;  %v5453_v20 = vld [vmem:[#allocation5 + $0x280] ss:$16 sps:$4 sm:$0xff]  }
  0x72   :  { %1471 = vmatprep.subr.bf16.mxu1 %v5391_v35  ;;  %1550 = vmatpush1.bf16.msra.mxu0 %v5434_v44  ;;  %v5490_v18 = vld [vmem:[#allocation5 + $0x624] ss:$16 sps:$4 sm:$0xff]   ;;  %v5488_v22 = vld [vmem:[#allocation5 + $0x620] ss:$16 sps:$4 sm:$0xff]  }
  0x73   :  { %1551 = vmatprep.subr.bf16.mxu0 %v5438_v45  ;;  %v5461_v21 = vld [vmem:[#allocation5 + $0x2a4] ss:$16 sps:$4 sm:$0xff]   ;;  %v5459_v25 = vld [vmem:[#allocation5 + $0x2a0] ss:$16 sps:$4 sm:$0xff]  }
  0x74   :  { %v5496_v23 = vld [vmem:[#allocation5 + $0x644] ss:$16 sps:$4 sm:$0xff]   ;;  %v5494_v27 = vld [vmem:[#allocation5 + $0x640] ss:$16 sps:$4 sm:$0xff]  }
  0x75   :  { %1472 = vmatpush1.bf16.msra.mxu1 %v5395_v38  ;;  %v5467_v26 = vld [vmem:[#allocation5 + $0x2c4] ss:$16 sps:$4 sm:$0xff]   ;;  %v5465_v29 = vld [vmem:[#allocation5 + $0x2c0] ss:$16 sps:$4 sm:$0xff]  }
  0x76   :  { %1473 = vmatprep.subr.bf16.mxu1 %v5397_v39  ;;  %1552 = vmatpush1.bf16.msra.mxu0 %v5440_v48  ;;  %v5502_v28 = vld [vmem:[#allocation5 + $0x664] ss:$16 sps:$4 sm:$0xff]   ;;  %v5500_v31 = vld [vmem:[#allocation5 + $0x660] ss:$16 sps:$4 sm:$0xff]  }
  0x77   :  { %1553 = vmatprep.subr.bf16.mxu0 %v5444_v49  ;;  %v5473_v30 = vld [vmem:[#allocation5 + $0x2e4] ss:$16 sps:$4 sm:$0xff]   ;;  %v5471_v34 = vld [vmem:[#allocation5 + $0x2e0] ss:$16 sps:$4 sm:$0xff]   ;;  %v5529_v49 = vld [vmem:[#allocation2 + $0x18] ss:$0 sps:$4 sm:$0xff]  }
  0x78   :  { %v5508_v32 = vld [vmem:[#allocation5 + $0x684] ss:$16 sps:$4 sm:$0xff]   ;;  %v5506_v36 = vld [vmem:[#allocation5 + $0x680] ss:$16 sps:$4 sm:$0xff]  }
  0x79   :  { %1474 = vmatpush1.bf16.msra.mxu1 %v5401_v42  ;;  %v5479_v35 = vld [vmem:[#allocation5 + $0x304] ss:$16 sps:$4 sm:$0xff]   ;;  %v5477_v38 = vld [vmem:[#allocation5 + $0x300] ss:$16 sps:$4 sm:$0xff]  }
  0x7a   :  { %1475 = vmatprep.subr.bf16.mxu1 %v5403_v43  ;;  %1554 = vmatpush1.bf16.msra.mxu0 %v5446_v52  ;;  %v5514_v37 = vld [vmem:[#allocation5 + $0x6a4] ss:$16 sps:$4 sm:$0xff]   ;;  %v5512_v40 = vld [vmem:[#allocation5 + $0x6a0] ss:$16 sps:$4 sm:$0xff]  }
  0x7b   :  { %1555 = vmatprep.subr.bf16.mxu0 %v5450_v53  ;;  %v5487_v39 = vld [vmem:[#allocation5 + $0x324] ss:$16 sps:$4 sm:$0xff]   ;;  %v5485_v42 = vld [vmem:[#allocation5 + $0x320] ss:$16 sps:$4 sm:$0xff]  }
  0x7c   :  { %v5520_v41 = vld [vmem:[#allocation5 + $0x6c4] ss:$16 sps:$4 sm:$0xff]   ;;  %v5518_v44 = vld [vmem:[#allocation5 + $0x6c0] ss:$16 sps:$4 sm:$0xff]  }
  0x7d   :  { %1476 = vmatpush1.bf16.msra.mxu1 %v5407_v46  ;;  %v5493_v43 = vld [vmem:[#allocation5 + $0x344] ss:$16 sps:$4 sm:$0xff]   ;;  %v5491_v46 = vld [vmem:[#allocation5 + $0x340] ss:$16 sps:$4 sm:$0xff]  }
  0x7e   :  { %1477 = vmatprep.subr.bf16.mxu1 %v5409_v47  ;;  %1556 = vmatpush1.bf16.msra.mxu0 %v5452_v55  ;;  %v5526_v45 = vld [vmem:[#allocation5 + $0x6e4] ss:$16 sps:$4 sm:$0xff]   ;;  %v5524_v47 = vld [vmem:[#allocation5 + $0x6e0] ss:$16 sps:$4 sm:$0xff]  }
  0x7f   :  { %1557 = vmatprep.subr.bf16.mxu0 %v5456_v58  ;;  %v5499_v48 = vld [vmem:[#allocation5 + $0x364] ss:$16 sps:$4 sm:$0xff]   ;;  %v5503_v52 = vld [vmem:[#allocation5 + $0x380] ss:$16 sps:$4 sm:$0xff]  }
  0x80   :  { %v5511_v53 = vld [vmem:[#allocation5 + $0x3a4] ss:$16 sps:$4 sm:$0xff]   ;;  %v5515_v56 = vld [vmem:[#allocation5 + $0x3c0] ss:$16 sps:$4 sm:$0xff]  }
  0x81   :  { %1478 = vmatpush1.bf16.msra.mxu1 %v5413_v50  ;;  %v5497_v50 = vld [vmem:[#allocation5 + $0x360] ss:$16 sps:$4 sm:$0xff]   ;;  %v5517_v55 = vld [vmem:[#allocation5 + $0x3c4] ss:$16 sps:$4 sm:$0xff]  }
  0x82   :  { %1479 = vmatprep.subr.bf16.mxu1 %v5415_v51  ;;  %1558 = vmatpush1.bf16.msra.mxu0 %v5458_v61  ;;  %v5505_v51 = vld [vmem:[#allocation5 + $0x384] ss:$16 sps:$4 sm:$0xff]   ;;  %v5521_v58 = vld [vmem:[#allocation5 + $0x3e0] ss:$16 sps:$4 sm:$0xff]   ;;  %v6126_v61 = vcombine.low %v6115_v17, %v6115_v17  ;;  %v5556_v17 = vld [vmem:[#allocation5 + $0x10c] ss:$16 sps:$4 sm:$0xff]  }
  0x83   :  { %1559 = vmatprep.subr.bf16.mxu0 %v5462_v63  ;;  %v5535_v63 = vld [vmem:[#allocation5 + $0x2c] ss:$16 sps:$4 sm:$0xff]  }
  0x85   :  { %1480 = vmatpush1.bf16.msra.mxu1 %v5419_v54  ;;  %v5509_v54 = vld [vmem:[#allocation5 + $0x3a0] ss:$16 sps:$4 sm:$0xff]  }
  0x86   :  { %1481 = vmatprep.subr.bf16.mxu1 %v5421_v57  ;;  %1560 = vmatpush1.bf16.msra.mxu0 %v5464_v2  ;;  %v5523_v57 = vld [vmem:[#allocation5 + $0x3e4] ss:$16 sps:$4 sm:$0xff]   ;;  %v5538_v2 = vld [vmem:[#allocation5 + $0x4c] ss:$16 sps:$4 sm:$0xff]  }
  0x87   :  { %1561 = vmatprep.subr.bf16.mxu0 %v5468_v4  ;;  %v5541_v4 = vld [vmem:[#allocation5 + $0x6c] ss:$16 sps:$4 sm:$0xff]  }
  0x89   :  { %1482 = vmatpush1.bf16.msra.mxu1 %v5425_v60  ;;  %v5532_v60 = vld [vmem:[#allocation5 + $0xc] ss:$16 sps:$4 sm:$0xff]  }
  0x8a   :  { %1492 = vmatprep.subr.bf16.mxu1 %v5431_v62  ;;  %1562 = vmatpush1.bf16.msra.mxu0 %v5470_v6  ;;  %v5530_v62 = vld [vmem:[#allocation5 + $0x8] ss:$16 sps:$4 sm:$0xff]   ;;  %v5544_v6 = vld [vmem:[#allocation5 + $0x8c] ss:$16 sps:$4 sm:$0xff]  }
  0x8b   :  { %1563 = vmatprep.subr.bf16.mxu0 %v5474_v8  ;;  %v5547_v8 = vld [vmem:[#allocation5 + $0xac] ss:$16 sps:$4 sm:$0xff]  }
  0x8c   :  { %1484 = vmatmul.mubr.bf16.vlgmr.msra.gmra.mrb[0].mxu1 %v6110_v0 }
  0x8d   :  { %1493 = vmatpush1.bf16.msra.mxu1 %v5429_v1  ;;  %1524 = vmatprep.mubr.bf16.mxu1 %v6119_v19  ;;  %v5533_v1 = vld [vmem:[#allocation5 + $0x28] ss:$16 sps:$4 sm:$0xff]  }
  0x8e   :  { %1494 = vmatprep.subr.bf16.mxu1 %v5437_v3  ;;  %1564 = vmatpush1.bf16.msra.mxu0 %v5476_v10  ;;  %v5536_v3 = vld [vmem:[#allocation5 + $0x48] ss:$16 sps:$4 sm:$0xff]   ;;  %v5550_v10 = vld [vmem:[#allocation5 + $0xcc] ss:$16 sps:$4 sm:$0xff]  }
  0x8f   :  { %1574 = vmatprep.subr.bf16.mxu0 %v5484_v12  ;;  %v1783_v12 = vld [vmem:[#allocation7] sm:$0xff] }
  0x91   :  { %1495 = vmatpush1.bf16.msra.mxu1 %v5435_v5  ;;  %1566 = vmatmul.mubr.bf16.vlgmr.msra.gmra.mrb[0].mxu0 %v6113_v15  ;;  %v5539_v5 = vld [vmem:[#allocation5 + $0x68] ss:$16 sps:$4 sm:$0xff]  }
  0x92   :  { %1496 = vmatprep.subr.bf16.mxu1 %v5443_v7  ;;  %1575 = vmatpush1.bf16.msra.mxu0 %v5482_v16  ;;  %v5542_v7 = vld [vmem:[#allocation5 + $0x88] ss:$16 sps:$4 sm:$0xff]  }
  0x93   :  { %1576 = vmatprep.subr.bf16.mxu0 %v5490_v18  ;;  %1606 = vmatprep.mubr.bf16.mxu0 %v6019_v24  ;;  %v5551_v16 = vld [vmem:[#allocation5 + $0xe8] ss:$16 sps:$4 sm:$0xff]  }
  0x95   :  { %1497 = vmatpush1.bf16.msra.mxu1 %v5441_v9  ;;  %v5545_v9 = vld [vmem:[#allocation5 + $0xa8] ss:$16 sps:$4 sm:$0xff]  }
  0x96   :  { %1498 = vmatprep.subr.bf16.mxu1 %v5449_v11  ;;  %1577 = vmatpush1.bf16.msra.mxu0 %v5488_v22  ;;  %v5548_v11 = vld [vmem:[#allocation5 + $0xc8] ss:$16 sps:$4 sm:$0xff]  }
  0x97   :  { %1578 = vmatprep.subr.bf16.mxu0 %v5496_v23  ;;  %v5554_v23 = vld [vmem:[#allocation5 + $0x108] ss:$16 sps:$4 sm:$0xff]  }
  0x99   :  { %1499 = vmatpush1.bf16.msra.mxu1 %v5447_v13  ;;  %v1787_v13 = vld [vmem:[#allocation7 + $0x20] sm:$0xff] }
  0x9a   :  { %1500 = vmatprep.subr.bf16.mxu1 %v5455_v14  ;;  %1579 = vmatpush1.bf16.msra.mxu0 %v5494_v27  ;;  %v4900_v14 = vcombine.high %v1783_v12, %v1787_v13  ;;  %v4899_v18 = vcombine.low %v1783_v12, %v1787_v13  ;;  %v1799_v27 = vld [vmem:[#allocation7 + $0x80] sm:$0xff]  ;;  %v5583_v12 = vld [vmem:[#allocation5 + $0x22c] ss:$16 sps:$4 sm:$0xff]  }
  0x9b   :  { %1580 = vmatprep.subr.bf16.mxu0 %v5502_v28  ;;  %v1803_v28 = vld [vmem:[#allocation7 + $0xa0] sm:$0xff] }
  0x9d   :  { %1501 = vmatpush1.bf16.msra.mxu1 %v5453_v20  ;;  %v1791_v20 = vld [vmem:[#allocation7 + $0x40] sm:$0xff] }
  0x9e   :  { %1502 = vmatprep.subr.bf16.mxu1 %v5461_v21  ;;  %1581 = vmatpush1.bf16.msra.mxu0 %v5500_v31  ;;  %v1795_v21 = vld [vmem:[#allocation7 + $0x60] sm:$0xff]  ;;  %v5562_v31 = vld [vmem:[#allocation5 + $0x14c] ss:$16 sps:$4 sm:$0xff]  }
  0x9f   :  { %1582 = vmatprep.subr.bf16.mxu0 %v5508_v32  ;;  %v4908_v22 = vcombine.high %v1791_v20, %v1795_v21  ;;  %v4915_v32 = vcombine.low %v1799_v27, %v1803_v28 }
  0xa1   :  { %1503 = vmatpush1.bf16.msra.mxu1 %v5459_v25  ;;  %v5559_v25 = vld [vmem:[#allocation5 + $0x12c] ss:$16 sps:$4 sm:$0xff]  }
  0xa2   :  { %1504 = vmatprep.subr.bf16.mxu1 %v5467_v26  ;;  %1583 = vmatpush1.bf16.msra.mxu0 %v5506_v36  ;;  %v4907_v26 = vcombine.low %v1791_v20, %v1795_v21  ;;  %v5586_v20 = vld [vmem:[#allocation5 + $0x24c] ss:$16 sps:$4 sm:$0xff]  }
  0xa3   :  { %1584 = vmatprep.subr.bf16.mxu0 %v5514_v37  ;;  %v5560_v37 = vld [vmem:[#allocation5 + $0x148] ss:$16 sps:$4 sm:$0xff]  }
  0xa5   :  { %1505 = vmatpush1.bf16.msra.mxu1 %v5465_v29  ;;  %v4916_v29 = vcombine.high %v1799_v27, %v1803_v28  ;;  %v5589_v28 = vld [vmem:[#allocation5 + $0x26c] ss:$16 sps:$4 sm:$0xff]  }
  0xa6   :  { %1506 = vmatprep.subr.bf16.mxu1 %v5473_v30  ;;  %1585 = vmatpush1.bf16.msra.mxu0 %v5512_v40  ;;  %v5557_v30 = vld [vmem:[#allocation5 + $0x128] ss:$16 sps:$4 sm:$0xff]   ;;  %v1815_v40 = vld [vmem:[#allocation7 + $0x100] sm:$0xff] }
  0xa7   :  { %1586 = vmatprep.subr.bf16.mxu0 %v5520_v41  ;;  %v1819_v41 = vld [vmem:[#allocation7 + $0x120] sm:$0xff] }
  0xa9   :  { %1507 = vmatpush1.bf16.msra.mxu1 %v5471_v34  ;;  %v1807_v34 = vld [vmem:[#allocation7 + $0xc0] sm:$0xff] }
  0xaa   :  { %1508 = vmatprep.subr.bf16.mxu1 %v5479_v35  ;;  %1587 = vmatpush1.bf16.msra.mxu0 %v5518_v44  ;;  %v1811_v35 = vld [vmem:[#allocation7 + $0xe0] sm:$0xff]  ;;  %v5568_v44 = vld [vmem:[#allocation5 + $0x18c] ss:$16 sps:$4 sm:$0xff]  }
  0xab   :  { %1588 = vmatprep.subr.bf16.mxu0 %v5526_v45  ;;  %v4924_v36 = vcombine.high %v1807_v34, %v1811_v35  ;;  %v4931_v45 = vcombine.low %v1815_v40, %v1819_v41 }
  0xad   :  { %1509 = vmatpush1.bf16.msra.mxu1 %v5477_v38  ;;  %v5565_v38 = vld [vmem:[#allocation5 + $0x16c] ss:$16 sps:$4 sm:$0xff]  }
  0xae   :  { %1510 = vmatprep.subr.bf16.mxu1 %v5487_v39  ;;  %1589 = vmatpush1.bf16.msra.mxu0 %v5524_v47  ;;  %v4923_v39 = vcombine.low %v1807_v34, %v1811_v35  ;;  %v1827_v47 = vld [vmem:[#allocation7 + $0x160] sm:$0xff] }
  0xaf   :  { %3361 = vmatprep.subr.bf16.mxu0 %v4900_v14  ;;  %v1863_v14 = vld [vmem:[#allocation7 + $0x280] sm:$0xff] }
  0xb0   :  { %v1887_v34 = vld [vmem:[#allocation7 + $0x340] sm:$0xff] }
  0xb1   :  { %1511 = vmatpush1.bf16.msra.mxu1 %v5485_v42  ;;  %1607 = vmatmul.mubr.bf16.vlgmr.msra.gmra.mrb[0].mxu0 %v5529_v49  ;;  %v4932_v42 = vcombine.high %v1815_v40, %v1819_v41  ;;  %v5566_v49 = vld [vmem:[#allocation5 + $0x188] ss:$16 sps:$4 sm:$0xff]   ;;  %v1891_v35 = vld [vmem:[#allocation7 + $0x360] sm:$0xff] }
  0xb2   :  { %1512 = vmatprep.subr.bf16.mxu1 %v5493_v43  ;;  %3362 = vmatpush1.bf16.msra.mxu0 %v4899_v18  ;;  %v5563_v43 = vld [vmem:[#allocation5 + $0x168] ss:$16 sps:$4 sm:$0xff]   ;;  %v1895_v40 = vld [vmem:[#allocation7 + $0x380] sm:$0xff] }
  0xb3   :  { %3363 = vmatprep.subr.bf16.mxu0 %v4908_v22  ;;  %v5581_v18 = vld [vmem:[#allocation5 + $0x228] ss:$16 sps:$4 sm:$0xff]   ;;  %v1871_v22 = vld [vmem:[#allocation7 + $0x2c0] sm:$0xff] }
  0xb4   :  { %v1899_v41 = vld [vmem:[#allocation7 + $0x3a0] sm:$0xff] }
  0xb5   :  { %1513 = vmatpush1.bf16.msra.mxu1 %v5491_v46  ;;  %v1823_v46 = vld [vmem:[#allocation7 + $0x140] sm:$0xff] }
  0xb6   :  { %1514 = vmatprep.subr.bf16.mxu1 %v5499_v48  ;;  %3364 = vmatpush1.bf16.msra.mxu0 %v4907_v26  ;;  %v4940_v48 = vcombine.high %v1823_v46, %v1827_v47  ;;  %v5584_v26 = vld [vmem:[#allocation5 + $0x248] ss:$16 sps:$4 sm:$0xff]  }
  0xb7   :  { %3365 = vmatprep.subr.bf16.mxu0 %v4916_v29  ;;  %v1883_v29 = vld [vmem:[#allocation7 + $0x320] sm:$0xff] }
  0xb9   :  { %1515 = vmatpush1.bf16.msra.mxu1 %v5497_v50  ;;  %v5571_v50 = vld [vmem:[#allocation5 + $0x1ac] ss:$16 sps:$4 sm:$0xff]  }
  0xba   :  { %1516 = vmatprep.subr.bf16.mxu1 %v5505_v51  ;;  %3366 = vmatpush1.bf16.msra.mxu0 %v4915_v32  ;;  %v4939_v51 = vcombine.low %v1823_v46, %v1827_v47  ;;  %v5592_v32 = vld [vmem:[#allocation5 + $0x28c] ss:$16 sps:$4 sm:$0xff]   ;;  %v1903_v46 = vld [vmem:[#allocation7 + $0x3c0] sm:$0xff] }
  0xbb   :  { %3367 = vmatprep.subr.bf16.mxu0 %v4924_v36  ;;  %v5004_v36 = vcombine.high %v1887_v34, %v1891_v35  ;;  %v1907_v47 = vld [vmem:[#allocation7 + $0x3e0] sm:$0xff] }
  0xbd   :  { %1517 = vmatpush1.bf16.msra.mxu1 %v5503_v52  ;;  %v1831_v52 = vld [vmem:[#allocation7 + $0x180] sm:$0xff] }
  0xbe   :  { %1518 = vmatprep.subr.bf16.mxu1 %v5511_v53  ;;  %3368 = vmatpush1.bf16.msra.mxu0 %v4923_v39  ;;  %v1835_v53 = vld [vmem:[#allocation7 + $0x1a0] sm:$0xff]  ;;  %v5595_v39 = vld [vmem:[#allocation5 + $0x2ac] ss:$16 sps:$4 sm:$0xff]  }
  0xbf   :  { %3369 = vmatprep.subr.bf16.mxu0 %v4932_v42  ;;  %v5012_v42 = vcombine.high %v1895_v40, %v1899_v41 }
  0xc1   :  { %1519 = vmatpush1.bf16.msra.mxu1 %v5509_v54  ;;  %v4948_v54 = vcombine.high %v1831_v52, %v1835_v53 }
  0xc2   :  { %1520 = vmatprep.subr.bf16.mxu1 %v5517_v55  ;;  %3370 = vmatpush1.bf16.msra.mxu0 %v4931_v45  ;;  %v5569_v55 = vld [vmem:[#allocation5 + $0x1a8] ss:$16 sps:$4 sm:$0xff]   ;;  %v5598_v45 = vld [vmem:[#allocation5 + $0x2cc] ss:$16 sps:$4 sm:$0xff]  }
  0xc3   :  { %3371 = vmatprep.subr.bf16.mxu0 %v4940_v48  ;;  %v5020_v48 = vcombine.high %v1903_v46, %v1907_v47 }
  0xc5   :  { %1521 = vmatpush1.bf16.msra.mxu1 %v5515_v56  ;;  %v5574_v56 = vld [vmem:[#allocation5 + $0x1cc] ss:$16 sps:$4 sm:$0xff]  }
  0xc6   :  { %1522 = vmatprep.subr.bf16.mxu1 %v5523_v57  ;;  %3372 = vmatpush1.bf16.msra.mxu0 %v4939_v51  ;;  %v4947_v57 = vcombine.low %v1831_v52, %v1835_v53  ;;  %v5601_v51 = vld [vmem:[#allocation5 + $0x2ec] ss:$16 sps:$4 sm:$0xff]   ;;  %v5599_v52 = vld [vmem:[#allocation5 + $0x2e8] ss:$16 sps:$4 sm:$0xff]  }
  0xc7   :  { %3373 = vmatprep.subr.bf16.mxu0 %v4948_v54  ;;  %v5604_v53 = vld [vmem:[#allocation5 + $0x30c] ss:$16 sps:$4 sm:$0xff]   ;;  %v5602_v54 = vld [vmem:[#allocation5 + $0x308] ss:$16 sps:$4 sm:$0xff]  }
  0xc9   :  { %1523 = vmatpush1.bf16.msra.mxu1 %v5521_v58  ;;  %v1839_v58 = vld [vmem:[#allocation7 + $0x1c0] sm:$0xff] }
  0xca   :  { %1615 = vmatprep.subr.bf16.mxu1 %v5532_v60  ;;  %3374 = vmatpush1.bf16.msra.mxu0 %v4947_v57  ;;  %v1843_v60 = vld [vmem:[#allocation7 + $0x1e0] sm:$0xff]  ;;  %v5610_v57 = vld [vmem:[#allocation5 + $0x34c] ss:$16 sps:$4 sm:$0xff]  }
  0xcc   :  { %1525 = vmatmul.mubr.bf16.vlgmr.msra.gmra.mrb[0].mxu1 %v6126_v61 }
  0xcd   :  { %1616 = vmatpush1.bf16.msra.mxu1 %v5530_v62  ;;  %1647 = vmatprep.mubr.bf16.mxu1 %v6104_v33  ;;  %v5553_v33 = vld [vmem:[#allocation5 + $0xec] ss:$16 sps:$4 sm:$0xff]   ;;  %v4956_v62 = vcombine.high %v1839_v58, %v1843_v60 }
  0xce   :  { %1617 = vmatprep.subr.bf16.mxu1 %v5535_v63  ;;  %v5572_v63 = vld [vmem:[#allocation5 + $0x1c8] ss:$16 sps:$4 sm:$0xff]  }
  0xcf   :  { %3375 = vmatprep.subr.bf16.mxu0 %v4956_v62  ;;  %v5611_v62 = vld [vmem:[#allocation5 + $0x368] ss:$16 sps:$4 sm:$0xff]  }
  0xd1   :  { %1618 = vmatpush1.bf16.msra.mxu1 %v5533_v1  ;;  %v5577_v1 = vld [vmem:[#allocation5 + $0x1ec] ss:$16 sps:$4 sm:$0xff]  }
  0xd2   :  { %1619 = vmatprep.subr.bf16.mxu1 %v5538_v2  ;;  %v4955_v2 = vcombine.low %v1839_v58, %v1843_v60  ;;  %v5608_v58 = vld [vmem:[#allocation5 + $0x348] ss:$16 sps:$4 sm:$0xff]   ;;  %v5613_v60 = vld [vmem:[#allocation5 + $0x36c] ss:$16 sps:$4 sm:$0xff]  }
  0xd4   :  { %3376 = vmatpush1.bf16.msra.mxu0 %v4955_v2  ;;  %v5619_v2 = vld [vmem:[#allocation5 + $0x3ac] ss:$16 sps:$4 sm:$0xff]  }
  0xd5   :  { %1620 = vmatpush1.bf16.msra.mxu1 %v5536_v3  ;;  %v1847_v3 = vld [vmem:[#allocation7 + $0x200] sm:$0xff] }
  0xd6   :  { %1621 = vmatprep.subr.bf16.mxu1 %v5541_v4  ;;  %v1851_v4 = vld [vmem:[#allocation7 + $0x220] sm:$0xff] }
  0xd9   :  { %1622 = vmatpush1.bf16.msra.mxu1 %v5539_v5  ;;  %v4964_v5 = vcombine.high %v1847_v3, %v1851_v4 }
  0xda   :  { %1623 = vmatprep.subr.bf16.mxu1 %v5544_v6  ;;  %v5575_v6 = vld [vmem:[#allocation5 + $0x1e8] ss:$16 sps:$4 sm:$0xff]  }
  0xdb   :  { %3377 = vmatprep.subr.bf16.mxu0 %v4964_v5  ;;  %v5620_v5 = vld [vmem:[#allocation5 + $0x3c8] ss:$16 sps:$4 sm:$0xff]  }
  0xdd   :  { %1624 = vmatpush1.bf16.msra.mxu1 %v5542_v7  ;;  %v5580_v7 = vld [vmem:[#allocation5 + $0x20c] ss:$16 sps:$4 sm:$0xff]  }
  0xde   :  { %1625 = vmatprep.subr.bf16.mxu1 %v5547_v8  ;;  %v4963_v8 = vcombine.low %v1847_v3, %v1851_v4  ;;  %v5617_v3 = vld [vmem:[#allocation5 + $0x3a8] ss:$16 sps:$4 sm:$0xff]   ;;  %v5622_v4 = vld [vmem:[#allocation5 + $0x3cc] ss:$16 sps:$4 sm:$0xff]  }
  0xe0   :  { %3378 = vmatpush1.bf16.msra.mxu0 %v4963_v8  ;;  %v5628_v8 = vld [vmem:[#allocation5 + $0x40c] ss:$16 sps:$4 sm:$0xff]  }
  0xe1   :  { %1626 = vmatpush1.bf16.msra.mxu1 %v5545_v9  ;;  %v1855_v9 = vld [vmem:[#allocation7 + $0x240] sm:$0xff] }
  0xe2   :  { %1627 = vmatprep.subr.bf16.mxu1 %v5550_v10  ;;  %v1859_v10 = vld [vmem:[#allocation7 + $0x260] sm:$0xff] }
  0xe3   :  { %v4971_v13 = vcombine.low %v1855_v9, %v1859_v10 }
  0xe5   :  { %1628 = vmatpush1.bf16.msra.mxu1 %v5548_v11  ;;  %v4972_v11 = vcombine.high %v1855_v9, %v1859_v10  ;;  %v5626_v9 = vld [vmem:[#allocation5 + $0x408] ss:$16 sps:$4 sm:$0xff]   ;;  %v5631_v10 = vld [vmem:[#allocation5 + $0x42c] ss:$16 sps:$4 sm:$0xff]  }
  0xe6   :  { %1629 = vmatprep.subr.bf16.mxu1 %v5553_v33  ;;  %v5578_v33 = vld [vmem:[#allocation5 + $0x208] ss:$16 sps:$4 sm:$0xff]  }
  0xe7   :  { %3379 = vmatprep.subr.bf16.mxu0 %v4972_v11  ;;  %v5629_v11 = vld [vmem:[#allocation5 + $0x428] ss:$16 sps:$4 sm:$0xff]  }
  0xe8   :  { %3380 = vmatpush1.bf16.msra.mxu0 %v4971_v13  ;;  %v5637_v13 = vld [vmem:[#allocation5 + $0x46c] ss:$16 sps:$4 sm:$0xff]  }
  0xe9   :  { %1630 = vmatpush1.bf16.msra.mxu1 %v5551_v16  ;;  %v1867_v16 = vld [vmem:[#allocation7 + $0x2a0] sm:$0xff] }
  0xea   :  { %1631 = vmatprep.subr.bf16.mxu1 %v5556_v17  ;;  %v4980_v17 = vcombine.high %v1863_v14, %v1867_v16  ;;  %v4979_v21 = vcombine.low %v1863_v14, %v1867_v16  ;;  %v5635_v14 = vld [vmem:[#allocation5 + $0x468] ss:$16 sps:$4 sm:$0xff]   ;;  %v5640_v16 = vld [vmem:[#allocation5 + $0x48c] ss:$16 sps:$4 sm:$0xff]  }
  0xec   :  { %3381 = vmatprep.subr.bf16.mxu0 %v4980_v17  ;;  %v5638_v17 = vld [vmem:[#allocation5 + $0x488] ss:$16 sps:$4 sm:$0xff]  }
  0xed   :  { %1632 = vmatpush1.bf16.msra.mxu1 %v5554_v23  ;;  %3382 = vmatpush1.bf16.msra.mxu0 %v4979_v21  ;;  %v1875_v23 = vld [vmem:[#allocation7 + $0x2e0] sm:$0xff]  ;;  %v5649_v21 = vld [vmem:[#allocation5 + $0x4ec] ss:$16 sps:$4 sm:$0xff]  }
  0xee   :  { %1633 = vmatprep.subr.bf16.mxu1 %v5559_v25  ;;  %v4988_v25 = vcombine.high %v1871_v22, %v1875_v23  ;;  %v4987_v27 = vcombine.low %v1871_v22, %v1875_v23  ;;  %v5647_v22 = vld [vmem:[#allocation5 + $0x4e8] ss:$16 sps:$4 sm:$0xff]   ;;  %v5652_v23 = vld [vmem:[#allocation5 + $0x50c] ss:$16 sps:$4 sm:$0xff]  }
  0xf0   :  { %3383 = vmatprep.subr.bf16.mxu0 %v4988_v25  ;;  %v5650_v25 = vld [vmem:[#allocation5 + $0x508] ss:$16 sps:$4 sm:$0xff]  }
  0xf1   :  { %1634 = vmatpush1.bf16.msra.mxu1 %v5557_v30  ;;  %3384 = vmatpush1.bf16.msra.mxu0 %v4987_v27  ;;  %v6134_v27 = vld [vmem:[#allocation7 + $0x400] sm:$0xff] }
  0xf2   :  { %1635 = vmatprep.subr.bf16.mxu1 %v5562_v31  ;;  %v5587_v31 = vld [vmem:[#allocation5 + $0x268] ss:$16 sps:$4 sm:$0xff]  }
  0xf5   :  { %1636 = vmatpush1.bf16.msra.mxu1 %v5560_v37  ;;  %v5590_v37 = vld [vmem:[#allocation5 + $0x288] ss:$16 sps:$4 sm:$0xff]  }
  0xf6   :  { %1637 = vmatprep.subr.bf16.mxu1 %v5565_v38  ;;  %v5003_v38 = vcombine.low %v1887_v34, %v1891_v35  ;;  %v5664_v34 = vld [vmem:[#allocation5 + $0x58c] ss:$16 sps:$4 sm:$0xff]   ;;  %v5662_v35 = vld [vmem:[#allocation5 + $0x588] ss:$16 sps:$4 sm:$0xff]  }
  0xf9   :  { %1638 = vmatpush1.bf16.msra.mxu1 %v5563_v43  ;;  %v5593_v43 = vld [vmem:[#allocation5 + $0x2a8] ss:$16 sps:$4 sm:$0xff]  }
  0xfa   :  { %1639 = vmatprep.subr.bf16.mxu1 %v5568_v44  ;;  %v5011_v44 = vcombine.low %v1895_v40, %v1899_v41  ;;  %v5673_v40 = vld [vmem:[#allocation5 + $0x5ec] ss:$16 sps:$4 sm:$0xff]   ;;  %v5671_v41 = vld [vmem:[#allocation5 + $0x5e8] ss:$16 sps:$4 sm:$0xff]  }
  0xfd   :  { %1640 = vmatpush1.bf16.msra.mxu1 %v5566_v49  ;;  %v5596_v49 = vld [vmem:[#allocation5 + $0x2c8] ss:$16 sps:$4 sm:$0xff]  }
  0xfe   :  { %1641 = vmatprep.subr.bf16.mxu1 %v5571_v50  ;;  %v5019_v50 = vcombine.low %v1903_v46, %v1907_v47  ;;  %v5677_v47 = vld [vmem:[#allocation5 + $0x628] ss:$16 sps:$4 sm:$0xff]  }
 0x101   :  { %1642 = vmatpush1.bf16.msra.mxu1 %v5569_v55  ;;  %v5607_v55 = vld [vmem:[#allocation5 + $0x32c] ss:$16 sps:$4 sm:$0xff]  }
 0x102   :  { %1643 = vmatprep.subr.bf16.mxu1 %v5574_v56  ;;  %v5605_v56 = vld [vmem:[#allocation5 + $0x328] ss:$16 sps:$4 sm:$0xff]  }
 0x105   :  { %1644 = vmatpush1.bf16.msra.mxu1 %v5572_v63  ;;  %v5616_v63 = vld [vmem:[#allocation5 + $0x38c] ss:$16 sps:$4 sm:$0xff]  }
 0x106   :  { %1645 = vmatprep.subr.bf16.mxu1 %v5577_v1  ;;  %v5614_v1 = vld [vmem:[#allocation5 + $0x388] ss:$16 sps:$4 sm:$0xff]  }
 0x109   :  { %1646 = vmatpush1.bf16.msra.mxu1 %v5575_v6  ;;  %v5625_v6 = vld [vmem:[#allocation5 + $0x3ec] ss:$16 sps:$4 sm:$0xff]  }
 0x10a   :  { %1656 = vmatprep.subr.bf16.mxu1 %v5580_v7  ;;  %v5623_v7 = vld [vmem:[#allocation5 + $0x3e8] ss:$16 sps:$4 sm:$0xff]  }
 0x10c   :  { %1648 = vmatmul.mubr.bf16.vlgmr.msra.gmra.mrb[4].mxu1 %v6110_v0  ;;  %v1879_v0 = vld [vmem:[#allocation7 + $0x300] sm:$0xff] }
 0x10d   :  { %1657 = vmatpush1.bf16.msra.mxu1 %v5578_v33  ;;  %1688 = vmatprep.mubr.bf16.mxu1 %v6119_v19  ;;  %v4996_v30 = vcombine.high %v1879_v0, %v1883_v29  ;;  %v4995_v19 = vcombine.low %v1879_v0, %v1883_v29  ;;  %v5634_v33 = vld [vmem:[#allocation5 + $0x44c] ss:$16 sps:$4 sm:$0xff]   ;;  %v5653_v0 = vld [vmem:[#allocation5 + $0x528] ss:$16 sps:$4 sm:$0xff]  }
 0x10e   :  { %1658 = vmatprep.subr.bf16.mxu1 %v5583_v12  ;;  %v5632_v12 = vld [vmem:[#allocation5 + $0x448] ss:$16 sps:$4 sm:$0xff]  }
 0x10f   :  { %3385 = vmatprep.subr.bf16.mxu0 %v4996_v30  ;;  %v5658_v30 = vld [vmem:[#allocation5 + $0x54c] ss:$16 sps:$4 sm:$0xff]  }
 0x110   :  { %3386 = vmatpush1.bf16.msra.mxu0 %v4995_v19  ;;  %v5661_v19 = vld [vmem:[#allocation5 + $0x56c] ss:$16 sps:$4 sm:$0xff]  }
 0x111   :  { %1659 = vmatpush1.bf16.msra.mxu1 %v5581_v18  ;;  %3387 = vmatprep.subr.bf16.mxu0 %v5004_v36  ;;  %v5643_v18 = vld [vmem:[#allocation5 + $0x4ac] ss:$16 sps:$4 sm:$0xff]  }
 0x112   :  { %1660 = vmatprep.subr.bf16.mxu1 %v5586_v20  ;;  %v5646_v20 = vld [vmem:[#allocation5 + $0x4cc] ss:$16 sps:$4 sm:$0xff]  }
 0x113   :  { %v5667_v36 = vld [vmem:[#allocation5 + $0x5ac] ss:$16 sps:$4 sm:$0xff]  }
 0x114   :  { %3388 = vmatpush1.bf16.msra.mxu0 %v5003_v38  ;;  %v5670_v38 = vld [vmem:[#allocation5 + $0x5cc] ss:$16 sps:$4 sm:$0xff]  }
 0x115   :  { %1661 = vmatpush1.bf16.msra.mxu1 %v5584_v26  ;;  %3389 = vmatprep.subr.bf16.mxu0 %v5012_v42  ;;  %v5655_v26 = vld [vmem:[#allocation5 + $0x52c] ss:$16 sps:$4 sm:$0xff]  }
 0x116   :  { %1662 = vmatprep.subr.bf16.mxu1 %v5589_v28  ;;  %v6136_v28 = vld [vmem:[#allocation7 + $0x420] sm:$0xff]  ;;  %v5676_v42 = vld [vmem:[#allocation5 + $0x60c] ss:$16 sps:$4 sm:$0xff]  }
 0x117   :  { %v5028_v29 = vcombine.high %v6134_v27, %v6136_v28 }
 0x118   :  { %3390 = vmatpush1.bf16.msra.mxu0 %v5011_v44  ;;  %v5679_v44 = vld [vmem:[#allocation5 + $0x62c] ss:$16 sps:$4 sm:$0xff]  }
 0x119   :  { %1663 = vmatpush1.bf16.msra.mxu1 %v5587_v31  ;;  %3391 = vmatprep.subr.bf16.mxu0 %v5020_v48  ;;  %v5656_v31 = vld [vmem:[#allocation5 + $0x548] ss:$16 sps:$4 sm:$0xff]  }
 0x11a   :  { %1664 = vmatprep.subr.bf16.mxu1 %v5592_v32  ;;  %v5659_v32 = vld [vmem:[#allocation5 + $0x568] ss:$16 sps:$4 sm:$0xff]  }
 0x11c   :  { %3392 = vmatpush1.bf16.msra.mxu0 %v5019_v50 }
 0x11d   :  { %1665 = vmatpush1.bf16.msra.mxu1 %v5590_v37  ;;  %3402 = vmatprep.subr.bf16.mxu0 %v5028_v29  ;;  %v5665_v37 = vld [vmem:[#allocation5 + $0x5a8] ss:$16 sps:$4 sm:$0xff]   ;;  %v1943_v29 = vld [vmem:[#allocation7 + $0x500] sm:$0xff] }
 0x11e   :  { %1666 = vmatprep.subr.bf16.mxu1 %v5595_v39  ;;  %v5668_v39 = vld [vmem:[#allocation5 + $0x5c8] ss:$16 sps:$4 sm:$0xff]  }
 0x121   :  { %1667 = vmatpush1.bf16.msra.mxu1 %v5593_v43  ;;  %v5674_v43 = vld [vmem:[#allocation5 + $0x608] ss:$16 sps:$4 sm:$0xff]  }
 0x122   :  { %1668 = vmatprep.subr.bf16.mxu1 %v5598_v45 }
 0x125   :  { %1669 = vmatpush1.bf16.msra.mxu1 %v5596_v49  ;;  %v5682_v49 = vld [vmem:[#allocation5 + $0x64c] ss:$16 sps:$4 sm:$0xff]  }
 0x126   :  { %1670 = vmatprep.subr.bf16.mxu1 %v5601_v51  ;;  %v5680_v51 = vld [vmem:[#allocation5 + $0x648] ss:$16 sps:$4 sm:$0xff]  }
 0x129   :  { %1671 = vmatpush1.bf16.msra.mxu1 %v5599_v52  ;;  %v5685_v52 = vld [vmem:[#allocation5 + $0x66c] ss:$16 sps:$4 sm:$0xff]  }
 0x12a   :  { %1672 = vmatprep.subr.bf16.mxu1 %v5604_v53  ;;  %v5683_v53 = vld [vmem:[#allocation5 + $0x668] ss:$16 sps:$4 sm:$0xff]  }
 0x12d   :  { %1673 = vmatpush1.bf16.msra.mxu1 %v5602_v54  ;;  %v5688_v54 = vld [vmem:[#allocation5 + $0x68c] ss:$16 sps:$4 sm:$0xff]  }
 0x12e   :  { %1674 = vmatprep.subr.bf16.mxu1 %v5607_v55  ;;  %v5686_v55 = vld [vmem:[#allocation5 + $0x688] ss:$16 sps:$4 sm:$0xff]  }
 0x131   :  { %1675 = vmatpush1.bf16.msra.mxu1 %v5605_v56  ;;  %v5689_v56 = vld [vmem:[#allocation5 + $0x6a8] ss:$16 sps:$4 sm:$0xff]  }
 0x132   :  { %1676 = vmatprep.subr.bf16.mxu1 %v5610_v57 }
 0x135   :  { %1677 = vmatpush1.bf16.msra.mxu1 %v5608_v58 }
 0x136   :  { %1678 = vmatprep.subr.bf16.mxu1 %v5613_v60 }
 0x139   :  { %1679 = vmatpush1.bf16.msra.mxu1 %v5611_v62 }
 0x13a   :  { %1680 = vmatprep.subr.bf16.mxu1 %v5616_v63 }
 0x13d   :  { %1681 = vmatpush1.bf16.msra.mxu1 %v5614_v1  ;;  %v5692_v1 = vld [vmem:[#allocation5 + $0x6c8] ss:$16 sps:$4 sm:$0xff]  }
 0x13e   :  { %1682 = vmatprep.subr.bf16.mxu1 %v5619_v2  ;;  %v1919_v2 = vld [vmem:[#allocation7 + $0x440] sm:$0xff] }
 0x141   :  { %1683 = vmatpush1.bf16.msra.mxu1 %v5617_v3  ;;  %v1923_v3 = vld [vmem:[#allocation7 + $0x460] sm:$0xff] }
 0x142   :  { %1684 = vmatprep.subr.bf16.mxu1 %v5622_v4 }
 0x145   :  { %1685 = vmatpush1.bf16.msra.mxu1 %v5620_v5  ;;  %v5697_v5 = vld [vmem:[#allocation5 + $0x6ec] ss:$16 sps:$4 sm:$0xff]  }
 0x146   :  { %1686 = vmatprep.subr.bf16.mxu1 %v5625_v6 }
 0x149   :  { %1687 = vmatpush1.bf16.msra.mxu1 %v5623_v7  ;;  %v1784_v7 = vld [vmem:[#allocation7 + $0x8] sm:$0xff] }
 0x14a   :  { %1697 = vmatprep.subr.bf16.mxu1 %v5628_v8  ;;  %v1788_v8 = vld [vmem:[#allocation7 + $0x28] sm:$0xff] }
 0x14c   :  { %1689 = vmatmul.mubr.bf16.vlgmr.msra.gmra.mrb[4].mxu1 %v6126_v61  ;;  %v5641_v61 = vld [vmem:[#allocation5 + $0x4a8] ss:$16 sps:$4 sm:$0xff]  }
 0x14d   :  { %1698 = vmatpush1.bf16.msra.mxu1 %v5626_v9  ;;  %1729 = vmatprep.mubr.bf16.mxu1 %v6107_v59  ;;  %v5644_v59 = vld [vmem:[#allocation5 + $0x4c8] ss:$16 sps:$4 sm:$0xff]   ;;  %v5027_v9 = vcombine.low %v6134_v27, %v6136_v28  ;;  %v5890_v27 = vld [vmem:[#allocation2 + $0x18] ss:$0 sps:$4 sm:$0xff]  }
 0x14e   :  { %1699 = vmatprep.subr.bf16.mxu1 %v5631_v10 }
 0x151   :  { %1700 = vmatpush1.bf16.msra.mxu1 %v5629_v11  ;;  %v5036_v11 = vcombine.high %v1919_v2, %v1923_v3 }
 0x152   :  { %1701 = vmatprep.subr.bf16.mxu1 %v5634_v33  ;;  %v5695_v33 = vld [vmem:[#allocation5 + $0x6e8] ss:$16 sps:$4 sm:$0xff]  }
 0x155   :  { %1702 = vmatpush1.bf16.msra.mxu1 %v5632_v12  ;;  %v1927_v12 = vld [vmem:[#allocation7 + $0x480] sm:$0xff] }
 0x156   :  { %1703 = vmatprep.subr.bf16.mxu1 %v5637_v13  ;;  %v1931_v13 = vld [vmem:[#allocation7 + $0x4a0] sm:$0xff] }
 0x159   :  { %1704 = vmatpush1.bf16.msra.mxu1 %v5635_v14  ;;  %v4902_v14 = vcombine.high %v1784_v7, %v1788_v8 }
 0x15a   :  { %1705 = vmatprep.subr.bf16.mxu1 %v5640_v16  ;;  %v1792_v16 = vld [vmem:[#allocation7 + $0x48] sm:$0xff] }
 0x15d   :  { %1706 = vmatpush1.bf16.msra.mxu1 %v5638_v17  ;;  %v1796_v17 = vld [vmem:[#allocation7 + $0x68] sm:$0xff] }
 0x15e   :  { %1707 = vmatprep.subr.bf16.mxu1 %v5643_v18  ;;  %v5035_v18 = vcombine.low %v1919_v2, %v1923_v3  ;;  %v1844_v2 = vld [vmem:[#allocation7 + $0x1e8] sm:$0xff] }
 0x161   :  { %1708 = vmatpush1.bf16.msra.mxu1 %v5641_v61  ;;  %v5044_v61 = vcombine.high %v1927_v12, %v1931_v13 }
 0x162   :  { %1709 = vmatprep.subr.bf16.mxu1 %v5646_v20  ;;  %v4901_v20 = vcombine.low %v1784_v7, %v1788_v8  ;;  %v1983_v7 = vld [vmem:[#allocation7 + $0x640] sm:$0xff] }
 0x163   :  { %v1987_v8 = vld [vmem:[#allocation7 + $0x660] sm:$0xff] }
 0x165   :  { %1710 = vmatpush1.bf16.msra.mxu1 %v5644_v59  ;;  %v1935_v59 = vld [vmem:[#allocation7 + $0x4c0] sm:$0xff] }
 0x166   :  { %1711 = vmatprep.subr.bf16.mxu1 %v5649_v21  ;;  %v1939_v21 = vld [vmem:[#allocation7 + $0x4e0] sm:$0xff] }
 0x167   :  { %v5052_v28 = vcombine.high %v1935_v59, %v1939_v21 }
 0x169   :  { %1712 = vmatpush1.bf16.msra.mxu1 %v5647_v22  ;;  %v4910_v22 = vcombine.high %v1792_v16, %v1796_v17 }
 0x16a   :  { %1713 = vmatprep.subr.bf16.mxu1 %v5652_v23  ;;  %v1800_v23 = vld [vmem:[#allocation7 + $0x88] sm:$0xff] }
 0x16d   :  { %1714 = vmatpush1.bf16.msra.mxu1 %v5650_v25  ;;  %v1804_v25 = vld [vmem:[#allocation7 + $0xa8] sm:$0xff] }
 0x16e   :  { %1715 = vmatprep.subr.bf16.mxu1 %v5655_v26  ;;  %v5043_v26 = vcombine.low %v1927_v12, %v1931_v13  ;;  %v5100_v13 = vcombine.high %v1983_v7, %v1987_v8 }
 0x171   :  { %1716 = vmatpush1.bf16.msra.mxu1 %v5653_v0  ;;  %v4909_v0 = vcombine.low %v1792_v16, %v1796_v17  ;;  %v1991_v16 = vld [vmem:[#allocation7 + $0x680] sm:$0xff] }
 0x172   :  { %1717 = vmatprep.subr.bf16.mxu1 %v5658_v30  ;;  %v1947_v30 = vld [vmem:[#allocation7 + $0x520] sm:$0xff] }
 0x173   :  { %v1995_v17 = vld [vmem:[#allocation7 + $0x6a0] sm:$0xff] }
 0x175   :  { %1718 = vmatpush1.bf16.msra.mxu1 %v5656_v31  ;;  %v4918_v31 = vcombine.high %v1800_v23, %v1804_v25 }
 0x176   :  { %1719 = vmatprep.subr.bf16.mxu1 %v5661_v19  ;;  %v1808_v19 = vld [vmem:[#allocation7 + $0xc8] sm:$0xff] }
 0x179   :  { %1720 = vmatpush1.bf16.msra.mxu1 %v5659_v32  ;;  %v1812_v32 = vld [vmem:[#allocation7 + $0xe8] sm:$0xff] }
 0x17a   :  { %1721 = vmatprep.subr.bf16.mxu1 %v5664_v34  ;;  %v5051_v34 = vcombine.low %v1935_v59, %v1939_v21  ;;  %v5099_v59 = vcombine.low %v1983_v7, %v1987_v8  ;;  %v5108_v21 = vcombine.high %v1991_v16, %v1995_v17  ;;  %v1920_v7 = vld [vmem:[#allocation7 + $0x448] sm:$0xff] }
 0x17b   :  { %v1924_v8 = vld [vmem:[#allocation7 + $0x468] sm:$0xff] }
 0x17d   :  { %1722 = vmatpush1.bf16.msra.mxu1 %v5662_v35  ;;  %v5060_v35 = vcombine.high %v1943_v29, %v1947_v30 }
 0x17e   :  { %1723 = vmatprep.subr.bf16.mxu1 %v5667_v36  ;;  %v4917_v36 = vcombine.low %v1800_v23, %v1804_v25  ;;  %v1999_v23 = vld [vmem:[#allocation7 + $0x6c0] sm:$0xff] }
 0x17f   :  { %v2003_v25 = vld [vmem:[#allocation7 + $0x6e0] sm:$0xff] }
 0x181   :  { %1724 = vmatpush1.bf16.msra.mxu1 %v5665_v37  ;;  %v1951_v37 = vld [vmem:[#allocation7 + $0x540] sm:$0xff] }
 0x182   :  { %1725 = vmatprep.subr.bf16.mxu1 %v5670_v38  ;;  %v1955_v38 = vld [vmem:[#allocation7 + $0x560] sm:$0xff] }
 0x184   :  { %v1608_v45 = vpop.f32.mrb[0].mxu0 }
 0x185   :  { %1726 = vmatpush1.bf16.msra.mxu1 %v5668_v39  ;;  %v1610_v46 = vpop.f32.mrb[1].mxu0  ;;  %v4926_v39 = vcombine.high %v1808_v19, %v1812_v32 }
 0x186   :  { %1727 = vmatprep.subr.bf16.mxu1 %v5673_v40  ;;  %v1612_v48 = vpop.f32.mrb[2].mxu0  ;;  %v1816_v40 = vld [vmem:[#allocation7 + $0x108] sm:$0xff] }
 0x187   :  { %v1613_v50 = vpop.f32.mrb[3].mxu0  ;;  %v1824_v48 = vld [vmem:[#allocation7 + $0x148] sm:$0xff] }
 0x188   :  { %v5067_v50 = vcombine.low %v1951_v37, %v1955_v38 }
 0x189   :  { %1728 = vmatpush1.bf16.msra.mxu1 %v5671_v41  ;;  %v1820_v41 = vld [vmem:[#allocation7 + $0x128] sm:$0xff] }
 0x18a   :  { %1738 = vmatprep.subr.bf16.mxu1 %v5676_v42  ;;  %v5059_v42 = vcombine.low %v1943_v29, %v1947_v30  ;;  %v5116_v29 = vcombine.high %v1999_v23, %v2003_v25 }
 0x18c   :  { %1730 = vmatmul.mubr.bf16.vlgmr.msra.gmra.mrb[4].mxu1 %v6113_v15  ;;  %v5691_v15 = vld [vmem:[#allocation5 + $0x6ac] ss:$16 sps:$4 sm:$0xff]  }
 0x18d   :  { %1739 = vmatpush1.bf16.msra.mxu1 %v5674_v43  ;;  %1770 = vmatprep.mubr.bf16.mxu1 %v6019_v24  ;;  %v5694_v24 = vld [vmem:[#allocation5 + $0x6cc] ss:$16 sps:$4 sm:$0xff]   ;;  %v5068_v43 = vcombine.high %v1951_v37, %v1955_v38 }
 0x18e   :  { %1740 = vmatprep.subr.bf16.mxu1 %v5679_v44  ;;  %v4925_v44 = vcombine.low %v1808_v19, %v1812_v32  ;;  %v2011_v19 = vld [vmem:[#allocation7 + $0x720] sm:$0xff] }
 0x191   :  { %1741 = vmatpush1.bf16.msra.mxu1 %v5677_v47  ;;  %v4934_v47 = vcombine.high %v1816_v40, %v1820_v41 }
 0x192   :  { %1742 = vmatprep.subr.bf16.mxu1 %v5682_v49  ;;  %v1828_v49 = vld [vmem:[#allocation7 + $0x168] sm:$0xff] }
 0x195   :  { %1743 = vmatpush1.bf16.msra.mxu1 %v5680_v51 }
 0x196   :  { %1744 = vmatprep.subr.bf16.mxu1 %v5685_v52  ;;  %v4933_v52 = vcombine.low %v1816_v40, %v1820_v41  ;;  %v2019_v40 = vld [vmem:[#allocation7 + $0x760] sm:$0xff] }
 0x199   :  { %1745 = vmatpush1.bf16.msra.mxu1 %v5683_v53  ;;  %v1967_v53 = vld [vmem:[#allocation7 + $0x5c0] sm:$0xff] }
 0x19a   :  { %1746 = vmatprep.subr.bf16.mxu1 %v5688_v54  ;;  %v1971_v54 = vld [vmem:[#allocation7 + $0x5e0] sm:$0xff] }
 0x19b   :  { %v5083_v3 = vcombine.low %v1967_v53, %v1971_v54 }
 0x19d   :  { %1747 = vmatpush1.bf16.msra.mxu1 %v5686_v55  ;;  %v4942_v55 = vcombine.high %v1824_v48, %v1828_v49 }
 0x19e   :  { %1748 = vmatprep.subr.bf16.mxu1 %v5691_v15  ;;  %v1832_v15 = vld [vmem:[#allocation7 + $0x188] sm:$0xff] }
 0x19f   :  { %v1526_v57 = vpop.f32.mrb[0].mxu1 }
 0x1a0   :  { %v5283_v58 = vadd.f32 %v1608_v45, %v1526_v57  ;;  %v1528_v60 = vpop.f32.mrb[1].mxu1  ;;  %v1959_v45 = vld [vmem:[#allocation7 + $0x580] sm:$0xff]  ;;  %v5084_v57 = vcombine.high %v1967_v53, %v1971_v54 }
 0x1a1   :  { %v5284_v62 = vadd.f32 %v1610_v46, %v1528_v60  ;;  %v1530_v63 = vpop.f32.mrb[2].mxu1  ;;  %1749 = vmatpush1.bf16.msra.mxu1 %v5689_v56  ;;  %v1963_v46 = vld [vmem:[#allocation7 + $0x5a0] sm:$0xff]  ;;  %v1836_v56 = vld [vmem:[#allocation7 + $0x1a8] sm:$0xff] }
 0x1a2   :  { %v1531_v4 = vpop.f32.mrb[3].mxu1  ;;  %1750 = vmatprep.subr.bf16.mxu1 %v5694_v24  ;;  %v6146_v10 = vpack.c.bf16 %v5283_v58, %v5283_v58  ;;  %v5076_v51 = vcombine.high %v1959_v45, %v1963_v46  ;;  %v5075_v24 = vcombine.low %v1959_v45, %v1963_v46  ;;  %v4941_v58 = vcombine.low %v1824_v48, %v1828_v49  ;;  %v1975_v60 = vld [vmem:[#allocation7 + $0x600] sm:$0xff] }
 0x1a3   :  { %v6142_v6 = vpack.c.bf16 %v5284_v62, %v5284_v62  ;;  %v1979_v62 = vld [vmem:[#allocation7 + $0x620] sm:$0xff]  ;;  %v4950_v63 = vcombine.high %v1832_v15, %v1836_v56 }
 0x1a4   :  { %v5092_v4 = vcombine.high %v1975_v60, %v1979_v62  ;;  %v5091_v12 = vcombine.low %v1975_v60, %v1979_v62  ;;  %v2027_v48 = vld [vmem:[#allocation7 + $0x7a0] sm:$0xff]  ;;  %v1904_v60 = vld [vmem:[#allocation7 + $0x3c8] sm:$0xff] }
 0x1a5   :  { %1751 = vmatpush1.bf16.msra.mxu1 %v5692_v1  ;;  %3393 = vmatprep.mubr.bf16.mxu0 %v6142_v6  ;;  %v1840_v1 = vld [vmem:[#allocation7 + $0x1c8] sm:$0xff] }
 0x1a6   :  { %3394 = vmatmul.mubr.bf16.vlgmr.msra.gmra.mrb[4].mxu0 %v6146_v10  ;;  %1752 = vmatprep.subr.bf16.mxu1 %v5697_v5  ;;  %v4949_v5 = vcombine.low %v1832_v15, %v1836_v56  ;;  %v1896_v15 = vld [vmem:[#allocation7 + $0x388] sm:$0xff] }
 0x1a7   :  { %3403 = vmatpush1.bf16.msra.mxu0 %v5027_v9  ;;  %v4958_v9 = vcombine.high %v1840_v1, %v1844_v2  ;;  %v1900_v56 = vld [vmem:[#allocation7 + $0x3a8] sm:$0xff] }
 0x1a8   :  { %3404 = vmatprep.subr.bf16.mxu0 %v5036_v11  ;;  %v1848_v11 = vld [vmem:[#allocation7 + $0x208] sm:$0xff] }
 0x1a9   :  { %1753 = vmatpush1.bf16.msra.mxu1 %v5695_v33  ;;  %v1852_v33 = vld [vmem:[#allocation7 + $0x228] sm:$0xff] }
 0x1aa   :  { %3443 = vmatprep.subr.bf16.mxu1 %v4902_v14  ;;  %v4957_v14 = vcombine.low %v1840_v1, %v1844_v2  ;;  %v1908_v62 = vld [vmem:[#allocation7 + $0x3e8] sm:$0xff] }
 0x1ab   :  { %3405 = vmatpush1.bf16.msra.mxu0 %v5035_v18  ;;  %v4966_v18 = vcombine.high %v1848_v11, %v1852_v33  ;;  %v5022_v1 = vcombine.high %v1904_v60, %v1908_v62  ;;  %v1912_v2 = vld [vmem:[#allocation7 + $0x408] sm:$0xff] }
 0x1ac   :  { %1771 = vmatmul.mubr.bf16.vlgmr.msra.gmra.mrb[4].mxu1 %v5890_v27  ;;  %3406 = vmatprep.subr.bf16.mxu0 %v5044_v61  ;;  %v1856_v61 = vld [vmem:[#allocation7 + $0x248] sm:$0xff] }
 0x1ad   :  { %3444 = vmatpush1.bf16.msra.mxu1 %v4901_v20  ;;  %3475 = vmatprep.mubr.bf16.mxu1 %v6142_v6  ;;  %v1860_v20 = vld [vmem:[#allocation7 + $0x268] sm:$0xff] }
 0x1ae   :  { %3445 = vmatprep.subr.bf16.mxu1 %v4910_v22  ;;  %v4965_v22 = vcombine.low %v1848_v11, %v1852_v33  ;;  %v1864_v27 = vld [vmem:[#allocation7 + $0x288] sm:$0xff]  ;;  %v4973_v30 = vcombine.low %v1856_v61, %v1860_v20  ;;  %v5038_v11 = vcombine.high %v1920_v7, %v1924_v8 }
 0x1af   :  { %3407 = vmatpush1.bf16.msra.mxu0 %v5043_v26  ;;  %v4974_v26 = vcombine.high %v1856_v61, %v1860_v20  ;;  %v1928_v33 = vld [vmem:[#allocation7 + $0x488] sm:$0xff] }
 0x1b0   :  { %3408 = vmatprep.subr.bf16.mxu0 %v5052_v28  ;;  %v1868_v28 = vld [vmem:[#allocation7 + $0x2a8] sm:$0xff] }
 0x1b1   :  { %3446 = vmatpush1.bf16.msra.mxu1 %v4909_v0  ;;  %v5107_v0 = vcombine.low %v1991_v16, %v1995_v17  ;;  %v4982_v32 = vcombine.high %v1864_v27, %v1868_v28  ;;  %v4981_v38 = vcombine.low %v1864_v27, %v1868_v28  ;;  %v1936_v16 = vld [vmem:[#allocation7 + $0x4c8] sm:$0xff] }
 0x1b2   :  { %3447 = vmatprep.subr.bf16.mxu1 %v4918_v31  ;;  %v2007_v31 = vld [vmem:[#allocation7 + $0x700] sm:$0xff]  ;;  %v1940_v17 = vld [vmem:[#allocation7 + $0x4e8] sm:$0xff] }
 0x1b3   :  { %3409 = vmatpush1.bf16.msra.mxu0 %v5051_v34  ;;  %v1872_v34 = vld [vmem:[#allocation7 + $0x2c8] sm:$0xff]  ;;  %v5124_v37 = vcombine.high %v2007_v31, %v2011_v19  ;;  %v5054_v61 = vcombine.high %v1936_v16, %v1940_v17 }
 0x1b4   :  { %3410 = vmatprep.subr.bf16.mxu0 %v5060_v35  ;;  %v1876_v35 = vld [vmem:[#allocation7 + $0x2e8] sm:$0xff] }
 0x1b5   :  { %3448 = vmatpush1.bf16.msra.mxu1 %v4917_v36  ;;  %v5115_v36 = vcombine.low %v1999_v23, %v2003_v25  ;;  %v4990_v41 = vcombine.high %v1872_v34, %v1876_v35  ;;  %v4989_v46 = vcombine.low %v1872_v34, %v1876_v35  ;;  %v1944_v20 = vld [vmem:[#allocation7 + $0x508] sm:$0xff] }
 0x1b6   :  { %3449 = vmatprep.subr.bf16.mxu1 %v4926_v39  ;;  %v2015_v39 = vld [vmem:[#allocation7 + $0x740] sm:$0xff]  ;;  %v1952_v23 = vld [vmem:[#allocation7 + $0x548] sm:$0xff] }
 0x1b7   :  { %3411 = vmatpush1.bf16.msra.mxu0 %v5059_v42  ;;  %v1880_v42 = vld [vmem:[#allocation7 + $0x308] sm:$0xff]  ;;  %v5132_v45 = vcombine.high %v2015_v39, %v2019_v40 }
 0x1b8   :  { %3412 = vmatprep.subr.bf16.mxu0 %v5068_v43  ;;  %v1884_v43 = vld [vmem:[#allocation7 + $0x328] sm:$0xff] }
 0x1b9   :  { %3450 = vmatpush1.bf16.msra.mxu1 %v4925_v44  ;;  %v5123_v44 = vcombine.low %v2007_v31, %v2011_v19  ;;  %v4998_v49 = vcombine.high %v1880_v42, %v1884_v43  ;;  %v4997_v54 = vcombine.low %v1880_v42, %v1884_v43  ;;  %v1956_v25 = vld [vmem:[#allocation7 + $0x568] sm:$0xff]  ;;  %v6160_v42 = vld [vmem:[#allocation7 + $0x38] sm:$0xff] }
 0x1ba   :  { %3451 = vmatprep.subr.bf16.mxu1 %v4934_v47  ;;  %v2023_v47 = vld [vmem:[#allocation7 + $0x780] sm:$0xff]  ;;  %v5070_v27 = vcombine.high %v1952_v23, %v1956_v25  ;;  %v1960_v28 = vld [vmem:[#allocation7 + $0x588] sm:$0xff]  ;;  %v5069_v31 = vcombine.low %v1952_v23, %v1956_v25  ;;  %v1798_v23 = vld [vmem:[#allocation7 + $0x78] sm:$0xff] }
 0x1bb   :  { %3413 = vmatpush1.bf16.msra.mxu0 %v5067_v50  ;;  %v1888_v50 = vld [vmem:[#allocation7 + $0x348] sm:$0xff]  ;;  %v5140_v53 = vcombine.high %v2023_v47, %v2027_v48 }
 0x1bc   :  { %3414 = vmatprep.subr.bf16.mxu0 %v5076_v51  ;;  %v1892_v51 = vld [vmem:[#allocation7 + $0x368] sm:$0xff] }
 0x1bd   :  { %3452 = vmatpush1.bf16.msra.mxu1 %v4933_v52  ;;  %v5131_v52 = vcombine.low %v2015_v39, %v2019_v40  ;;  %v1968_v35 = vld [vmem:[#allocation7 + $0x5c8] sm:$0xff]  ;;  %v6156_v39 = vld [vmem:[#allocation7 + $0x18] sm:$0xff] }
 0x1be   :  { %3453 = vmatprep.subr.bf16.mxu1 %v4942_v55  ;;  %v5006_v55 = vcombine.high %v1888_v50, %v1892_v51 }
 0x1bf   :  { %3415 = vmatpush1.bf16.msra.mxu0 %v5075_v24  ;;  %v5139_v24 = vcombine.low %v2023_v47, %v2027_v48  ;;  %v1980_v47 = vld [vmem:[#allocation7 + $0x628] sm:$0xff] }
 0x1c0   :  { %3416 = vmatprep.subr.bf16.mxu0 %v5084_v57  ;;  %v5005_v57 = vcombine.low %v1888_v50, %v1892_v51  ;;  %v1984_v50 = vld [vmem:[#allocation7 + $0x648] sm:$0xff] }
 0x1c1   :  { %3454 = vmatpush1.bf16.msra.mxu1 %v4941_v58  ;;  %v5014_v58 = vcombine.high %v1896_v15, %v1900_v56  ;;  %v1988_v51 = vld [vmem:[#allocation7 + $0x668] sm:$0xff] }
 0x1c2   :  { %3455 = vmatprep.subr.bf16.mxu1 %v4950_v63  ;;  %v5013_v63 = vcombine.low %v1896_v15, %v1900_v56  ;;  %v5101_v15 = vcombine.low %v1984_v50, %v1988_v51 }
 0x1c3   :  { %3417 = vmatpush1.bf16.msra.mxu0 %v5083_v3  ;;  %v1916_v3 = vld [vmem:[#allocation7 + $0x428] sm:$0xff] }
 0x1c4   :  { %3418 = vmatprep.subr.bf16.mxu0 %v5092_v4  ;;  %v5021_v4 = vcombine.low %v1904_v60, %v1908_v62  ;;  %v2008_v62 = vld [vmem:[#allocation7 + $0x708] sm:$0xff] }
 0x1c5   :  { %3456 = vmatpush1.bf16.msra.mxu1 %v4949_v5  ;;  %v5030_v5 = vcombine.high %v1912_v2, %v1916_v3 }
 0x1c6   :  { %3457 = vmatprep.subr.bf16.mxu1 %v4958_v9  ;;  %v5029_v9 = vcombine.low %v1912_v2, %v1916_v3  ;;  %v2016_v3 = vld [vmem:[#allocation7 + $0x748] sm:$0xff] }
 0x1c7   :  { %3419 = vmatpush1.bf16.msra.mxu0 %v5091_v12  ;;  %v1932_v12 = vld [vmem:[#allocation7 + $0x4a8] sm:$0xff] }
 0x1c8   :  { %3420 = vmatprep.subr.bf16.mxu0 %v5100_v13  ;;  %v5037_v13 = vcombine.low %v1920_v7, %v1924_v8  ;;  %v2024_v8 = vld [vmem:[#allocation7 + $0x788] sm:$0xff] }
 0x1c9   :  { %3458 = vmatpush1.bf16.msra.mxu1 %v4957_v14  ;;  %v5046_v14 = vcombine.high %v1928_v33, %v1932_v12 }
 0x1ca   :  { %3459 = vmatprep.subr.bf16.mxu1 %v4966_v18  ;;  %v5045_v18 = vcombine.low %v1928_v33, %v1932_v12  ;;  %v2032_v12 = vld [vmem:[#allocation7 + $0x7c8] sm:$0xff] }
 0x1cb   :  { %3421 = vmatpush1.bf16.msra.mxu0 %v5099_v59  ;;  %v1948_v59 = vld [vmem:[#allocation7 + $0x528] sm:$0xff] }
 0x1cc   :  { %3422 = vmatprep.subr.bf16.mxu0 %v5108_v21  ;;  %v5053_v21 = vcombine.low %v1936_v16, %v1940_v17 }
 0x1cd   :  { %3460 = vmatpush1.bf16.msra.mxu1 %v4965_v22  ;;  %v5062_v22 = vcombine.high %v1944_v20, %v1948_v59 }
 0x1ce   :  { %3461 = vmatprep.subr.bf16.mxu1 %v4974_v26  ;;  %v5061_v26 = vcombine.low %v1944_v20, %v1948_v59  ;;  %v1793_v20 = vld [vmem:[#allocation7 + $0x50] sm:$0xff] }
 0x1cf   :  { %3423 = vmatpush1.bf16.msra.mxu0 %v5107_v0  ;;  %v1964_v0 = vld [vmem:[#allocation7 + $0x5a8] sm:$0xff] }
 0x1d0   :  { %3424 = vmatprep.subr.bf16.mxu0 %v5116_v29  ;;  %v2031_v29 = vld [vmem:[#allocation7 + $0x7c0] sm:$0xff]  ;;  %v5077_v40 = vcombine.low %v1960_v28, %v1964_v0 }
 0x1d1   :  { %3462 = vmatpush1.bf16.msra.mxu1 %v4973_v30  ;;  %v2035_v30 = vld [vmem:[#allocation7 + $0x7e0] sm:$0xff] }
 0x1d2   :  { %3463 = vmatprep.subr.bf16.mxu1 %v4982_v32  ;;  %v5148_v19 = vcombine.high %v2031_v29, %v2035_v30  ;;  %v5078_v32 = vcombine.high %v1960_v28, %v1964_v0  ;;  %v5147_v34 = vcombine.low %v2031_v29, %v2035_v30  ;;  %v1801_v0 = vld [vmem:[#allocation7 + $0x90] sm:$0xff] }
 0x1d3   :  { %3425 = vmatpush1.bf16.msra.mxu0 %v5115_v36  ;;  %v1972_v36 = vld [vmem:[#allocation7 + $0x5e8] sm:$0xff] }
 0x1d4   :  { %3426 = vmatprep.subr.bf16.mxu0 %v5124_v37  ;;  %v6152_v37 = vld [vmem:[#allocation7 + $0x10] sm:$0xff]  ;;  %v5086_v43 = vcombine.high %v1968_v35, %v1972_v36  ;;  %v5085_v48 = vcombine.low %v1968_v35, %v1972_v36 }
 0x1d5   :  { %3464 = vmatpush1.bf16.msra.mxu1 %v4981_v38  ;;  %v6154_v38 = vld [vmem:[#allocation7 + $0x30] sm:$0xff] }
 0x1d6   :  { %3465 = vmatprep.subr.bf16.mxu1 %v4990_v41  ;;  %v4904_v41 = vcombine.high %v6152_v37, %v6154_v38 }
 0x1d7   :  { %3427 = vmatpush1.bf16.msra.mxu0 %v5123_v44  ;;  %v4903_v44 = vcombine.low %v6152_v37, %v6154_v38 }
 0x1d8   :  { %3428 = vmatprep.subr.bf16.mxu0 %v5132_v45  ;;  %v4905_v45 = vcombine.low %v6156_v39, %v6160_v42 }
 0x1d9   :  { %3466 = vmatpush1.bf16.msra.mxu1 %v4989_v46  ;;  %v1976_v46 = vld [vmem:[#allocation7 + $0x608] sm:$0xff] }
 0x1da   :  { %3467 = vmatprep.subr.bf16.mxu1 %v4998_v49  ;;  %v5094_v49 = vcombine.high %v1976_v46, %v1980_v47 }
 0x1db   :  { %3429 = vmatpush1.bf16.msra.mxu0 %v5131_v52  ;;  %v5093_v52 = vcombine.low %v1976_v46, %v1980_v47  ;;  %v1810_v46 = vld [vmem:[#allocation7 + $0xd8] sm:$0xff] }
 0x1dc   :  { %3430 = vmatprep.subr.bf16.mxu0 %v5140_v53  ;;  %v5102_v53 = vcombine.high %v1984_v50, %v1988_v51  ;;  %v1814_v47 = vld [vmem:[#allocation7 + $0xf8] sm:$0xff] }
 0x1dd   :  { %3468 = vmatpush1.bf16.msra.mxu1 %v4997_v54  ;;  %v1992_v54 = vld [vmem:[#allocation7 + $0x688] sm:$0xff]  ;;  %v4929_v50 = vcombine.low %v1810_v46, %v1814_v47 }
 0x1de   :  { %3469 = vmatprep.subr.bf16.mxu1 %v5006_v55  ;;  %v1996_v55 = vld [vmem:[#allocation7 + $0x6a8] sm:$0xff] }
 0x1df   :  { %3431 = vmatpush1.bf16.msra.mxu0 %v5139_v24  ;;  %v5110_v56 = vcombine.high %v1992_v54, %v1996_v55  ;;  %v2000_v24 = vld [vmem:[#allocation7 + $0x6c8] sm:$0xff] }
 0x1e0   :  { %3432 = vmatprep.subr.bf16.mxu0 %v5148_v19  ;;  %v1802_v19 = vld [vmem:[#allocation7 + $0x98] sm:$0xff] }
 0x1e1   :  { %3470 = vmatpush1.bf16.msra.mxu1 %v5005_v57  ;;  %v2004_v57 = vld [vmem:[#allocation7 + $0x6e8] sm:$0xff] }
 0x1e2   :  { %3471 = vmatprep.subr.bf16.mxu1 %v5014_v58  ;;  %v5109_v58 = vcombine.low %v1992_v54, %v1996_v55  ;;  %v5118_v60 = vcombine.high %v2000_v24, %v2004_v57  ;;  %v1829_v54 = vld [vmem:[#allocation7 + $0x170] sm:$0xff]  ;;  %v1826_v55 = vld [vmem:[#allocation7 + $0x158] sm:$0xff] }
 0x1e3   :  { %3433 = vmatpush1.bf16.msra.mxu0 %v5147_v34 }
 0x1e4   :  { %3525 = vmatprep.subr.bf16.mxu0 %v4904_v41  ;;  %v1809_v41 = vld [vmem:[#allocation7 + $0xd0] sm:$0xff] }
 0x1e5   :  { %3472 = vmatpush1.bf16.msra.mxu1 %v5013_v63  ;;  %v2012_v63 = vld [vmem:[#allocation7 + $0x728] sm:$0xff] }
 0x1e6   :  { %3473 = vmatprep.subr.bf16.mxu1 %v5022_v1  ;;  %v5117_v1 = vcombine.low %v2000_v24, %v2004_v57  ;;  %v5126_v2 = vcombine.high %v2008_v62, %v2012_v63 }
 0x1e9   :  { %3474 = vmatpush1.bf16.msra.mxu1 %v5021_v4  ;;  %v2020_v4 = vld [vmem:[#allocation7 + $0x768] sm:$0xff] }
 0x1ea   :  { %3484 = vmatprep.subr.bf16.mxu1 %v5030_v5  ;;  %v5125_v5 = vcombine.low %v2008_v62, %v2012_v63  ;;  %v5134_v7 = vcombine.high %v2016_v3, %v2020_v4  ;;  %v1837_v62 = vld [vmem:[#allocation7 + $0x1b0] sm:$0xff]  ;;  %v1834_v63 = vld [vmem:[#allocation7 + $0x198] sm:$0xff] }
 0x1ec   :  { %3476 = vmatmul.mubr.bf16.vlgmr.msra.gmra.mrb[8].mxu1 %v6146_v10 }
 0x1ed   :  { %3485 = vmatpush1.bf16.msra.mxu1 %v5029_v9  ;;  %v2028_v9 = vld [vmem:[#allocation7 + $0x7a8] sm:$0xff] }
 0x1ee   :  { %3486 = vmatprep.subr.bf16.mxu1 %v5038_v11  ;;  %v5133_v11 = vcombine.low %v2016_v3, %v2020_v4  ;;  %v5142_v33 = vcombine.high %v2024_v8, %v2028_v9 }
 0x1f1   :  { %3487 = vmatpush1.bf16.msra.mxu1 %v5037_v13  ;;  %v2036_v13 = vld [vmem:[#allocation7 + $0x7e8] sm:$0xff] }
 0x1f2   :  { %3488 = vmatprep.subr.bf16.mxu1 %v5046_v14  ;;  %v5141_v14 = vcombine.low %v2024_v8, %v2028_v9  ;;  %v5150_v16 = vcombine.high %v2032_v12, %v2036_v13  ;;  %v5149_v17 = vcombine.low %v2032_v12, %v2036_v13  ;;  %v1845_v8 = vld [vmem:[#allocation7 + $0x1f0] sm:$0xff]  ;;  %v1842_v9 = vld [vmem:[#allocation7 + $0x1d8] sm:$0xff] }
 0x1f5   :  { %3489 = vmatpush1.bf16.msra.mxu1 %v5045_v18  ;;  %v4906_v18 = vcombine.high %v6156_v39, %v6160_v42  ;;  %v4930_v42 = vcombine.high %v1810_v46, %v1814_v47  ;;  %v1873_v47 = vld [vmem:[#allocation7 + $0x2d0] sm:$0xff] }
 0x1f6   :  { %3490 = vmatprep.subr.bf16.mxu1 %v5054_v61 }
 0x1f9   :  { %3491 = vmatpush1.bf16.msra.mxu1 %v5053_v21  ;;  %v1797_v21 = vld [vmem:[#allocation7 + $0x70] sm:$0xff] }
 0x1fa   :  { %3492 = vmatprep.subr.bf16.mxu1 %v5062_v22  ;;  %v1794_v22 = vld [vmem:[#allocation7 + $0x58] sm:$0xff]  ;;  %v4912_v29 = vcombine.high %v1793_v20, %v1797_v21  ;;  %v4911_v34 = vcombine.low %v1793_v20, %v1797_v21 }
 0x1fb   :  { %v4914_v30 = vcombine.high %v1794_v22, %v1798_v23  ;;  %v4913_v35 = vcombine.low %v1794_v22, %v1798_v23  ;;  %v1857_v23 = vld [vmem:[#allocation7 + $0x250] sm:$0xff] }
 0x1fd   :  { %3493 = vmatpush1.bf16.msra.mxu1 %v5061_v26 }
 0x1fe   :  { %3494 = vmatprep.subr.bf16.mxu1 %v5070_v27 }
 0x201   :  { %3495 = vmatpush1.bf16.msra.mxu1 %v5069_v31  ;;  %v1805_v31 = vld [vmem:[#allocation7 + $0xb0] sm:$0xff] }
 0x202   :  { %3496 = vmatprep.subr.bf16.mxu1 %v5078_v32  ;;  %v1806_v32 = vld [vmem:[#allocation7 + $0xb8] sm:$0xff]  ;;  %v4920_v36 = vcombine.high %v1801_v0, %v1805_v31  ;;  %v4919_v37 = vcombine.low %v1801_v0, %v1805_v31 }
 0x203   :  { %v4921_v38 = vcombine.low %v1802_v19, %v1806_v32  ;;  %v1862_v0 = vld [vmem:[#allocation7 + $0x278] sm:$0xff] }
 0x205   :  { %3497 = vmatpush1.bf16.msra.mxu1 %v5077_v40  ;;  %v4922_v40 = vcombine.high %v1802_v19, %v1806_v32  ;;  %v1865_v32 = vld [vmem:[#allocation7 + $0x290] sm:$0xff] }
 0x206   :  { %3498 = vmatprep.subr.bf16.mxu1 %v5086_v43  ;;  %v1813_v43 = vld [vmem:[#allocation7 + $0xf0] sm:$0xff] }
 0x207   :  { %v4928_v39 = vcombine.high %v1809_v41, %v1813_v43 }
 0x209   :  { %3499 = vmatpush1.bf16.msra.mxu1 %v5085_v48  ;;  %v1818_v48 = vld [vmem:[#allocation7 + $0x118] sm:$0xff] }
 0x20a   :  { %3500 = vmatprep.subr.bf16.mxu1 %v5094_v49  ;;  %v4927_v49 = vcombine.low %v1809_v41, %v1813_v43 }
 0x20d   :  { %3501 = vmatpush1.bf16.msra.mxu1 %v5093_v52 }
 0x20e   :  { %3502 = vmatprep.subr.bf16.mxu1 %v5102_v53  ;;  %v1825_v53 = vld [vmem:[#allocation7 + $0x150] sm:$0xff] }
 0x20f   :  { %v4944_v57 = vcombine.high %v1825_v53, %v1829_v54 }
 0x211   :  { %3503 = vmatpush1.bf16.msra.mxu1 %v5101_v15  ;;  %v1830_v15 = vld [vmem:[#allocation7 + $0x178] sm:$0xff] }
 0x212   :  { %3504 = vmatprep.subr.bf16.mxu1 %v5110_v56  ;;  %v4945_v3 = vcombine.low %v1826_v55, %v1830_v15 }
 0x215   :  { %3505 = vmatpush1.bf16.msra.mxu1 %v5109_v58  ;;  %v4946_v58 = vcombine.high %v1826_v55, %v1830_v15  ;;  %v1889_v15 = vld [vmem:[#allocation7 + $0x350] sm:$0xff] }
 0x216   :  { %3506 = vmatprep.subr.bf16.mxu1 %v5118_v60  ;;  %v1833_v60 = vld [vmem:[#allocation7 + $0x190] sm:$0xff] }
 0x217   :  { %v4952_v4 = vcombine.high %v1833_v60, %v1837_v62 }
 0x219   :  { %3507 = vmatpush1.bf16.msra.mxu1 %v5117_v1  ;;  %v1838_v1 = vld [vmem:[#allocation7 + $0x1b8] sm:$0xff] }
 0x21a   :  { %3508 = vmatprep.subr.bf16.mxu1 %v5126_v2  ;;  %v4943_v2 = vcombine.low %v1825_v53, %v1829_v54  ;;  %v4953_v12 = vcombine.low %v1834_v63, %v1838_v1 }
 0x21d   :  { %3509 = vmatpush1.bf16.msra.mxu1 %v5125_v5  ;;  %v4954_v5 = vcombine.high %v1834_v63, %v1838_v1  ;;  %v1897_v1 = vld [vmem:[#allocation7 + $0x390] sm:$0xff] }
 0x21e   :  { %3510 = vmatprep.subr.bf16.mxu1 %v5134_v7  ;;  %v1841_v7 = vld [vmem:[#allocation7 + $0x1d0] sm:$0xff] }
 0x21f   :  { %v4960_v13 = vcombine.high %v1841_v7, %v1845_v8  ;;  %v4959_v20 = vcombine.low %v1841_v7, %v1845_v8 }
 0x221   :  { %3511 = vmatpush1.bf16.msra.mxu1 %v5133_v11  ;;  %v1846_v11 = vld [vmem:[#allocation7 + $0x1f8] sm:$0xff] }
 0x222   :  { %3512 = vmatprep.subr.bf16.mxu1 %v5142_v33  ;;  %v4951_v33 = vcombine.low %v1833_v60, %v1837_v62 }
 0x225   :  { %3513 = vmatpush1.bf16.msra.mxu1 %v5141_v14  ;;  %v4962_v14 = vcombine.high %v1842_v9, %v1846_v11 }
 0x226   :  { %3514 = vmatprep.subr.bf16.mxu1 %v5150_v16  ;;  %v1849_v16 = vld [vmem:[#allocation7 + $0x210] sm:$0xff] }
 0x229   :  { %3515 = vmatpush1.bf16.msra.mxu1 %v5149_v17  ;;  %v1853_v17 = vld [vmem:[#allocation7 + $0x230] sm:$0xff] }
 0x22a   :  { %3607 = vmatprep.subr.bf16.mxu1 %v4906_v18  ;;  %v1850_v18 = vld [vmem:[#allocation7 + $0x218] sm:$0xff]  ;;  %v4968_v21 = vcombine.high %v1849_v16, %v1853_v17 }
 0x27f   :  { %v1772_v61 = vpop.f32.mrb[4].mxu1 }
 0x280   :  { %v1774_v59 = vpop.f32.mrb[5].mxu1  ;;  %v6170_v27 = vpack.c.bf16 %v1772_v61, %v1772_v61  ;;  %v1854_v61 = vld [vmem:[#allocation7 + $0x238] sm:$0xff] }
 0x281   :  { %v6168_v25 = vpack.c.bf16 %v1774_v59, %v1774_v59  ;;  %v1776_v26 = vpop.f32.mrb[6].mxu1  ;;  %v4961_v59 = vcombine.low %v1842_v9, %v1846_v11  ;;  %v4970_v22 = vcombine.high %v1850_v18, %v1854_v61  ;;  %v1905_v11 = vld [vmem:[#allocation7 + $0x3d0] sm:$0xff] }
 0x282   :  { %v1777_v28 = vpop.f32.mrb[7].mxu1  ;;  %v1861_v26 = vld [vmem:[#allocation7 + $0x270] sm:$0xff] }
 0x283   :  { %3434 = vmatprep.mubr.bf16.mxu0 %v6168_v25  ;;  %3516 = vmatprep.mubr.bf16.mxu1 %v6168_v25  ;;  %v1858_v28 = vld [vmem:[#allocation7 + $0x258] sm:$0xff]  ;;  %v4976_v31 = vcombine.high %v1857_v23, %v1861_v26 }
 0x284   :  { %3435 = vmatmul.mubr.bf16.vlgmr.msra.gmra.mrb[4].mxu0 %v6170_v27  ;;  %3517 = vmatmul.mubr.bf16.vlgmr.msra.gmra.mrb[8].mxu1 %v6170_v27  ;;  %v4978_v19 = vcombine.high %v1858_v28, %v1862_v0  ;;  %v4977_v41 = vcombine.low %v1858_v28, %v1862_v0  ;;  %v1921_v0 = vld [vmem:[#allocation7 + $0x450] sm:$0xff] }
 0x285   :  { %3526 = vmatpush1.bf16.msra.mxu0 %v4903_v44  ;;  %3608 = vmatpush1.bf16.msra.mxu1 %v4905_v45  ;;  %v1817_v44 = vld [vmem:[#allocation7 + $0x110] sm:$0xff] }
 0x286   :  { %3557 = vmatprep.mubr.bf16.mxu0 %v6142_v6  ;;  %3639 = vmatprep.mubr.bf16.mxu1 %v6142_v6  ;;  %v1821_v45 = vld [vmem:[#allocation7 + $0x130] sm:$0xff]  ;;  %v1822_v6 = vld [vmem:[#allocation7 + $0x138] sm:$0xff] }
 0x287   :  { %3527 = vmatprep.subr.bf16.mxu0 %v4912_v29  ;;  %3609 = vmatprep.subr.bf16.mxu1 %v4914_v30  ;;  %v4936_v51 = vcombine.high %v1817_v44, %v1821_v45  ;;  %v4938_v52 = vcombine.high %v1818_v48, %v1822_v6  ;;  %v4935_v56 = vcombine.low %v1817_v44, %v1821_v45 }
 0x288   :  { %v4937_v24 = vcombine.low %v1818_v48, %v1822_v6  ;;  %v4967_v29 = vcombine.low %v1849_v16, %v1853_v17  ;;  %v4969_v30 = vcombine.low %v1850_v18, %v1854_v61  ;;  %v1881_v6 = vld [vmem:[#allocation7 + $0x310] sm:$0xff] }
 0x289   :  { %3528 = vmatpush1.bf16.msra.mxu0 %v4911_v34  ;;  %3610 = vmatpush1.bf16.msra.mxu1 %v4913_v35  ;;  %v1869_v34 = vld [vmem:[#allocation7 + $0x2b0] sm:$0xff]  ;;  %v1866_v35 = vld [vmem:[#allocation7 + $0x298] sm:$0xff] }
 0x28a   :  { %3529 = vmatprep.subr.bf16.mxu0 %v4920_v36  ;;  %3611 = vmatprep.subr.bf16.mxu1 %v4922_v40  ;;  %v1870_v36 = vld [vmem:[#allocation7 + $0x2b8] sm:$0xff]  ;;  %v4975_v40 = vcombine.low %v1857_v23, %v1861_v26  ;;  %v4984_v43 = vcombine.high %v1865_v32, %v1869_v34  ;;  %v1913_v61 = vld [vmem:[#allocation7 + $0x410] sm:$0xff] }
 0x28b   :  { %v4986_v46 = vcombine.high %v1866_v35, %v1870_v36  ;;  %v4985_v44 = vcombine.low %v1866_v35, %v1870_v36  ;;  %v1929_v36 = vld [vmem:[#allocation7 + $0x490] sm:$0xff] }
 0x28d   :  { %3530 = vmatpush1.bf16.msra.mxu0 %v4919_v37  ;;  %3612 = vmatpush1.bf16.msra.mxu1 %v4921_v38  ;;  %v1877_v37 = vld [vmem:[#allocation7 + $0x2f0] sm:$0xff]  ;;  %v1874_v38 = vld [vmem:[#allocation7 + $0x2d8] sm:$0xff] }
 0x28e   :  { %3531 = vmatprep.subr.bf16.mxu0 %v4928_v39  ;;  %3613 = vmatprep.subr.bf16.mxu1 %v4930_v42  ;;  %v1878_v39 = vld [vmem:[#allocation7 + $0x2f8] sm:$0xff]  ;;  %v4983_v42 = vcombine.low %v1865_v32, %v1869_v34  ;;  %v4992_v45 = vcombine.high %v1873_v47, %v1877_v37 }
 0x28f   :  { %v4994_v48 = vcombine.high %v1874_v38, %v1878_v39  ;;  %v4993_v53 = vcombine.low %v1874_v38, %v1878_v39  ;;  %v1937_v39 = vld [vmem:[#allocation7 + $0x4d0] sm:$0xff] }
 0x291   :  { %3532 = vmatpush1.bf16.msra.mxu0 %v4927_v49  ;;  %3614 = vmatpush1.bf16.msra.mxu1 %v4929_v50  ;;  %v1885_v49 = vld [vmem:[#allocation7 + $0x330] sm:$0xff]  ;;  %v1882_v50 = vld [vmem:[#allocation7 + $0x318] sm:$0xff] }
 0x292   :  { %3533 = vmatprep.subr.bf16.mxu0 %v4936_v51  ;;  %3615 = vmatprep.subr.bf16.mxu1 %v4938_v52  ;;  %v1886_v51 = vld [vmem:[#allocation7 + $0x338] sm:$0xff]  ;;  %v4991_v52 = vcombine.low %v1873_v47, %v1877_v37  ;;  %v5000_v54 = vcombine.high %v1881_v6, %v1885_v49 }
 0x293   :  { %v5002_v55 = vcombine.high %v1882_v50, %v1886_v51  ;;  %v5001_v60 = vcombine.low %v1882_v50, %v1886_v51  ;;  %v1945_v50 = vld [vmem:[#allocation7 + $0x510] sm:$0xff] }
 0x294   :  { %v1949_v51 = vld [vmem:[#allocation7 + $0x530] sm:$0xff] }
 0x295   :  { %3534 = vmatpush1.bf16.msra.mxu0 %v4935_v56  ;;  %3616 = vmatpush1.bf16.msra.mxu1 %v4937_v24  ;;  %v1893_v56 = vld [vmem:[#allocation7 + $0x370] sm:$0xff]  ;;  %v1890_v24 = vld [vmem:[#allocation7 + $0x358] sm:$0xff] }
 0x296   :  { %3535 = vmatprep.subr.bf16.mxu0 %v4944_v57  ;;  %3617 = vmatprep.subr.bf16.mxu1 %v4946_v58  ;;  %v1894_v57 = vld [vmem:[#allocation7 + $0x378] sm:$0xff]  ;;  %v4999_v58 = vcombine.low %v1881_v6, %v1885_v49  ;;  %v5008_v62 = vcombine.high %v1889_v15, %v1893_v56 }
 0x297   :  { %v5010_v63 = vcombine.high %v1890_v24, %v1894_v57  ;;  %v5009_v7 = vcombine.low %v1890_v24, %v1894_v57  ;;  %v1957_v24 = vld [vmem:[#allocation7 + $0x570] sm:$0xff]  ;;  %v1954_v57 = vld [vmem:[#allocation7 + $0x558] sm:$0xff] }
 0x299   :  { %3536 = vmatpush1.bf16.msra.mxu0 %v4943_v2  ;;  %3618 = vmatpush1.bf16.msra.mxu1 %v4945_v3  ;;  %v1901_v2 = vld [vmem:[#allocation7 + $0x3b0] sm:$0xff]  ;;  %v1898_v3 = vld [vmem:[#allocation7 + $0x398] sm:$0xff] }
 0x29a   :  { %3537 = vmatprep.subr.bf16.mxu0 %v4952_v4  ;;  %3619 = vmatprep.subr.bf16.mxu1 %v4954_v5  ;;  %v1902_v4 = vld [vmem:[#allocation7 + $0x3b8] sm:$0xff]  ;;  %v5007_v5 = vcombine.low %v1889_v15, %v1893_v56  ;;  %v5016_v8 = vcombine.high %v1897_v1, %v1901_v2  ;;  %v1953_v56 = vld [vmem:[#allocation7 + $0x550] sm:$0xff] }
 0x29b   :  { %v5018_v9 = vcombine.high %v1898_v3, %v1902_v4  ;;  %v5017_v16 = vcombine.low %v1898_v3, %v1902_v4  ;;  %v1965_v3 = vld [vmem:[#allocation7 + $0x5b0] sm:$0xff]  ;;  %v1962_v4 = vld [vmem:[#allocation7 + $0x598] sm:$0xff] }
 0x29d   :  { %3538 = vmatpush1.bf16.msra.mxu0 %v4951_v33  ;;  %3620 = vmatpush1.bf16.msra.mxu1 %v4953_v12  ;;  %v1909_v33 = vld [vmem:[#allocation7 + $0x3f0] sm:$0xff]  ;;  %v1906_v12 = vld [vmem:[#allocation7 + $0x3d8] sm:$0xff] }
 0x29e   :  { %3539 = vmatprep.subr.bf16.mxu0 %v4960_v13  ;;  %3621 = vmatprep.subr.bf16.mxu1 %v4962_v14  ;;  %v1910_v13 = vld [vmem:[#allocation7 + $0x3f8] sm:$0xff]  ;;  %v5015_v14 = vcombine.low %v1897_v1, %v1901_v2  ;;  %v5024_v17 = vcombine.high %v1905_v11, %v1909_v33  ;;  %v1961_v2 = vld [vmem:[#allocation7 + $0x590] sm:$0xff] }
 0x29f   :  { %v5026_v18 = vcombine.high %v1906_v12, %v1910_v13  ;;  %v5025_v23 = vcombine.low %v1906_v12, %v1910_v13  ;;  %v1973_v12 = vld [vmem:[#allocation7 + $0x5f0] sm:$0xff]  ;;  %v1970_v13 = vld [vmem:[#allocation7 + $0x5d8] sm:$0xff] }
 0x2a1   :  { %3540 = vmatpush1.bf16.msra.mxu0 %v4959_v20  ;;  %3622 = vmatpush1.bf16.msra.mxu1 %v4961_v59  ;;  %v1917_v20 = vld [vmem:[#allocation7 + $0x430] sm:$0xff]  ;;  %v1914_v59 = vld [vmem:[#allocation7 + $0x418] sm:$0xff] }
 0x2a2   :  { %3541 = vmatprep.subr.bf16.mxu0 %v4968_v21  ;;  %3623 = vmatprep.subr.bf16.mxu1 %v4970_v22  ;;  %v1918_v21 = vld [vmem:[#allocation7 + $0x438] sm:$0xff]  ;;  %v5023_v22 = vcombine.low %v1905_v11, %v1909_v33  ;;  %v5032_v26 = vcombine.high %v1913_v61, %v1917_v20  ;;  %v1969_v33 = vld [vmem:[#allocation7 + $0x5d0] sm:$0xff] }
 0x2a3   :  { %v5034_v28 = vcombine.high %v1914_v59, %v1918_v21  ;;  %v5033_v32 = vcombine.low %v1914_v59, %v1918_v21  ;;  %v1981_v59 = vld [vmem:[#allocation7 + $0x630] sm:$0xff]  ;;  %v1978_v21 = vld [vmem:[#allocation7 + $0x618] sm:$0xff] }
 0x2a5   :  { %3542 = vmatpush1.bf16.msra.mxu0 %v4967_v29  ;;  %3624 = vmatpush1.bf16.msra.mxu1 %v4969_v30  ;;  %v1925_v29 = vld [vmem:[#allocation7 + $0x470] sm:$0xff]  ;;  %v1922_v30 = vld [vmem:[#allocation7 + $0x458] sm:$0xff] }
 0x2a6   :  { %3543 = vmatprep.subr.bf16.mxu0 %v4976_v31  ;;  %3625 = vmatprep.subr.bf16.mxu1 %v4978_v19  ;;  %v1926_v31 = vld [vmem:[#allocation7 + $0x478] sm:$0xff]  ;;  %v5031_v19 = vcombine.low %v1913_v61, %v1917_v20  ;;  %v5040_v34 = vcombine.high %v1921_v0, %v1925_v29  ;;  %v1977_v20 = vld [vmem:[#allocation7 + $0x610] sm:$0xff] }
 0x2a7   :  { %v5042_v35 = vcombine.high %v1922_v30, %v1926_v31  ;;  %v5041_v47 = vcombine.low %v1922_v30, %v1926_v31  ;;  %v1989_v30 = vld [vmem:[#allocation7 + $0x670] sm:$0xff]  ;;  %v1986_v31 = vld [vmem:[#allocation7 + $0x658] sm:$0xff] }
 0x2a9   :  { %3544 = vmatpush1.bf16.msra.mxu0 %v4975_v40  ;;  %3626 = vmatpush1.bf16.msra.mxu1 %v4977_v41  ;;  %v1933_v40 = vld [vmem:[#allocation7 + $0x4b0] sm:$0xff]  ;;  %v1930_v41 = vld [vmem:[#allocation7 + $0x498] sm:$0xff] }
 0x2aa   :  { %3545 = vmatprep.subr.bf16.mxu0 %v4984_v43  ;;  %3627 = vmatprep.subr.bf16.mxu1 %v4986_v46  ;;  %v1934_v43 = vld [vmem:[#allocation7 + $0x4b8] sm:$0xff]  ;;  %v5039_v46 = vcombine.low %v1921_v0, %v1925_v29  ;;  %v5048_v37 = vcombine.high %v1929_v36, %v1933_v40  ;;  %v1985_v29 = vld [vmem:[#allocation7 + $0x650] sm:$0xff] }
 0x2ab   :  { %v5050_v38 = vcombine.high %v1930_v41, %v1934_v43 }
 0x2ad   :  { %3546 = vmatpush1.bf16.msra.mxu0 %v4983_v42  ;;  %3628 = vmatpush1.bf16.msra.mxu1 %v4985_v44  ;;  %v1941_v42 = vld [vmem:[#allocation7 + $0x4f0] sm:$0xff]  ;;  %v1938_v44 = vld [vmem:[#allocation7 + $0x4d8] sm:$0xff] }
 0x2ae   :  { %3547 = vmatprep.subr.bf16.mxu0 %v4992_v45  ;;  %3629 = vmatprep.subr.bf16.mxu1 %v4994_v48  ;;  %v1942_v45 = vld [vmem:[#allocation7 + $0x4f8] sm:$0xff]  ;;  %v5049_v48 = vcombine.low %v1930_v41, %v1934_v43  ;;  %v5056_v6 = vcombine.high %v1937_v39, %v1941_v42  ;;  %v1997_v41 = vld [vmem:[#allocation7 + $0x6b0] sm:$0xff] }
 0x2af   :  { %v5058_v49 = vcombine.high %v1938_v44, %v1942_v45  ;;  %v1994_v43 = vld [vmem:[#allocation7 + $0x698] sm:$0xff] }
 0x2b1   :  { %3548 = vmatpush1.bf16.msra.mxu0 %v4991_v52  ;;  %3630 = vmatpush1.bf16.msra.mxu1 %v4993_v53  ;;  %v1950_v52 = vld [vmem:[#allocation7 + $0x538] sm:$0xff]  ;;  %v5055_v53 = vcombine.low %v1937_v39, %v1941_v42  ;;  %v2001_v42 = vld [vmem:[#allocation7 + $0x6d0] sm:$0xff] }
 0x2b2   :  { %3549 = vmatprep.subr.bf16.mxu0 %v5000_v54  ;;  %3631 = vmatprep.subr.bf16.mxu1 %v5002_v55  ;;  %v5057_v54 = vcombine.low %v1938_v44, %v1942_v45  ;;  %v5064_v55 = vcombine.high %v1945_v50, %v1949_v51  ;;  %v2005_v44 = vld [vmem:[#allocation7 + $0x6f0] sm:$0xff]  ;;  %v2002_v45 = vld [vmem:[#allocation7 + $0x6d8] sm:$0xff] }
 0x2b5   :  { %3550 = vmatpush1.bf16.msra.mxu0 %v4999_v58  ;;  %3632 = vmatpush1.bf16.msra.mxu1 %v5001_v60  ;;  %v1958_v58 = vld [vmem:[#allocation7 + $0x578] sm:$0xff]  ;;  %v5063_v60 = vcombine.low %v1945_v50, %v1949_v51  ;;  %v2009_v51 = vld [vmem:[#allocation7 + $0x710] sm:$0xff] }
 0x2b6   :  { %3551 = vmatprep.subr.bf16.mxu0 %v5008_v62  ;;  %3633 = vmatprep.subr.bf16.mxu1 %v5010_v63  ;;  %v5072_v63 = vcombine.high %v1953_v56, %v1957_v24  ;;  %v5074_v1 = vcombine.high %v1954_v57, %v1958_v58 }
 0x2b9   :  { %3552 = vmatpush1.bf16.msra.mxu0 %v5007_v5  ;;  %3634 = vmatpush1.bf16.msra.mxu1 %v5009_v7  ;;  %v1966_v5 = vld [vmem:[#allocation7 + $0x5b8] sm:$0xff]  ;;  %v5071_v7 = vcombine.low %v1953_v56, %v1957_v24  ;;  %v2017_v24 = vld [vmem:[#allocation7 + $0x750] sm:$0xff] }
 0x2ba   :  { %3553 = vmatprep.subr.bf16.mxu0 %v5016_v8  ;;  %3635 = vmatprep.subr.bf16.mxu1 %v5018_v9  ;;  %v5073_v8 = vcombine.low %v1954_v57, %v1958_v58  ;;  %v5080_v9 = vcombine.high %v1961_v2, %v1965_v3  ;;  %v5082_v11 = vcombine.high %v1962_v4, %v1966_v5  ;;  %v2021_v57 = vld [vmem:[#allocation7 + $0x770] sm:$0xff]  ;;  %v2018_v58 = vld [vmem:[#allocation7 + $0x758] sm:$0xff] }
 0x2bd   :  { %3554 = vmatpush1.bf16.msra.mxu0 %v5015_v14  ;;  %3636 = vmatpush1.bf16.msra.mxu1 %v5017_v16  ;;  %v1974_v14 = vld [vmem:[#allocation7 + $0x5f8] sm:$0xff]  ;;  %v5079_v16 = vcombine.low %v1961_v2, %v1965_v3  ;;  %v2025_v3 = vld [vmem:[#allocation7 + $0x790] sm:$0xff] }
 0x2be   :  { %3555 = vmatprep.subr.bf16.mxu0 %v5024_v17  ;;  %3637 = vmatprep.subr.bf16.mxu1 %v5026_v18  ;;  %v5081_v17 = vcombine.low %v1962_v4, %v1966_v5  ;;  %v5088_v18 = vcombine.high %v1969_v33, %v1973_v12  ;;  %v5090_v61 = vcombine.high %v1970_v13, %v1974_v14  ;;  %v2029_v4 = vld [vmem:[#allocation7 + $0x7b0] sm:$0xff]  ;;  %v2026_v5 = vld [vmem:[#allocation7 + $0x798] sm:$0xff] }
 0x2c1   :  { %3556 = vmatpush1.bf16.msra.mxu0 %v5023_v22  ;;  %3638 = vmatpush1.bf16.msra.mxu1 %v5025_v23  ;;  %v1982_v22 = vld [vmem:[#allocation7 + $0x638] sm:$0xff]  ;;  %v5087_v23 = vcombine.low %v1969_v33, %v1973_v12  ;;  %v2033_v12 = vld [vmem:[#allocation7 + $0x7d0] sm:$0xff] }
 0x2c2   :  { %3566 = vmatprep.subr.bf16.mxu0 %v5032_v26  ;;  %3648 = vmatprep.subr.bf16.mxu1 %v5034_v28  ;;  %v5089_v26 = vcombine.low %v1970_v13, %v1974_v14  ;;  %v5096_v28 = vcombine.high %v1977_v20, %v1981_v59  ;;  %v5098_v0 = vcombine.high %v1978_v21, %v1982_v22  ;;  %v2037_v13 = vld [vmem:[#allocation7 + $0x7f0] sm:$0xff]  ;;  %v2034_v14 = vld [vmem:[#allocation7 + $0x7d8] sm:$0xff] }
 0x2c4   :  { %3558 = vmatmul.mubr.bf16.vlgmr.msra.gmra.mrb[8].mxu0 %v6146_v10  ;;  %3640 = vmatmul.mubr.bf16.vlgmr.msra.gmra.mrb[12].mxu1 %v6146_v10  ;;  %v5047_v10 = vcombine.low %v1929_v36, %v1933_v40  ;;  %v1993_v40 = vld [vmem:[#allocation7 + $0x690] sm:$0xff] }
 0x2c5   :  { %3567 = vmatpush1.bf16.msra.mxu0 %v5031_v19  ;;  %3598 = vmatprep.mubr.bf16.mxu0 %v6168_v25  ;;  %v1990_v19 = vld [vmem:[#allocation7 + $0x678] sm:$0xff] }
 0x2c6   :  { %3649 = vmatpush1.bf16.msra.mxu1 %v5033_v32  ;;  %3680 = vmatprep.mubr.bf16.mxu1 %v6168_v25  ;;  %v1946_v25 = vld [vmem:[#allocation7 + $0x518] sm:$0xff]  ;;  %v5095_v32 = vcombine.low %v1977_v20, %v1981_v59  ;;  %v5106_v36 = vcombine.high %v1986_v31, %v1990_v19  ;;  %v5151_v59 = vcombine.low %v2033_v12, %v2037_v13 }
 0x2c7   :  { %3568 = vmatprep.subr.bf16.mxu0 %v5040_v34  ;;  %3650 = vmatprep.subr.bf16.mxu1 %v5042_v35  ;;  %v5066_v15 = vcombine.high %v1946_v25, %v1950_v52  ;;  %v5065_v62 = vcombine.low %v1946_v25, %v1950_v52  ;;  %v5097_v34 = vcombine.low %v1978_v21, %v1982_v22  ;;  %v2013_v25 = vld [vmem:[#allocation7 + $0x730] sm:$0xff]  ;;  %v2010_v52 = vld [vmem:[#allocation7 + $0x718] sm:$0xff]  ;;  %v5700_v22 = vld [vmem:[#allocation8 + $0x4] ss:$8 sps:$4 sm:$0xff]  }
 0x2c8   :  { %v5104_v35 = vcombine.high %v1985_v29, %v1989_v30 }
 0x2c9   :  { %3569 = vmatpush1.bf16.msra.mxu0 %v5039_v46  ;;  %v1998_v46 = vld [vmem:[#allocation7 + $0x6b8] sm:$0xff] }
 0x2ca   :  { %3651 = vmatpush1.bf16.msra.mxu1 %v5041_v47  ;;  %3570 = vmatprep.subr.bf16.mxu0 %v5048_v37  ;;  %v5103_v47 = vcombine.low %v1985_v29, %v1989_v30  ;;  %v5105_v37 = vcombine.low %v1986_v31, %v1990_v19  ;;  %v5114_v39 = vcombine.high %v1994_v43, %v1998_v46  ;;  %v5704_v29 = vld [vmem:[#allocation8 + $0x20] ss:$8 sps:$4 sm:$0xff]   ;;  %v5709_v30 = vld [vmem:[#allocation8 + $0x34] ss:$8 sps:$4 sm:$0xff]   ;;  %v5707_v31 = vld [vmem:[#allocation8 + $0x30] ss:$8 sps:$4 sm:$0xff]  }
 0x2cb   :  { %3652 = vmatprep.subr.bf16.mxu1 %v5050_v38  ;;  %v5112_v38 = vcombine.high %v1993_v40, %v1997_v41  ;;  %v5712_v19 = vld [vmem:[#allocation8 + $0x44] ss:$8 sps:$4 sm:$0xff]  }
 0x2cd   :  { %3571 = vmatpush1.bf16.msra.mxu0 %v5047_v10  ;;  %v2006_v10 = vld [vmem:[#allocation7 + $0x6f8] sm:$0xff] }
 0x2ce   :  { %3653 = vmatpush1.bf16.msra.mxu1 %v5049_v48  ;;  %3572 = vmatprep.subr.bf16.mxu0 %v5056_v6  ;;  %v5111_v48 = vcombine.low %v1993_v40, %v1997_v41  ;;  %v5113_v6 = vcombine.low %v1994_v43, %v1998_v46  ;;  %v5122_v50 = vcombine.high %v2002_v45, %v2006_v10  ;;  %v5721_v40 = vld [vmem:[#allocation8 + $0x74] ss:$8 sps:$4 sm:$0xff]   ;;  %v5719_v41 = vld [vmem:[#allocation8 + $0x70] ss:$8 sps:$4 sm:$0xff]   ;;  %v5724_v43 = vld [vmem:[#allocation8 + $0x84] ss:$8 sps:$4 sm:$0xff]  }
 0x2cf   :  { %3654 = vmatprep.subr.bf16.mxu1 %v5058_v49  ;;  %v5120_v49 = vcombine.high %v2001_v42, %v2005_v44  ;;  %v5722_v46 = vld [vmem:[#allocation8 + $0x80] ss:$8 sps:$4 sm:$0xff]  }
 0x2d1   :  { %3573 = vmatpush1.bf16.msra.mxu0 %v5055_v53  ;;  %v2014_v53 = vld [vmem:[#allocation7 + $0x738] sm:$0xff] }
 0x2d2   :  { %3655 = vmatpush1.bf16.msra.mxu1 %v5057_v54  ;;  %3574 = vmatprep.subr.bf16.mxu0 %v5064_v55  ;;  %v5119_v54 = vcombine.low %v2001_v42, %v2005_v44  ;;  %v5121_v55 = vcombine.low %v2002_v45, %v2006_v10  ;;  %v5130_v56 = vcombine.high %v2010_v52, %v2014_v53  ;;  %v5733_v42 = vld [vmem:[#allocation8 + $0xb4] ss:$8 sps:$4 sm:$0xff]   ;;  %v5731_v44 = vld [vmem:[#allocation8 + $0xb0] ss:$8 sps:$4 sm:$0xff]   ;;  %v5736_v45 = vld [vmem:[#allocation8 + $0xc4] ss:$8 sps:$4 sm:$0xff]  }
 0x2d3   :  { %3656 = vmatprep.subr.bf16.mxu1 %v5066_v15  ;;  %v5128_v15 = vcombine.high %v2009_v51, %v2013_v25  ;;  %v5734_v10 = vld [vmem:[#allocation8 + $0xc0] ss:$8 sps:$4 sm:$0xff]  }
 0x2d5   :  { %3575 = vmatpush1.bf16.msra.mxu0 %v5063_v60  ;;  %v2022_v60 = vld [vmem:[#allocation7 + $0x778] sm:$0xff] }
 0x2d6   :  { %3657 = vmatpush1.bf16.msra.mxu1 %v5065_v62  ;;  %3576 = vmatprep.subr.bf16.mxu0 %v5072_v63  ;;  %v5127_v62 = vcombine.low %v2009_v51, %v2013_v25  ;;  %v5129_v63 = vcombine.low %v2010_v52, %v2014_v53  ;;  %v5138_v2 = vcombine.high %v2018_v58, %v2022_v60  ;;  %v5745_v51 = vld [vmem:[#allocation8 + $0xf4] ss:$8 sps:$4 sm:$0xff]   ;;  %v5743_v25 = vld [vmem:[#allocation8 + $0xf0] ss:$8 sps:$4 sm:$0xff]   ;;  %v5748_v52 = vld [vmem:[#allocation8 + $0x104] ss:$8 sps:$4 sm:$0xff]   ;;  %v2041_v53 = vlaneseq }
 0x2d7   :  { %3658 = vmatprep.subr.bf16.mxu1 %v5074_v1  ;;  %v5136_v1 = vcombine.high %v2017_v24, %v2021_v57 }
 0x2d9   :  { %3577 = vmatpush1.bf16.msra.mxu0 %v5071_v7  ;;  %v2030_v7 = vld [vmem:[#allocation7 + $0x7b8] sm:$0xff] }
 0x2da   :  { %3659 = vmatpush1.bf16.msra.mxu1 %v5073_v8  ;;  %3578 = vmatprep.subr.bf16.mxu0 %v5080_v9  ;;  %v5135_v8 = vcombine.low %v2017_v24, %v2021_v57  ;;  %v5137_v9 = vcombine.low %v2018_v58, %v2022_v60  ;;  %v5146_v33 = vcombine.high %v2026_v5, %v2030_v7 }
 0x2db   :  { %3660 = vmatprep.subr.bf16.mxu1 %v5082_v11  ;;  %v5144_v11 = vcombine.high %v2025_v3, %v2029_v4 }
 0x2dd   :  { %3579 = vmatpush1.bf16.msra.mxu0 %v5079_v16  ;;  %v2038_v16 = vld [vmem:[#allocation7 + $0x7f8] sm:$0xff] }
 0x2de   :  { %3661 = vmatpush1.bf16.msra.mxu1 %v5081_v17  ;;  %3580 = vmatprep.subr.bf16.mxu0 %v5088_v18  ;;  %v5143_v17 = vcombine.low %v2025_v3, %v2029_v4  ;;  %v5145_v18 = vcombine.low %v2026_v5, %v2030_v7  ;;  %v5154_v20 = vcombine.high %v2034_v14, %v2038_v16 }
 0x2df   :  { %3662 = vmatprep.subr.bf16.mxu1 %v5090_v61  ;;  %v5152_v61 = vcombine.high %v2033_v12, %v2037_v13  ;;  %v5153_v21 = vcombine.low %v2034_v14, %v2038_v16  ;;  %v5746_v16 = vld [vmem:[#allocation8 + $0x100] ss:$8 sps:$4 sm:$0xff]  }
 0x2e1   :  { %3581 = vmatpush1.bf16.msra.mxu0 %v5087_v23  ;;  %v5698_v23 = vld [vmem:[#allocation8] ss:$8 sps:$4 sm:$0xff]  }
 0x2e2   :  { %3663 = vmatpush1.bf16.msra.mxu1 %v5089_v26  ;;  %3582 = vmatprep.subr.bf16.mxu0 %v5096_v28  ;;  %v5703_v26 = vld [vmem:[#allocation8 + $0x14] ss:$8 sps:$4 sm:$0xff]   ;;  %v5701_v28 = vld [vmem:[#allocation8 + $0x10] ss:$8 sps:$4 sm:$0xff]  }
 0x2e3   :  { %3664 = vmatprep.subr.bf16.mxu1 %v5098_v0  ;;  %v5706_v0 = vld [vmem:[#allocation8 + $0x24] ss:$8 sps:$4 sm:$0xff]  }
 0x2e5   :  { %3583 = vmatpush1.bf16.msra.mxu0 %v5095_v32  ;;  %v5710_v32 = vld [vmem:[#allocation8 + $0x40] ss:$8 sps:$4 sm:$0xff]  }
 0x2e6   :  { %3665 = vmatpush1.bf16.msra.mxu1 %v5097_v34  ;;  %3584 = vmatprep.subr.bf16.mxu0 %v5104_v35  ;;  %v5715_v34 = vld [vmem:[#allocation8 + $0x54] ss:$8 sps:$4 sm:$0xff]   ;;  %v5713_v35 = vld [vmem:[#allocation8 + $0x50] ss:$8 sps:$4 sm:$0xff]  }
 0x2e7   :  { %3666 = vmatprep.subr.bf16.mxu1 %v5106_v36  ;;  %v5716_v36 = vld [vmem:[#allocation8 + $0x60] ss:$8 sps:$4 sm:$0xff]  }
 0x2e9   :  { %3585 = vmatpush1.bf16.msra.mxu0 %v5103_v47  ;;  %v5727_v47 = vld [vmem:[#allocation8 + $0x94] ss:$8 sps:$4 sm:$0xff]  }
 0x2ea   :  { %3667 = vmatpush1.bf16.msra.mxu1 %v5105_v37  ;;  %3586 = vmatprep.subr.bf16.mxu0 %v5112_v38  ;;  %v5725_v37 = vld [vmem:[#allocation8 + $0x90] ss:$8 sps:$4 sm:$0xff]   ;;  %v5730_v38 = vld [vmem:[#allocation8 + $0xa4] ss:$8 sps:$4 sm:$0xff]  }
 0x2eb   :  { %3668 = vmatprep.subr.bf16.mxu1 %v5114_v39  ;;  %v5728_v39 = vld [vmem:[#allocation8 + $0xa0] ss:$8 sps:$4 sm:$0xff]  }
 0x2ed   :  { %3587 = vmatpush1.bf16.msra.mxu0 %v5111_v48  ;;  %v5739_v48 = vld [vmem:[#allocation8 + $0xd4] ss:$8 sps:$4 sm:$0xff]  }
 0x2ee   :  { %3669 = vmatpush1.bf16.msra.mxu1 %v5113_v6  ;;  %3588 = vmatprep.subr.bf16.mxu0 %v5120_v49  ;;  %v5737_v6 = vld [vmem:[#allocation8 + $0xd0] ss:$8 sps:$4 sm:$0xff]   ;;  %v5742_v49 = vld [vmem:[#allocation8 + $0xe4] ss:$8 sps:$4 sm:$0xff]  }
 0x2ef   :  { %3670 = vmatprep.subr.bf16.mxu1 %v5122_v50  ;;  %v5740_v50 = vld [vmem:[#allocation8 + $0xe0] ss:$8 sps:$4 sm:$0xff]  }
 0x2f1   :  { %3589 = vmatpush1.bf16.msra.mxu0 %v5119_v54  ;;  %v6190_v54 = vshrl.u32 %v2041_v53, 7  ;;  %v5799_v53 = vld [vmem:[#allocation8 + $0x214] ss:$8 sps:$4 sm:$0xff]  }
 0x2f2   :  { %3671 = vmatpush1.bf16.msra.mxu1 %v5121_v55  ;;  %3590 = vmatprep.subr.bf16.mxu0 %v5128_v15  ;;  %v6196_v15 = vld [vmem:[%s6245_s3] sm:$0xff] }
 0x2f3   :  { %3672 = vmatprep.subr.bf16.mxu1 %v5130_v56  ;;  %v2043_v55 = vsub.s32 0, %v6190_v54  ;;  %v2047_v56 = vsub.s32 1, %v6190_v54  ;;  %v2055_v24 = vsub.s32 3, %v6190_v54 }
 0x2f5   :  { %3591 = vmatpush1.bf16.msra.mxu0 %v5127_v62  ;;  %v2044_v57 = vrot.slane %v6196_v15, %v2043_v55  ;;  %v2048_v58 = vrot.slane %v6196_v15, %v2047_v56  ;;  %v2056_v60 = vrot.slane %v6196_v15, %v2055_v24  ;;  %v5797_v24 = vld [vmem:[#allocation8 + $0x210] ss:$8 sps:$4 sm:$0xff]  }
 0x2f6   :  { %3673 = vmatpush1.bf16.msra.mxu1 %v5129_v63  ;;  %3592 = vmatprep.subr.bf16.mxu0 %v5136_v1 }
 0x2f7   :  { %3674 = vmatprep.subr.bf16.mxu1 %v5138_v2 }
 0x2f9   :  { %3593 = vmatpush1.bf16.msra.mxu0 %v5135_v8 }
 0x2fa   :  { %3675 = vmatpush1.bf16.msra.mxu1 %v5137_v9  ;;  %3594 = vmatprep.subr.bf16.mxu0 %v5144_v11 }
 0x2fb   :  { %3676 = vmatprep.subr.bf16.mxu1 %v5146_v33 }
 0x2fd   :  { %3595 = vmatpush1.bf16.msra.mxu0 %v5143_v17 }
 0x2fe   :  { %3677 = vmatpush1.bf16.msra.mxu1 %v5145_v18  ;;  %3596 = vmatprep.subr.bf16.mxu0 %v5152_v61  ;;  %v5751_v18 = vld [vmem:[#allocation8 + $0x114] ss:$8 sps:$4 sm:$0xff]  }
 0x2ff   :  { %3678 = vmatprep.subr.bf16.mxu1 %v5154_v20  ;;  %v5749_v20 = vld [vmem:[#allocation8 + $0x110] ss:$8 sps:$4 sm:$0xff]  }
 0x301   :  { %3597 = vmatpush1.bf16.msra.mxu0 %v5151_v59  ;;  %v5754_v59 = vld [vmem:[#allocation8 + $0x124] ss:$8 sps:$4 sm:$0xff]  }
 0x302   :  { %3679 = vmatpush1.bf16.msra.mxu1 %v5153_v21  ;;  %4485 = vmatprep.subr.bf16.mxu0 %v5700_v22  ;;  %v5752_v21 = vld [vmem:[#allocation8 + $0x120] ss:$8 sps:$4 sm:$0xff]   ;;  %v5757_v22 = vld [vmem:[#allocation8 + $0x134] ss:$8 sps:$4 sm:$0xff]  }
 0x304   :  { %3599 = vmatmul.mubr.bf16.vlgmr.msra.gmra.mrb[8].mxu0 %v6170_v27 }
 0x305   :  { %3681 = vmatmul.mubr.bf16.vlgmr.msra.gmra.mrb[12].mxu1 %v6170_v27  ;;  %4486 = vmatpush1.bf16.msra.mxu0 %v5698_v23  ;;  %v5718_v27 = vld [vmem:[#allocation8 + $0x64] ss:$8 sps:$4 sm:$0xff]   ;;  %v5755_v23 = vld [vmem:[#allocation8 + $0x130] ss:$8 sps:$4 sm:$0xff]  }
 0x306   :  { %4487 = vmatprep.subr.bf16.mxu0 %v5703_v26  ;;  %v5760_v26 = vld [vmem:[#allocation8 + $0x144] ss:$8 sps:$4 sm:$0xff]  }
 0x309   :  { %4488 = vmatpush1.bf16.msra.mxu0 %v5701_v28  ;;  %v5758_v28 = vld [vmem:[#allocation8 + $0x140] ss:$8 sps:$4 sm:$0xff]  }
 0x30a   :  { %4489 = vmatprep.subr.bf16.mxu0 %v5706_v0  ;;  %v5763_v0 = vld [vmem:[#allocation8 + $0x154] ss:$8 sps:$4 sm:$0xff]  }
 0x30d   :  { %4490 = vmatpush1.bf16.msra.mxu0 %v5704_v29  ;;  %v5761_v29 = vld [vmem:[#allocation8 + $0x150] ss:$8 sps:$4 sm:$0xff]  }
 0x30e   :  { %4491 = vmatprep.subr.bf16.mxu0 %v5709_v30  ;;  %v5766_v30 = vld [vmem:[#allocation8 + $0x164] ss:$8 sps:$4 sm:$0xff]  }
 0x311   :  { %4492 = vmatpush1.bf16.msra.mxu0 %v5707_v31  ;;  %v5764_v31 = vld [vmem:[#allocation8 + $0x160] ss:$8 sps:$4 sm:$0xff]  }
 0x312   :  { %4493 = vmatprep.subr.bf16.mxu0 %v5712_v19  ;;  %v5769_v19 = vld [vmem:[#allocation8 + $0x174] ss:$8 sps:$4 sm:$0xff]  }
 0x315   :  { %4494 = vmatpush1.bf16.msra.mxu0 %v5710_v32  ;;  %v5767_v32 = vld [vmem:[#allocation8 + $0x170] ss:$8 sps:$4 sm:$0xff]  }
 0x316   :  { %4495 = vmatprep.subr.bf16.mxu0 %v5715_v34  ;;  %v5772_v34 = vld [vmem:[#allocation8 + $0x184] ss:$8 sps:$4 sm:$0xff]  }
 0x319   :  { %4496 = vmatpush1.bf16.msra.mxu0 %v5713_v35  ;;  %v5770_v35 = vld [vmem:[#allocation8 + $0x180] ss:$8 sps:$4 sm:$0xff]  }
 0x31a   :  { %4497 = vmatprep.subr.bf16.mxu0 %v5718_v27  ;;  %v5775_v27 = vld [vmem:[#allocation8 + $0x194] ss:$8 sps:$4 sm:$0xff]  }
 0x31d   :  { %4498 = vmatpush1.bf16.msra.mxu0 %v5716_v36  ;;  %v5773_v36 = vld [vmem:[#allocation8 + $0x190] ss:$8 sps:$4 sm:$0xff]  }
 0x31e   :  { %4499 = vmatprep.subr.bf16.mxu0 %v5721_v40  ;;  %v5778_v40 = vld [vmem:[#allocation8 + $0x1a4] ss:$8 sps:$4 sm:$0xff]  }
 0x321   :  { %4500 = vmatpush1.bf16.msra.mxu0 %v5719_v41  ;;  %v5776_v41 = vld [vmem:[#allocation8 + $0x1a0] ss:$8 sps:$4 sm:$0xff]  }
 0x322   :  { %4501 = vmatprep.subr.bf16.mxu0 %v5724_v43  ;;  %v5781_v43 = vld [vmem:[#allocation8 + $0x1b4] ss:$8 sps:$4 sm:$0xff]  }
 0x325   :  { %4502 = vmatpush1.bf16.msra.mxu0 %v5722_v46  ;;  %v5779_v46 = vld [vmem:[#allocation8 + $0x1b0] ss:$8 sps:$4 sm:$0xff]  }
 0x326   :  { %4503 = vmatprep.subr.bf16.mxu0 %v5727_v47  ;;  %v5784_v47 = vld [vmem:[#allocation8 + $0x1c4] ss:$8 sps:$4 sm:$0xff]  }
 0x329   :  { %4504 = vmatpush1.bf16.msra.mxu0 %v5725_v37  ;;  %v5782_v37 = vld [vmem:[#allocation8 + $0x1c0] ss:$8 sps:$4 sm:$0xff]  }
 0x32a   :  { %4505 = vmatprep.subr.bf16.mxu0 %v5730_v38  ;;  %v2051_v38 = vsub.s32 2, %v6190_v54 }
 0x32d   :  { %4506 = vmatpush1.bf16.msra.mxu0 %v5728_v39  ;;  %v5787_v39 = vld [vmem:[#allocation8 + $0x1d4] ss:$8 sps:$4 sm:$0xff]  }
 0x32e   :  { %4507 = vmatprep.subr.bf16.mxu0 %v5733_v42  ;;  %v5785_v42 = vld [vmem:[#allocation8 + $0x1d0] ss:$8 sps:$4 sm:$0xff]  }
 0x331   :  { %4508 = vmatpush1.bf16.msra.mxu0 %v5731_v44  ;;  %v2052_v44 = vrot.slane %v6196_v15, %v2051_v38  ;;  %v5844_v38 = vld [vmem:[#allocation8 + $0x304] ss:$8 sps:$4 sm:$0xff]  }
 0x332   :  { %4509 = vmatprep.subr.bf16.mxu0 %v5736_v45  ;;  %v5790_v45 = vld [vmem:[#allocation8 + $0x1e4] ss:$8 sps:$4 sm:$0xff]  }
 0x335   :  { %4510 = vmatpush1.bf16.msra.mxu0 %v5734_v10  ;;  %v5788_v10 = vld [vmem:[#allocation8 + $0x1e0] ss:$8 sps:$4 sm:$0xff]  }
 0x336   :  { %4511 = vmatprep.subr.bf16.mxu0 %v5739_v48 }
 0x339   :  { %4512 = vmatpush1.bf16.msra.mxu0 %v5737_v6  ;;  %v5793_v6 = vld [vmem:[#allocation8 + $0x1f4] ss:$8 sps:$4 sm:$0xff]  }
 0x33a   :  { %4513 = vmatprep.subr.bf16.mxu0 %v5742_v49  ;;  %v5791_v49 = vld [vmem:[#allocation8 + $0x1f0] ss:$8 sps:$4 sm:$0xff]  }
 0x33d   :  { %4514 = vmatpush1.bf16.msra.mxu0 %v5740_v50 }
 0x33e   :  { %4515 = vmatprep.subr.bf16.mxu0 %v5745_v51  ;;  %v5796_v51 = vld [vmem:[#allocation8 + $0x204] ss:$8 sps:$4 sm:$0xff]  }
 0x341   :  { %4516 = vmatpush1.bf16.msra.mxu0 %v5743_v25  ;;  %v5794_v25 = vld [vmem:[#allocation8 + $0x200] ss:$8 sps:$4 sm:$0xff]  }
 0x342   :  { %4526 = vmatprep.subr.bf16.mxu0 %v5748_v52 }
 0x357   :  { %v3436_v62 = vpop.f32.mrb[4].mxu0  ;;  %v6207_v63 = vpop.f32.mrb[8].mxu1 }
 0x358   :  { %v5285_v1 = vadd.f32 %v3436_v62, %v2044_v57  ;;  %v3438_v2 = vpop.f32.mrb[5].mxu0  ;;  %v3520_v3 = vpop.f32.mrb[9].mxu1  ;;  %v5287_v48 = vadd.f32 %v6207_v63, %v2052_v44  ;;  %v5802_v57 = vld [vmem:[#allocation8 + $0x224] ss:$8 sps:$4 sm:$0xff]   ;;  %v5803_v62 = vld [vmem:[#allocation8 + $0x230] ss:$8 sps:$4 sm:$0xff]  }
 0x359   :  { %v5286_v4 = vadd.f32 %v3438_v2, %v2048_v58  ;;  %v5288_v5 = vadd.f32 %v3520_v3, %v2056_v60  ;;  %v3440_v7 = vpop.f32.mrb[6].mxu0  ;;  %v3522_v8 = vpop.f32.mrb[10].mxu1  ;;  %v5800_v58 = vld [vmem:[#allocation8 + $0x220] ss:$8 sps:$4 sm:$0xff]   ;;  %v5805_v60 = vld [vmem:[#allocation8 + $0x234] ss:$8 sps:$4 sm:$0xff]  }
 0x35a   :  { %v3689_v9 = vmax.f32 %v5285_v1, 0.0  ;;  %v3441_v11 = vpop.f32.mrb[7].mxu0  ;;  %v3523_v33 = vpop.f32.mrb[11].mxu1  ;;  %v3691_v50 = vmax.f32 %v5287_v48, 0.0  ;;  %v5808_v63 = vld [vmem:[#allocation8 + $0x244] ss:$8 sps:$4 sm:$0xff]  }
 0x35b   :  { %v3690_v12 = vmax.f32 %v5286_v4, 0.0  ;;  %v3692_v13 = vmax.f32 %v5288_v5, 0.0  ;;  %v5806_v1 = vld [vmem:[#allocation8 + $0x240] ss:$8 sps:$4 sm:$0xff]   ;;  %v5811_v2 = vld [vmem:[#allocation8 + $0x254] ss:$8 sps:$4 sm:$0xff]  }
 0x35c   :  { %v3697_v17 = vpack.c.bf16 %v3689_v9, %v3689_v9  ;;  %v3699_v52 = vpack.c.bf16 %v3691_v50, %v3691_v50  ;;  %v5809_v3 = vld [vmem:[#allocation8 + $0x250] ss:$8 sps:$4 sm:$0xff]   ;;  %v5814_v4 = vld [vmem:[#allocation8 + $0x264] ss:$8 sps:$4 sm:$0xff]   ;;  %v5812_v5 = vld [vmem:[#allocation8 + $0x260] ss:$8 sps:$4 sm:$0xff]  }
 0x35d   :  { %v3698_v14 = vpack.c.bf16 %v3690_v12, %v3690_v12  ;;  %v3700_v61 = vpack.c.bf16 %v3692_v13, %v3692_v13  ;;  %v5817_v7 = vld [vmem:[#allocation8 + $0x274] ss:$8 sps:$4 sm:$0xff]   ;;  %v5815_v8 = vld [vmem:[#allocation8 + $0x270] ss:$8 sps:$4 sm:$0xff]   ;;  %v5820_v9 = vld [vmem:[#allocation8 + $0x284] ss:$8 sps:$4 sm:$0xff]  }
 0x35e   :  { %v5818_v11 = vld [vmem:[#allocation8 + $0x280] ss:$8 sps:$4 sm:$0xff]   ;;  %v5823_v33 = vld [vmem:[#allocation8 + $0x294] ss:$8 sps:$4 sm:$0xff]   ;;  %v5821_v12 = vld [vmem:[#allocation8 + $0x290] ss:$8 sps:$4 sm:$0xff]  }
 0x35f   :  { %4517 = vmatprep.mubr.bf16.mxu0 %v3698_v14  ;;  %v5826_v13 = vld [vmem:[#allocation8 + $0x2a4] ss:$8 sps:$4 sm:$0xff]   ;;  %v5824_v14 = vld [vmem:[#allocation8 + $0x2a0] ss:$8 sps:$4 sm:$0xff]   ;;  %v5845_v50 = vld [vmem:[#allocation8 + $0x310] ss:$8 sps:$4 sm:$0xff]  }
 0x360   :  { %4518 = vmatmul.mubr.bf16.vlgmr.msra.gmra.mrb[12].mxu0 %v3697_v17  ;;  %v5827_v17 = vld [vmem:[#allocation8 + $0x2b0] ss:$8 sps:$4 sm:$0xff]  }
 0x361   :  { %4527 = vmatpush1.bf16.msra.mxu0 %v5746_v16  ;;  %4558 = vmatprep.mubr.bf16.mxu0 %v3700_v61  ;;  %v5829_v16 = vld [vmem:[#allocation8 + $0x2b4] ss:$8 sps:$4 sm:$0xff]   ;;  %v5830_v61 = vld [vmem:[#allocation8 + $0x2c0] ss:$8 sps:$4 sm:$0xff]  }
 0x362   :  { %4528 = vmatprep.subr.bf16.mxu0 %v5751_v18  ;;  %v5832_v18 = vld [vmem:[#allocation8 + $0x2c4] ss:$8 sps:$4 sm:$0xff]  }
 0x365   :  { %4529 = vmatpush1.bf16.msra.mxu0 %v5749_v20  ;;  %v5835_v20 = vld [vmem:[#allocation8 + $0x2d4] ss:$8 sps:$4 sm:$0xff]  }
 0x366   :  { %4530 = vmatprep.subr.bf16.mxu0 %v5754_v59  ;;  %v2059_v59 = vsub.s32 4, %v6190_v54 }
 0x369   :  { %4531 = vmatpush1.bf16.msra.mxu0 %v5752_v21  ;;  %v5833_v21 = vld [vmem:[#allocation8 + $0x2d0] ss:$8 sps:$4 sm:$0xff]  }
 0x36a   :  { %4532 = vmatprep.subr.bf16.mxu0 %v5757_v22  ;;  %v2063_v22 = vsub.s32 5, %v6190_v54 }
 0x36d   :  { %4533 = vmatpush1.bf16.msra.mxu0 %v5755_v23  ;;  %v2071_v23 = vsub.s32 7, %v6190_v54 }
 0x36e   :  { %4534 = vmatprep.subr.bf16.mxu0 %v5760_v26  ;;  %v5838_v26 = vld [vmem:[#allocation8 + $0x2e4] ss:$8 sps:$4 sm:$0xff]  }
 0x371   :  { %4535 = vmatpush1.bf16.msra.mxu0 %v5758_v28  ;;  %v2060_v28 = vrot.slane %v6196_v15, %v2059_v59 }
 0x372   :  { %4536 = vmatprep.subr.bf16.mxu0 %v5763_v0  ;;  %v2064_v0 = vrot.slane %v6196_v15, %v2063_v22  ;;  %v5887_v22 = vld [vmem:[#allocation8 + $0x3f0] ss:$8 sps:$4 sm:$0xff]  }
 0x375   :  { %4537 = vmatpush1.bf16.msra.mxu0 %v5761_v29  ;;  %v5836_v29 = vld [vmem:[#allocation8 + $0x2e0] ss:$8 sps:$4 sm:$0xff]  }
 0x376   :  { %4538 = vmatprep.subr.bf16.mxu0 %v5766_v30  ;;  %v2072_v30 = vrot.slane %v6196_v15, %v2071_v23 }
 0x379   :  { %4539 = vmatpush1.bf16.msra.mxu0 %v5764_v31  ;;  %v5841_v31 = vld [vmem:[#allocation8 + $0x2f4] ss:$8 sps:$4 sm:$0xff]  }
 0x37a   :  { %4540 = vmatprep.subr.bf16.mxu0 %v5769_v19 }
 0x37d   :  { %4541 = vmatpush1.bf16.msra.mxu0 %v5767_v32 }
 0x37e   :  { %4542 = vmatprep.subr.bf16.mxu0 %v5772_v34 }
 0x381   :  { %4543 = vmatpush1.bf16.msra.mxu0 %v5770_v35 }
 0x382   :  { %4544 = vmatprep.subr.bf16.mxu0 %v5775_v27 }
 0x385   :  { %4545 = vmatpush1.bf16.msra.mxu0 %v5773_v36 }
 0x386   :  { %4546 = vmatprep.subr.bf16.mxu0 %v5778_v40 }
 0x389   :  { %4547 = vmatpush1.bf16.msra.mxu0 %v5776_v41  ;;  %v5839_v41 = vld [vmem:[#allocation8 + $0x2f0] ss:$8 sps:$4 sm:$0xff]  }
 0x38a   :  { %4548 = vmatprep.subr.bf16.mxu0 %v5781_v43 }
 0x38d   :  { %4549 = vmatpush1.bf16.msra.mxu0 %v5779_v46 }
 0x38e   :  { %4550 = vmatprep.subr.bf16.mxu0 %v5784_v47 }
 0x391   :  { %4551 = vmatpush1.bf16.msra.mxu0 %v5782_v37 }
 0x392   :  { %4552 = vmatprep.subr.bf16.mxu0 %v5787_v39 }
 0x395   :  { %4553 = vmatpush1.bf16.msra.mxu0 %v5785_v42 }
 0x396   :  { %4554 = vmatprep.subr.bf16.mxu0 %v5790_v45 }
 0x399   :  { %4555 = vmatpush1.bf16.msra.mxu0 %v5788_v10  ;;  %v5842_v10 = vld [vmem:[#allocation8 + $0x300] ss:$8 sps:$4 sm:$0xff]  }
 0x39a   :  { %4556 = vmatprep.subr.bf16.mxu0 %v5793_v6  ;;  %v5847_v6 = vld [vmem:[#allocation8 + $0x314] ss:$8 sps:$4 sm:$0xff]  }
 0x39d   :  { %4557 = vmatpush1.bf16.msra.mxu0 %v5791_v49 }
 0x39e   :  { %4567 = vmatprep.subr.bf16.mxu0 %v5796_v51  ;;  %v5850_v51 = vld [vmem:[#allocation8 + $0x324] ss:$8 sps:$4 sm:$0xff]  }
 0x3a0   :  { %4559 = vmatmul.mubr.bf16.vlgmr.msra.gmra.mrb[12].mxu0 %v3699_v52  ;;  %v5853_v52 = vld [vmem:[#allocation8 + $0x334] ss:$8 sps:$4 sm:$0xff]  }
 0x3a1   :  { %4568 = vmatpush1.bf16.msra.mxu0 %v5794_v25  ;;  %v5848_v25 = vld [vmem:[#allocation8 + $0x320] ss:$8 sps:$4 sm:$0xff]  }
 0x3a2   :  { %4569 = vmatprep.subr.bf16.mxu0 %v5799_v53  ;;  %v5851_v53 = vld [vmem:[#allocation8 + $0x330] ss:$8 sps:$4 sm:$0xff]  }
 0x3a5   :  { %4570 = vmatpush1.bf16.msra.mxu0 %v5797_v24  ;;  %v5856_v24 = vld [vmem:[#allocation8 + $0x344] ss:$8 sps:$4 sm:$0xff]  }
 0x3a6   :  { %4571 = vmatprep.subr.bf16.mxu0 %v5802_v57  ;;  %v5854_v57 = vld [vmem:[#allocation8 + $0x340] ss:$8 sps:$4 sm:$0xff]  }
 0x3a9   :  { %4572 = vmatpush1.bf16.msra.mxu0 %v5800_v58  ;;  %v5859_v58 = vld [vmem:[#allocation8 + $0x354] ss:$8 sps:$4 sm:$0xff]  }
 0x3aa   :  { %4573 = vmatprep.subr.bf16.mxu0 %v5805_v60  ;;  %v5857_v60 = vld [vmem:[#allocation8 + $0x350] ss:$8 sps:$4 sm:$0xff]  }
 0x3ad   :  { %4574 = vmatpush1.bf16.msra.mxu0 %v5803_v62  ;;  %v5862_v62 = vld [vmem:[#allocation8 + $0x364] ss:$8 sps:$4 sm:$0xff]  }
 0x3ae   :  { %4575 = vmatprep.subr.bf16.mxu0 %v5808_v63  ;;  %v5860_v63 = vld [vmem:[#allocation8 + $0x360] ss:$8 sps:$4 sm:$0xff]  }
 0x3b1   :  { %4576 = vmatpush1.bf16.msra.mxu0 %v5806_v1  ;;  %v5865_v1 = vld [vmem:[#allocation8 + $0x374] ss:$8 sps:$4 sm:$0xff]  }
 0x3b2   :  { %4577 = vmatprep.subr.bf16.mxu0 %v5811_v2  ;;  %v5863_v2 = vld [vmem:[#allocation8 + $0x370] ss:$8 sps:$4 sm:$0xff]  }
 0x3b5   :  { %4578 = vmatpush1.bf16.msra.mxu0 %v5809_v3  ;;  %v5868_v3 = vld [vmem:[#allocation8 + $0x384] ss:$8 sps:$4 sm:$0xff]  }
 0x3b6   :  { %4579 = vmatprep.subr.bf16.mxu0 %v5814_v4  ;;  %v5866_v4 = vld [vmem:[#allocation8 + $0x380] ss:$8 sps:$4 sm:$0xff]  }
 0x3b9   :  { %4580 = vmatpush1.bf16.msra.mxu0 %v5812_v5  ;;  %v5871_v5 = vld [vmem:[#allocation8 + $0x394] ss:$8 sps:$4 sm:$0xff]  }
 0x3ba   :  { %4581 = vmatprep.subr.bf16.mxu0 %v5817_v7  ;;  %v5869_v7 = vld [vmem:[#allocation8 + $0x390] ss:$8 sps:$4 sm:$0xff]  }
 0x3bd   :  { %4582 = vmatpush1.bf16.msra.mxu0 %v5815_v8  ;;  %v5874_v8 = vld [vmem:[#allocation8 + $0x3a4] ss:$8 sps:$4 sm:$0xff]  }
 0x3be   :  { %4583 = vmatprep.subr.bf16.mxu0 %v5820_v9  ;;  %v5872_v9 = vld [vmem:[#allocation8 + $0x3a0] ss:$8 sps:$4 sm:$0xff]  }
 0x3c1   :  { %4584 = vmatpush1.bf16.msra.mxu0 %v5818_v11  ;;  %v5877_v11 = vld [vmem:[#allocation8 + $0x3b4] ss:$8 sps:$4 sm:$0xff]  }
 0x3c2   :  { %4585 = vmatprep.subr.bf16.mxu0 %v5823_v33  ;;  %v5875_v33 = vld [vmem:[#allocation8 + $0x3b0] ss:$8 sps:$4 sm:$0xff]  }
 0x3c5   :  { %4586 = vmatpush1.bf16.msra.mxu0 %v5821_v12  ;;  %v5880_v12 = vld [vmem:[#allocation8 + $0x3c4] ss:$8 sps:$4 sm:$0xff]  }
 0x3c6   :  { %4587 = vmatprep.subr.bf16.mxu0 %v5826_v13  ;;  %v5878_v13 = vld [vmem:[#allocation8 + $0x3c0] ss:$8 sps:$4 sm:$0xff]  }
 0x3c9   :  { %4588 = vmatpush1.bf16.msra.mxu0 %v5824_v14  ;;  %v2067_v14 = vsub.s32 6, %v6190_v54 }
 0x3ca   :  { %4589 = vmatprep.subr.bf16.mxu0 %v5829_v16  ;;  %v5883_v16 = vld [vmem:[#allocation8 + $0x3d4] ss:$8 sps:$4 sm:$0xff]  }
 0x3cd   :  { %4590 = vmatpush1.bf16.msra.mxu0 %v5827_v17  ;;  %v5881_v17 = vld [vmem:[#allocation8 + $0x3d0] ss:$8 sps:$4 sm:$0xff]  }
 0x3ce   :  { %4591 = vmatprep.subr.bf16.mxu0 %v5832_v18  ;;  %v2068_v18 = vrot.slane %v6196_v15, %v2067_v14 }
 0x3d1   :  { %4592 = vmatpush1.bf16.msra.mxu0 %v5830_v61  ;;  %v5886_v61 = vld [vmem:[#allocation8 + $0x3e4] ss:$8 sps:$4 sm:$0xff]  }
 0x3d2   :  { %4593 = vmatprep.subr.bf16.mxu0 %v5835_v20  ;;  %v5884_v20 = vld [vmem:[#allocation8 + $0x3e0] ss:$8 sps:$4 sm:$0xff]  }
 0x3d5   :  { %4594 = vmatpush1.bf16.msra.mxu0 %v5833_v21  ;;  %v5889_v21 = vld [vmem:[#allocation8 + $0x3f4] ss:$8 sps:$4 sm:$0xff]  }
 0x3d6   :  { %4595 = vmatprep.subr.bf16.mxu0 %v5838_v26 }
 0x3d7   :  { %v3600_v19 = vpop.f32.mrb[8].mxu0 }
 0x3d8   :  { %v5289_v32 = vadd.f32 %v3600_v19, %v2060_v28  ;;  %v6218_v34 = vpop.f32.mrb[12].mxu1  ;;  %v3602_v35 = vpop.f32.mrb[9].mxu0  ;;  %v3833_v28 = vld [vmem:[%s6247_s5] sm:$0x3] }
 0x3d9   :  { %v5290_v27 = vadd.f32 %v3602_v35, %v2064_v0  ;;  %v3684_v36 = vpop.f32.mrb[13].mxu1  ;;  %v3604_v40 = vpop.f32.mrb[10].mxu0  ;;  %4596 = vmatpush1.bf16.msra.mxu0 %v5836_v29  ;;  %v5291_v59 = vadd.f32 %v6218_v34, %v2068_v18  ;;  %v3838_v15 = vrot.slane %v3833_v28, %v2043_v55  ;;  %v3842_v0 = vrot.slane %v3833_v28, %v2047_v56 }
 0x3da   :  { %v3693_v43 = vmax.f32 %v5289_v32, 0.0  ;;  %v5292_v46 = vadd.f32 %v3684_v36, %v2072_v30  ;;  %v3686_v47 = vpop.f32.mrb[14].mxu1  ;;  %v3605_v37 = vpop.f32.mrb[11].mxu0  ;;  %4597 = vmatprep.subr.bf16.mxu0 %v5841_v31 }
 0x3db   :  { %v3694_v39 = vmax.f32 %v5290_v27, 0.0  ;;  %v3687_v42 = vpop.f32.mrb[15].mxu1  ;;  %v3695_v23 = vmax.f32 %v5291_v59, 0.0 }
 0x3dc   :  { %v3696_v44 = vmax.f32 %v5292_v46, 0.0  ;;  %v3701_v48 = vpack.c.bf16 %v3693_v43, %v3693_v43 }
 0x3dd   :  { %v3702_v45 = vpack.c.bf16 %v3694_v39, %v3694_v39  ;;  %4598 = vmatpush1.bf16.msra.mxu0 %v5839_v41  ;;  %v3703_v26 = vpack.c.bf16 %v3695_v23, %v3695_v23 }
 0x3de   :  { %4608 = vmatprep.subr.bf16.mxu0 %v5844_v38  ;;  %v3704_v49 = vpack.c.bf16 %v3696_v44, %v3696_v44 }
 0x3df   :  { %4599 = vmatprep.mubr.bf16.mxu0 %v3702_v45 }
 0x3e0   :  { %4600 = vmatmul.mubr.bf16.vlgmr.msra.gmra.mrb[12].mxu0 %v3701_v48 }
 0x3e1   :  { %4609 = vmatpush1.bf16.msra.mxu0 %v5842_v10  ;;  %4640 = vmatprep.mubr.bf16.mxu0 %v3704_v49 }
 0x3e2   :  { %4610 = vmatprep.subr.bf16.mxu0 %v5847_v6 }
 0x3e5   :  { %4611 = vmatpush1.bf16.msra.mxu0 %v5845_v50 }
 0x3e6   :  { %4612 = vmatprep.subr.bf16.mxu0 %v5850_v51 }
 0x3e9   :  { %4613 = vmatpush1.bf16.msra.mxu0 %v5848_v25 }
 0x3ea   :  { %4614 = vmatprep.subr.bf16.mxu0 %v5853_v52 }
 0x3ed   :  { %4615 = vmatpush1.bf16.msra.mxu0 %v5851_v53 }
 0x3ee   :  { %4616 = vmatprep.subr.bf16.mxu0 %v5856_v24 }
 0x3f1   :  { %4617 = vmatpush1.bf16.msra.mxu0 %v5854_v57 }
 0x3f2   :  { %4618 = vmatprep.subr.bf16.mxu0 %v5859_v58 }
 0x3f5   :  { %4619 = vmatpush1.bf16.msra.mxu0 %v5857_v60 }
 0x3f6   :  { %4620 = vmatprep.subr.bf16.mxu0 %v5862_v62 }
 0x3f9   :  { %4621 = vmatpush1.bf16.msra.mxu0 %v5860_v63 }
 0x3fa   :  { %4622 = vmatprep.subr.bf16.mxu0 %v5865_v1 }
 0x3fd   :  { %4623 = vmatpush1.bf16.msra.mxu0 %v5863_v2 }
 0x3fe   :  { %4624 = vmatprep.subr.bf16.mxu0 %v5868_v3 }
 0x401   :  { %4625 = vmatpush1.bf16.msra.mxu0 %v5866_v4 }
 0x402   :  { %4626 = vmatprep.subr.bf16.mxu0 %v5871_v5 }
 0x405   :  { %4627 = vmatpush1.bf16.msra.mxu0 %v5869_v7 }
 0x406   :  { %4628 = vmatprep.subr.bf16.mxu0 %v5874_v8 }
 0x409   :  { %4629 = vmatpush1.bf16.msra.mxu0 %v5872_v9 }
 0x40a   :  { %4630 = vmatprep.subr.bf16.mxu0 %v5877_v11 }
 0x40d   :  { %4631 = vmatpush1.bf16.msra.mxu0 %v5875_v33 }
 0x40e   :  { %4632 = vmatprep.subr.bf16.mxu0 %v5880_v12 }
 0x411   :  { %4633 = vmatpush1.bf16.msra.mxu0 %v5878_v13 }
 0x412   :  { %4634 = vmatprep.subr.bf16.mxu0 %v5883_v16 }
 0x415   :  { %4635 = vmatpush1.bf16.msra.mxu0 %v5881_v17 }
 0x416   :  { %4636 = vmatprep.subr.bf16.mxu0 %v5886_v61 }
 0x419   :  { %4637 = vmatpush1.bf16.msra.mxu0 %v5884_v20 }
 0x41a   :  { %4638 = vmatprep.subr.bf16.mxu0 %v5889_v21 }
 0x41d   :  { %4639 = vmatpush1.bf16.msra.mxu0 %v5887_v22 }
 0x420   :  { %4641 = vmatmul.mubr.bf16.vlgmr.msra.gmra.mrb[12].mxu0 %v3703_v26 }
 0x4f3   :  { %v4642_v29 = vpop.f32.mrb[12].mxu0 }
 0x4f4   :  { %v5293_v30 = vadd.f32 %v4642_v29, %v3838_v15  ;;  %v4644_v31 = vpop.f32.mrb[13].mxu0 }
 0x4f5   :  { %v5294_v19 = vadd.f32 %v4644_v31, %v3842_v0  ;;  %v4646_v32 = vpop.f32.mrb[14].mxu0 }
 0x4f6   :  { %4649 = vst [vmem:[#allocation10] sm:$0xff] %v5293_v30  ;;  %v4647_v34 = vpop.f32.mrb[15].mxu0 }
 0x4f7   :  { %4650 = vst [vmem:[#allocation10 + $0x8] sm:$0xff] %v5294_v19 }
 0x4f8   :  { %5990 = shalt.err (!%p5987_p8)
}
 0x4f9   :  { %s5991_s29 = scalar_lea.hbm %s6248_s6, 256 }
 0x4fa   :  { %p5992_p9 = scmp.ne.s32.totalorder %s6248_s6, %s5991_s29  ;;  %p5995_p10 = scmp.lt.u32.totalorder %s5991_s29, %s6248_s6 }
 0x4fc   :  { %p5997_p11 = pnand %p5995_p10, %p5992_p9 }
 0x4fe   :  { %6000 = shalt.err (!%p5997_p11)
}
 0x4ff   :  { %4660 = dma.vmem_to_hbm [thread:$0]  %s4658_s26, 256, %s6248_s6, [#allocation4]  }
 0x500   :  { %6007 = dma.done.wait [#allocation4], 256  }
 0x501   :  { %6008 = vsyncadd [#allocation4], 4294967040 }
 0x502   :  { %4664 = vsyncpa [#allocation3], 1 }
 0x503   :  { %4665 = vsyncpa [#allocation6], 1 }
 0x504   :  { %4666 = vsyncpa [#allocation9], 1 }
 0x505   :  { %4667 = vsyncpa [#allocation4], 1 }

</bundles_post_ra>
